<compile_context>
chip_gen: v7x
topology: tpu7x:2x2x1
jax: 0.10.0
libtpu: 0.0.40
codegen_flags: <defaults>
</compile_context>

<pallas_src>
import functools

import jax
import jax.numpy as jnp
from jax.experimental import pallas as pl
from jax.experimental.pallas import tpu as pltpu


def _round_up(x, m):
    return (x + m - 1) // m * m


def _num_tensorcores():
    """Best-effort detection of multi-TensorCore chips (v7x). Defaults to 1."""
    try:
        kind = (getattr(jax.devices()[0], "device_kind", "") or "").lower()
        return 2 if ("v7" in kind or "7x" in kind) else 1
    except Exception:
        return 1


def _pick_batch_tile(B, *, max_bt=256, prefer_two_tiles=False):
    """Batch tile (MXU M dim). Multiple of 8; multiple of 16 whenever the grid
    has more than one tile (bf16 input blocks); >=2 tiles on 2-TC chips when
    the batch is large enough to split."""
    Bt = min(max_bt, _round_up(B, 8))
    B_pad = _round_up(B, Bt)
    if prefer_two_tiles and B_pad // Bt == 1 and Bt >= 32:
        Bt = _round_up(Bt // 2, 16)
        B_pad = _round_up(B, Bt)
    if B_pad // Bt > 1 and Bt % 16 != 0:
        Bt = _round_up(Bt, 16)
        B_pad = _round_up(B, Bt)
    return Bt, B_pad


def make_kernel(T, C_in, H, num_layers, Bt, NC_pad):
    C1, C2 = 32, 64          # conv1 / conv2 output channels (fixed by the module)
    G = 4 * H                # gate width

    def kernel(x_ref, w1_ref, b1_ref, w2_ref, b2_ref, *rest):
        lstm_refs = rest[: 3 * num_layers]          # (wih_bf16, whh_bf16, bias_f32) per layer
        wfc_ref = rest[3 * num_layers]              # (H, NC_pad) f32
        bfc_ref = rest[3 * num_layers + 1]          # (1, NC_pad) f32
        out_ref = rest[3 * num_layers + 2]          # (Bt, NC_pad) f32
        xproj_ref = rest[3 * num_layers + 3]        # VMEM (T, Bt, 4H) f32
        seq_ref = rest[3 * num_layers + 4]          # VMEM (T, Bt, H) bf16

        def conv_block(x3d, w_ref, b_ref, c_out):
            # x3d: (T, Bt, c_in) bf16.  Conv1d(k=3, padding=1) along the time
            # axis: ONE matmul against the N-concatenated tap weights
            # (c_in, 3*c_out), then leading-axis shift-adds to place the taps.
            c_in = x3d.shape[-1]
            y = jnp.dot(x3d.reshape(T * Bt, c_in), w_ref[...],
                        preferred_element_type=jnp.float32).reshape(T, Bt, 3 * c_out)
            y_prev = y[..., 0:c_out]                 # x[t] @ w[0]
            y_cur = y[..., c_out:2 * c_out]          # x[t] @ w[1]
            y_next = y[..., 2 * c_out:3 * c_out]     # x[t] @ w[2]
            zrow = jnp.zeros((1, Bt, c_out), jnp.float32)
            # out[t] = x[t-1]@w0 + x[t]@w1 + x[t+1]@w2  (whole-slab shifts).
            acc = y_cur
            acc = acc + jnp.concatenate([zrow, y_prev[:T - 1]], axis=0)
            acc = acc + jnp.concatenate([y_next[1:], zrow], axis=0)
            return jnp.maximum(acc + b_ref[...], 0.0).astype(jnp.bfloat16)

        # ---- conv1 + ReLU, conv2 + ReLU (time-major, bf16 activations) ----
        x = x_ref[...]                                   # (T, Bt, C_in) bf16
        h1 = conv_block(x, w1_ref, b1_ref, C1)           # (T, Bt, 32) bf16
        h2 = conv_block(h1, w2_ref, b2_ref, C2)          # (T, Bt, 64) bf16

        # ---- stacked LSTM, layer-major ----
        def input_proj(seq2d, layer):
            # seq2d: (T*Bt, in_dim) bf16 -> all-timestep gate inputs, f32.
            wih = lstm_refs[3 * layer][...]              # (in_dim, 4H) bf16
            bias = lstm_refs[3 * layer + 2][...]         # (1, 4H) f32 (= b_ih + b_hh)
            xp = jnp.dot(seq2d, wih, preferred_element_type=jnp.float32) + bias
            return xp.reshape(T, Bt, G)

        xproj_ref[...] = input_proj(h2.reshape(T * Bt, C2), 0)

        h = jnp.zeros((Bt, H), jnp.float32)
        for layer in range(num_layers):
            whh = lstm_refs[3 * layer + 1][...]          # (H, 4H) bf16, hoisted out of loop
            store_seq = layer + 1 < num_layers

            h = jnp.zeros((Bt, H), jnp.float32)
            c = jnp.zeros((Bt, H), jnp.float32)
            # Fully unrolled time loop (small static trip count): only the
            # bf16 (Bt, H) @ (H, 4H) recurrent matmul + gate math remain per step.
            for t in range(T):
                gates = xproj_ref[t] + jnp.dot(h.astype(jnp.bfloat16), whh,
                                               preferred_element_type=jnp.float32)
                # Gate columns were reordered host-side to [i, f, o | g]:
                # one sigmoid over 3H lanes + one tanh over H lanes.
                sg = jax.nn.sigmoid(gates[:, 0:3 * H])
                g_g = jnp.tanh(gates[:, 3 * H:4 * H])
                i_g = sg[:, 0:H]
                f_g = sg[:, H:2 * H]
                o_g = sg[:, 2 * H:3 * H]
                c = f_g * c + i_g * g_g
                h = o_g * jnp.tanh(c)
                if store_seq:
                    seq_ref[t] = h.astype(jnp.bfloat16)  # h-sequence feeds next layer

            if store_seq:
                xproj_ref[...] = input_proj(seq_ref[...].reshape(T * Bt, H), layer + 1)

        # dropout(p=0.3) is identity at inference; fc weights pre-padded to
        # NC_pad lanes so the final store is lane-dense.
        logits = jnp.dot(h, wfc_ref[...], preferred_element_type=jnp.float32) + bfc_ref[...]
        out_ref[...] = logits.astype(out_ref.dtype)

    return kernel


def init_params(key, input_size, hidden_size, num_layers, num_classes):
    """Deterministic synthetic parameters, canonical PyTorch-like math layout:
    conv taps (3, c_in, c_out); LSTM (in, 4H)/(H, 4H) with gate order (i,f,g,o)
    and a single combined bias (= b_ih + b_hh); fc (H, num_classes)."""
    scale = 0.1
    keys = jax.random.split(key, 6 + 3 * num_layers)
    w1 = scale * jax.random.normal(keys[0], (3, input_size, 32), jnp.float32)
    b1 = scale * jax.random.normal(keys[1], (1, 32), jnp.float32)
    w2 = scale * jax.random.normal(keys[2], (3, 32, 64), jnp.float32)
    b2 = scale * jax.random.normal(keys[3], (1, 64), jnp.float32)
    lstm_params = []
    kidx = 4
    in_dim = 64
    for _ in range(num_layers):
        wih_t = scale * jax.random.normal(keys[kidx], (in_dim, 4 * hidden_size), jnp.float32)
        whh_t = scale * jax.random.normal(keys[kidx + 1], (hidden_size, 4 * hidden_size), jnp.float32)
        bias = scale * jax.random.normal(keys[kidx + 2], (1, 4 * hidden_size), jnp.float32)
        lstm_params.append((wih_t, whh_t, bias))
        kidx += 3
        in_dim = hidden_size
    wfc_t = scale * jax.random.normal(keys[kidx], (hidden_size, num_classes), jnp.float32)
    bfc = scale * jax.random.normal(keys[kidx + 1], (1, num_classes), jnp.float32)
    return (w1, b1, w2, b2, lstm_params, wfc_t, bfc)


@functools.partial(jax.jit, static_argnames=("hidden_size", "num_layers", "num_classes"))
def cnn_lstm_forward(x, params, *, hidden_size, num_layers, num_classes):
    w1, b1, w2, b2, lstm_params, wfc_t, bfc = params
    B, T, C_in = x.shape
    H = hidden_size
    G = 4 * H

    Bt, B_pad = _pick_batch_tile(B, max_bt=256,
                                 prefer_two_tiles=_num_tensorcores() >= 2)
    NC_pad = _round_up(num_classes, 128)              # lane-dense output width

    # Layout plumbing: time-major, batch-padded, bf16 input (it is consumed in
    # bf16 by the conv matmul anyway; halves the only streamed HBM->VMEM DMA).
    x_t = jnp.transpose(x, (1, 0, 2))
    if B_pad != B:
        x_t = jnp.pad(x_t, ((0, 0), (0, B_pad - B), (0, 0)))
    x_t = x_t.astype(jnp.bfloat16)

    # Conv tap weights concatenated along N host-side: (c_in, 3*c_out), bf16.
    w1cat = jnp.concatenate([w1[0], w1[1], w1[2]], axis=1).astype(jnp.bfloat16)   # (C_in, 96)
    w2cat = jnp.concatenate([w2[0], w2[1], w2[2]], axis=1).astype(jnp.bfloat16)   # (32, 192)

    wfc_pad = jnp.pad(wfc_t, ((0, 0), (0, NC_pad - num_classes)))
    bfc_pad = jnp.pad(bfc, ((0, 0), (0, NC_pad - num_classes)))

    def reorder(a):   # gate columns (i, f, g, o) -> (i, f, o, g)
        i, f, g, o = jnp.split(a, 4, axis=-1)
        return jnp.concatenate([i, f, o, g], axis=-1)

    lstm_flat = []
    for (wih_t, whh_t, bias) in lstm_params:
        lstm_flat += [reorder(wih_t).astype(jnp.bfloat16),
                      reorder(whh_t).astype(jnp.bfloat16),
                      reorder(bias)]

    kernel = make_kernel(T, C_in, H, num_layers, Bt, NC_pad)

    def _full_spec(a):
        zeros = (0,) * a.ndim
        return pl.BlockSpec(a.shape, lambda b, z=zeros: z)

    in_arrays = [x_t, w1cat, b1, w2cat, b2] + lstm_flat + [wfc_pad, bfc_pad]
    in_specs = ([pl.BlockSpec((T, Bt, C_in), lambda b: (0, b, 0))]
                + [_full_spec(a) for a in in_arrays[1:]])

    out = pl.pallas_call(
        kernel,
        out_shape=jax.ShapeDtypeStruct((B_pad, NC_pad), jnp.float32),
        grid_spec=pltpu.PrefetchScalarGridSpec(
            num_scalar_prefetch=0,
            grid=(B_pad // Bt,),
            in_specs=in_specs,
            out_specs=pl.BlockSpec((Bt, NC_pad), lambda b: (b, 0)),
            scratch_shapes=[pltpu.VMEM((T, Bt, G), jnp.float32),     # per-layer input projections
                            pltpu.VMEM((T, Bt, H), jnp.bfloat16)],   # h-sequence between layers
        ),
        compiler_params=pltpu.CompilerParams(
            dimension_semantics=("parallel",)),       # independent batch tiles (v7x 2 TCs)
    )(*in_arrays)
    return out[:B, :num_classes]


def reference_forward(x, params, *, hidden_size, num_layers, num_classes):
    """Pure-JAX f32 reference with the module's math (for verification)."""
    w1, b1, w2, b2, lstm_params, wfc_t, bfc = params
    B, T, _ = x.shape
    H = hidden_size
    xp = jnp.pad(x, ((0, 0), (1, 1), (0, 0)))
    h1 = jnp.zeros((B, T, 32), jnp.float32)
    for k in range(3):
        h1 = h1 + jnp.einsum('btc,co->bto', xp[:, k:k + T, :], w1[k])
    h1 = jax.nn.relu(h1 + b1)
    h1p = jnp.pad(h1, ((0, 0), (1, 1), (0, 0)))
    h2 = jnp.zeros((B, T, 64), jnp.float32)
    for k in range(3):
        h2 = h2 + jnp.einsum('btc,co->bto', h1p[:, k:k + T, :], w2[k])
    h2 = jax.nn.relu(h2 + b2)
    hs = [jnp.zeros((B, H), jnp.float32) for _ in range(num_layers)]
    cs = [jnp.zeros((B, H), jnp.float32) for _ in range(num_layers)]
    for t in range(T):
        inp = h2[:, t, :]
        for l in range(num_layers):
            wih_t, whh_t, bias = lstm_params[l]
            gates = inp @ wih_t + hs[l] @ whh_t + bias
            i = jax.nn.sigmoid(gates[:, 0:H])
            f = jax.nn.sigmoid(gates[:, H:2 * H])
            g = jnp.tanh(gates[:, 2 * H:3 * H])
            o = jax.nn.sigmoid(gates[:, 3 * H:4 * H])
            cs[l] = f * cs[l] + i * g
            hs[l] = o * jnp.tanh(cs[l])
            inp = hs[l]
    return hs[-1] @ wfc_t + bfc


if __name__ == "__main__":
    B, T = 2, 16
    input_size, hidden_size, num_layers, num_classes = 8, 32, 2, 2

    key = jax.random.PRNGKey(0)
    kx, kp = jax.random.split(key)
    x = jax.random.normal(kx, (B, T, input_size), jnp.float32)
    params = init_params(kp, input_size, hidden_size, num_layers, num_classes)

    out = cnn_lstm_forward(x, params, hidden_size=hidden_size,
                           num_layers=num_layers, num_classes=num_classes)
    out = jax.block_until_ready(out)

    ref = reference_forward(x, params, hidden_size=hidden_size,
                            num_layers=num_layers, num_classes=num_classes)
    assert out.shape == (B, num_classes)
    # Kernel uses bf16 MXU operands (f32 accumulation) for conv, LSTM input
    # projections AND the recurrent matmul, so compare against the pure-f32
    # reference with a bf16-appropriate tolerance.
    assert jnp.allclose(out, ref, atol=3e-2, rtol=3e-2), (out, ref)
    print("KERNEL_OK")
</pallas_src>

<mosaic_0001>
module attributes {stable_mosaic.version = 11 : i64} {
  func.func @kernel(%arg0: i32, %arg1: memref<16x8x8xbf16, #tpu.memory_space<vmem>>, %arg2: memref<8x96xbf16, #tpu.memory_space<vmem>>, %arg3: memref<1x32xf32, #tpu.memory_space<vmem>>, %arg4: memref<32x192xbf16, #tpu.memory_space<vmem>>, %arg5: memref<1x64xf32, #tpu.memory_space<vmem>>, %arg6: memref<64x128xbf16, #tpu.memory_space<vmem>>, %arg7: memref<32x128xbf16, #tpu.memory_space<vmem>>, %arg8: memref<1x128xf32, #tpu.memory_space<vmem>>, %arg9: memref<32x128xbf16, #tpu.memory_space<vmem>>, %arg10: memref<32x128xbf16, #tpu.memory_space<vmem>>, %arg11: memref<1x128xf32, #tpu.memory_space<vmem>>, %arg12: memref<32x128xf32, #tpu.memory_space<vmem>>, %arg13: memref<1x128xf32, #tpu.memory_space<vmem>>, %arg14: memref<8x128xf32, #tpu.memory_space<vmem>>, %arg15: memref<16x8x128xf32, #tpu.memory_space<vmem>>, %arg16: memref<16x8x32xbf16, #tpu.memory_space<vmem>>) attributes {dimension_semantics = [#tpu.dimension_semantics<parallel>], iteration_bounds = array<i64: 1>, scalar_prefetch = 0 : i64, scratch_operands = 2 : i64, tpu.core_type = #tpu.core_type<tc>, window_params = [{transform_indices = @transform_0, window_bounds = array<i64: 16, 8, 8>}, {pipeline_mode = #tpu.pipeline_mode<synchronous>, transform_indices = @transform_1, window_bounds = array<i64: 8, 96>}, {pipeline_mode = #tpu.pipeline_mode<synchronous>, transform_indices = @transform_2, window_bounds = array<i64: 1, 32>}, {pipeline_mode = #tpu.pipeline_mode<synchronous>, transform_indices = @transform_3, window_bounds = array<i64: 32, 192>}, {pipeline_mode = #tpu.pipeline_mode<synchronous>, transform_indices = @transform_4, window_bounds = array<i64: 1, 64>}, {pipeline_mode = #tpu.pipeline_mode<synchronous>, transform_indices = @transform_5, window_bounds = array<i64: 64, 128>}, {pipeline_mode = #tpu.pipeline_mode<synchronous>, transform_indices = @transform_6, window_bounds = array<i64: 32, 128>}, {pipeline_mode = #tpu.pipeline_mode<synchronous>, transform_indices = @transform_7, window_bounds = array<i64: 1, 128>}, {pipeline_mode = #tpu.pipeline_mode<synchronous>, transform_indices = @transform_8, window_bounds = array<i64: 32, 128>}, {pipeline_mode = #tpu.pipeline_mode<synchronous>, transform_indices = @transform_9, window_bounds = array<i64: 32, 128>}, {pipeline_mode = #tpu.pipeline_mode<synchronous>, transform_indices = @transform_10, window_bounds = array<i64: 1, 128>}, {pipeline_mode = #tpu.pipeline_mode<synchronous>, transform_indices = @transform_11, window_bounds = array<i64: 32, 128>}, {pipeline_mode = #tpu.pipeline_mode<synchronous>, transform_indices = @transform_12, window_bounds = array<i64: 1, 128>}, {transform_indices = @transform_13, window_bounds = array<i64: 8, 128>}]} {
    %c0 = arith.constant 0 : index
    %c0_0 = arith.constant 0 : index
    %c0_1 = arith.constant 0 : index
    %0 = vector.load %arg1[%c0, %c0_0, %c0_1] : memref<16x8x8xbf16, #tpu.memory_space<vmem>>, vector<16x8x8xbf16>
    %1 = vector.shape_cast %0 : vector<16x8x8xbf16> to vector<128x8xbf16>
    %c0_2 = arith.constant 0 : index
    %c0_3 = arith.constant 0 : index
    %2 = vector.load %arg2[%c0_2, %c0_3] : memref<8x96xbf16, #tpu.memory_space<vmem>>, vector<8x96xbf16>
    %cst = arith.constant dense<0.000000e+00> : vector<128x96xf32>
    %3 = tpu.matmul %1, %2, %cst {dimension_numbers = #tpu.dot_dimension_numbers<[1], [0], [0], [1], [0, 0, 1, 1], [], []>} : vector<128x8xbf16>, vector<8x96xbf16>, vector<128x96xf32> -> vector<128x96xf32>
    %4 = vector.shape_cast %3 : vector<128x96xf32> to vector<16x8x96xf32>
    %5 = vector.extract_strided_slice %4 {offsets = [0, 0, 0], sizes = [16, 8, 32], strides = [1, 1, 1]} : vector<16x8x96xf32> to vector<16x8x32xf32>
    %6 = vector.extract_strided_slice %4 {offsets = [0, 0, 32], sizes = [16, 8, 32], strides = [1, 1, 1]} : vector<16x8x96xf32> to vector<16x8x32xf32>
    %7 = vector.extract_strided_slice %4 {offsets = [0, 0, 64], sizes = [16, 8, 32], strides = [1, 1, 1]} : vector<16x8x96xf32> to vector<16x8x32xf32>
    %cst_4 = arith.constant 0.000000e+00 : f32
    %8 = vector.broadcast %cst_4 : f32 to vector<1x8x32xf32>
    %9 = vector.extract_strided_slice %5 {offsets = [0, 0, 0], sizes = [15, 8, 32], strides = [1, 1, 1]} : vector<16x8x32xf32> to vector<15x8x32xf32>
    %10 = tpu.concatenate %8, %9 in 0 : vector<1x8x32xf32>, vector<15x8x32xf32> -> vector<16x8x32xf32>
    %11 = arith.addf %6, %10 : vector<16x8x32xf32>
    %12 = vector.extract_strided_slice %7 {offsets = [1, 0, 0], sizes = [15, 8, 32], strides = [1, 1, 1]} : vector<16x8x32xf32> to vector<15x8x32xf32>
    %13 = tpu.concatenate %12, %8 in 0 : vector<15x8x32xf32>, vector<1x8x32xf32> -> vector<16x8x32xf32>
    %14 = arith.addf %11, %13 : vector<16x8x32xf32>
    %c0_5 = arith.constant 0 : index
    %c0_6 = arith.constant 0 : index
    %15 = vector.load %arg3[%c0_5, %c0_6] : memref<1x32xf32, #tpu.memory_space<vmem>>, vector<1x32xf32>
    %16 = vector.shape_cast %15 : vector<1x32xf32> to vector<1x1x32xf32>
    %17 = vector.broadcast %16 : vector<1x1x32xf32> to vector<16x8x32xf32>
    %18 = arith.addf %14, %17 : vector<16x8x32xf32>
    %cst_7 = arith.constant 0.000000e+00 : f32
    %19 = vector.broadcast %cst_7 : f32 to vector<16x8x32xf32>
    %20 = arith.maximumf %18, %19 : vector<16x8x32xf32>
    %21 = arith.truncf %20 : vector<16x8x32xf32> to vector<16x8x32xbf16>
    %22 = vector.shape_cast %21 : vector<16x8x32xbf16> to vector<128x32xbf16>
    %c0_8 = arith.constant 0 : index
    %c0_9 = arith.constant 0 : index
    %23 = vector.load %arg4[%c0_8, %c0_9] : memref<32x192xbf16, #tpu.memory_space<vmem>>, vector<32x192xbf16>
    %cst_10 = arith.constant dense<0.000000e+00> : vector<128x192xf32>
    %24 = tpu.matmul %22, %23, %cst_10 {dimension_numbers = #tpu.dot_dimension_numbers<[1], [0], [0], [1], [0, 0, 1, 1], [], []>} : vector<128x32xbf16>, vector<32x192xbf16>, vector<128x192xf32> -> vector<128x192xf32>
    %25 = vector.shape_cast %24 : vector<128x192xf32> to vector<16x8x192xf32>
    %26 = vector.extract_strided_slice %25 {offsets = [0, 0, 0], sizes = [16, 8, 64], strides = [1, 1, 1]} : vector<16x8x192xf32> to vector<16x8x64xf32>
    %27 = vector.extract_strided_slice %25 {offsets = [0, 0, 64], sizes = [16, 8, 64], strides = [1, 1, 1]} : vector<16x8x192xf32> to vector<16x8x64xf32>
    %28 = vector.extract_strided_slice %25 {offsets = [0, 0, 128], sizes = [16, 8, 64], strides = [1, 1, 1]} : vector<16x8x192xf32> to vector<16x8x64xf32>
    %cst_11 = arith.constant 0.000000e+00 : f32
    %29 = vector.broadcast %cst_11 : f32 to vector<1x8x64xf32>
    %30 = vector.extract_strided_slice %26 {offsets = [0, 0, 0], sizes = [15, 8, 64], strides = [1, 1, 1]} : vector<16x8x64xf32> to vector<15x8x64xf32>
    %31 = tpu.concatenate %29, %30 in 0 : vector<1x8x64xf32>, vector<15x8x64xf32> -> vector<16x8x64xf32>
    %32 = arith.addf %27, %31 : vector<16x8x64xf32>
    %33 = vector.extract_strided_slice %28 {offsets = [1, 0, 0], sizes = [15, 8, 64], strides = [1, 1, 1]} : vector<16x8x64xf32> to vector<15x8x64xf32>
    %34 = tpu.concatenate %33, %29 in 0 : vector<15x8x64xf32>, vector<1x8x64xf32> -> vector<16x8x64xf32>
    %35 = arith.addf %32, %34 : vector<16x8x64xf32>
    %c0_12 = arith.constant 0 : index
    %c0_13 = arith.constant 0 : index
    %36 = vector.load %arg5[%c0_12, %c0_13] : memref<1x64xf32, #tpu.memory_space<vmem>>, vector<1x64xf32>
    %37 = vector.shape_cast %36 : vector<1x64xf32> to vector<1x1x64xf32>
    %38 = vector.broadcast %37 : vector<1x1x64xf32> to vector<16x8x64xf32>
    %39 = arith.addf %35, %38 : vector<16x8x64xf32>
    %cst_14 = arith.constant 0.000000e+00 : f32
    %40 = vector.broadcast %cst_14 : f32 to vector<16x8x64xf32>
    %41 = arith.maximumf %39, %40 : vector<16x8x64xf32>
    %42 = arith.truncf %41 : vector<16x8x64xf32> to vector<16x8x64xbf16>
    %43 = vector.shape_cast %42 : vector<16x8x64xbf16> to vector<128x64xbf16>
    %c0_15 = arith.constant 0 : index
    %c0_16 = arith.constant 0 : index
    %44 = vector.load %arg6[%c0_15, %c0_16] : memref<64x128xbf16, #tpu.memory_space<vmem>>, vector<64x128xbf16>
    %c0_17 = arith.constant 0 : index
    %c0_18 = arith.constant 0 : index
    %45 = vector.load %arg8[%c0_17, %c0_18] : memref<1x128xf32, #tpu.memory_space<vmem>>, vector<1x128xf32>
    %cst_19 = arith.constant dense<0.000000e+00> : vector<128x128xf32>
    %46 = tpu.matmul %43, %44, %cst_19 {dimension_numbers = #tpu.dot_dimension_numbers<[1], [0], [0], [1], [0, 0, 1, 1], [], []>} : vector<128x64xbf16>, vector<64x128xbf16>, vector<128x128xf32> -> vector<128x128xf32>
    %47 = vector.broadcast %45 : vector<1x128xf32> to vector<128x128xf32>
    %48 = arith.addf %46, %47 : vector<128x128xf32>
    %49 = vector.shape_cast %48 : vector<128x128xf32> to vector<16x8x128xf32>
    %c0_20 = arith.constant 0 : index
    %c0_21 = arith.constant 0 : index
    %c0_22 = arith.constant 0 : index
    %50 = vector.load %arg15[%c0_20, %c0_21, %c0_22] : memref<16x8x128xf32, #tpu.memory_space<vmem>>, vector<16x8x128xf32>
    tpu.vector_store %arg15[%c0_20, %c0_21, %c0_22], %49 {strides = array<i32>} : memref<16x8x128xf32, #tpu.memory_space<vmem>>, vector<16x8x128xf32>,
    %c0_23 = arith.constant 0 : index
    %c0_24 = arith.constant 0 : index
    %51 = vector.load %arg7[%c0_23, %c0_24] : memref<32x128xbf16, #tpu.memory_space<vmem>>, vector<32x128xbf16>
    %cst_25 = arith.constant 0.000000e+00 : f32
    %52 = vector.broadcast %cst_25 : f32 to vector<8x32xf32>
    %cst_26 = arith.constant 0.000000e+00 : f32
    %53 = vector.broadcast %cst_26 : f32 to vector<8x32xf32>
    %c0_27 = arith.constant 0 : index
    %c0_28 = arith.constant 0 : index
    %c0_29 = arith.constant 0 : index
    %54 = vector.load %arg15[%c0_27, %c0_28, %c0_29] : memref<16x8x128xf32, #tpu.memory_space<vmem>>, vector<1x8x128xf32>
    %55 = vector.shape_cast %54 : vector<1x8x128xf32> to vector<8x128xf32>
    %56 = arith.truncf %52 : vector<8x32xf32> to vector<8x32xbf16>
    %cst_30 = arith.constant dense<0.000000e+00> : vector<8x128xf32>
    %57 = tpu.matmul %56, %51, %cst_30 {dimension_numbers = #tpu.dot_dimension_numbers<[1], [0], [0], [1], [0, 0, 1, 1], [], []>} : vector<8x32xbf16>, vector<32x128xbf16>, vector<8x128xf32> -> vector<8x128xf32>
    %58 = arith.addf %55, %57 : vector<8x128xf32>
    %59 = vector.extract_strided_slice %58 {offsets = [0, 0], sizes = [8, 96], strides = [1, 1]} : vector<8x128xf32> to vector<8x96xf32>
    %60 = arith.negf %59 : vector<8x96xf32>
    %61 = math.exp %60 : vector<8x96xf32>
    %cst_31 = arith.constant 1.000000e+00 : f32
    %62 = vector.broadcast %cst_31 : f32 to vector<8x96xf32>
    %63 = arith.addf %62, %61 : vector<8x96xf32>
    %64 = arith.divf %62, %63 : vector<8x96xf32>
    %65 = vector.extract_strided_slice %58 {offsets = [0, 96], sizes = [8, 32], strides = [1, 1]} : vector<8x128xf32> to vector<8x32xf32>
    %66 = math.tanh %65 : vector<8x32xf32>
    %67 = vector.extract_strided_slice %64 {offsets = [0, 0], sizes = [8, 32], strides = [1, 1]} : vector<8x96xf32> to vector<8x32xf32>
    %68 = vector.extract_strided_slice %64 {offsets = [0, 32], sizes = [8, 32], strides = [1, 1]} : vector<8x96xf32> to vector<8x32xf32>
    %69 = vector.extract_strided_slice %64 {offsets = [0, 64], sizes = [8, 32], strides = [1, 1]} : vector<8x96xf32> to vector<8x32xf32>
    %70 = arith.mulf %68, %53 : vector<8x32xf32>
    %71 = arith.mulf %67, %66 : vector<8x32xf32>
    %72 = arith.addf %70, %71 : vector<8x32xf32>
    %73 = math.tanh %72 : vector<8x32xf32>
    %74 = arith.mulf %69, %73 : vector<8x32xf32>
    %75 = arith.truncf %74 : vector<8x32xf32> to vector<8x32xbf16>
    %c0_32 = arith.constant 0 : index
    %c0_33 = arith.constant 0 : index
    %c0_34 = arith.constant 0 : index
    %76 = vector.load %arg16[%c0_32, %c0_33, %c0_34] : memref<16x8x32xbf16, #tpu.memory_space<vmem>>, vector<1x8x32xbf16>
    %77 = vector.shape_cast %76 : vector<1x8x32xbf16> to vector<8x32xbf16>
    %78 = vector.shape_cast %75 : vector<8x32xbf16> to vector<1x8x32xbf16>
    tpu.vector_store %arg16[%c0_32, %c0_33, %c0_34], %78 {strides = array<i32>} : memref<16x8x32xbf16, #tpu.memory_space<vmem>>, vector<1x8x32xbf16>,
    %c1 = arith.constant 1 : index
    %c0_35 = arith.constant 0 : index
    %c0_36 = arith.constant 0 : index
    %79 = vector.load %arg15[%c1, %c0_35, %c0_36] : memref<16x8x128xf32, #tpu.memory_space<vmem>>, vector<1x8x128xf32>
    %80 = vector.shape_cast %79 : vector<1x8x128xf32> to vector<8x128xf32>
    %81 = arith.truncf %74 : vector<8x32xf32> to vector<8x32xbf16>
    %cst_37 = arith.constant dense<0.000000e+00> : vector<8x128xf32>
    %82 = tpu.matmul %81, %51, %cst_37 {dimension_numbers = #tpu.dot_dimension_numbers<[1], [0], [0], [1], [0, 0, 1, 1], [], []>} : vector<8x32xbf16>, vector<32x128xbf16>, vector<8x128xf32> -> vector<8x128xf32>
    %83 = arith.addf %80, %82 : vector<8x128xf32>
    %84 = vector.extract_strided_slice %83 {offsets = [0, 0], sizes = [8, 96], strides = [1, 1]} : vector<8x128xf32> to vector<8x96xf32>
    %85 = arith.negf %84 : vector<8x96xf32>
    %86 = math.exp %85 : vector<8x96xf32>
    %cst_38 = arith.constant 1.000000e+00 : f32
    %87 = vector.broadcast %cst_38 : f32 to vector<8x96xf32>
    %88 = arith.addf %87, %86 : vector<8x96xf32>
    %89 = arith.divf %87, %88 : vector<8x96xf32>
    %90 = vector.extract_strided_slice %83 {offsets = [0, 96], sizes = [8, 32], strides = [1, 1]} : vector<8x128xf32> to vector<8x32xf32>
    %91 = math.tanh %90 : vector<8x32xf32>
    %92 = vector.extract_strided_slice %89 {offsets = [0, 0], sizes = [8, 32], strides = [1, 1]} : vector<8x96xf32> to vector<8x32xf32>
    %93 = vector.extract_strided_slice %89 {offsets = [0, 32], sizes = [8, 32], strides = [1, 1]} : vector<8x96xf32> to vector<8x32xf32>
    %94 = vector.extract_strided_slice %89 {offsets = [0, 64], sizes = [8, 32], strides = [1, 1]} : vector<8x96xf32> to vector<8x32xf32>
    %95 = arith.mulf %93, %72 : vector<8x32xf32>
    %96 = arith.mulf %92, %91 : vector<8x32xf32>
    %97 = arith.addf %95, %96 : vector<8x32xf32>
    %98 = math.tanh %97 : vector<8x32xf32>
    %99 = arith.mulf %94, %98 : vector<8x32xf32>
    %100 = arith.truncf %99 : vector<8x32xf32> to vector<8x32xbf16>
    %c1_39 = arith.constant 1 : index
    %c0_40 = arith.constant 0 : index
    %c0_41 = arith.constant 0 : index
    %101 = vector.load %arg16[%c1_39, %c0_40, %c0_41] : memref<16x8x32xbf16, #tpu.memory_space<vmem>>, vector<1x8x32xbf16>
    %102 = vector.shape_cast %101 : vector<1x8x32xbf16> to vector<8x32xbf16>
    %103 = vector.shape_cast %100 : vector<8x32xbf16> to vector<1x8x32xbf16>
    tpu.vector_store %arg16[%c1_39, %c0_40, %c0_41], %103 {strides = array<i32>} : memref<16x8x32xbf16, #tpu.memory_space<vmem>>, vector<1x8x32xbf16>,
    %c2 = arith.constant 2 : index
    %c0_42 = arith.constant 0 : index
    %c0_43 = arith.constant 0 : index
    %104 = vector.load %arg15[%c2, %c0_42, %c0_43] : memref<16x8x128xf32, #tpu.memory_space<vmem>>, vector<1x8x128xf32>
    %105 = vector.shape_cast %104 : vector<1x8x128xf32> to vector<8x128xf32>
    %106 = arith.truncf %99 : vector<8x32xf32> to vector<8x32xbf16>
    %cst_44 = arith.constant dense<0.000000e+00> : vector<8x128xf32>
    %107 = tpu.matmul %106, %51, %cst_44 {dimension_numbers = #tpu.dot_dimension_numbers<[1], [0], [0], [1], [0, 0, 1, 1], [], []>} : vector<8x32xbf16>, vector<32x128xbf16>, vector<8x128xf32> -> vector<8x128xf32>
    %108 = arith.addf %105, %107 : vector<8x128xf32>
    %109 = vector.extract_strided_slice %108 {offsets = [0, 0], sizes = [8, 96], strides = [1, 1]} : vector<8x128xf32> to vector<8x96xf32>
    %110 = arith.negf %109 : vector<8x96xf32>
    %111 = math.exp %110 : vector<8x96xf32>
    %cst_45 = arith.constant 1.000000e+00 : f32
    %112 = vector.broadcast %cst_45 : f32 to vector<8x96xf32>
    %113 = arith.addf %112, %111 : vector<8x96xf32>
    %114 = arith.divf %112, %113 : vector<8x96xf32>
    %115 = vector.extract_strided_slice %108 {offsets = [0, 96], sizes = [8, 32], strides = [1, 1]} : vector<8x128xf32> to vector<8x32xf32>
    %116 = math.tanh %115 : vector<8x32xf32>
    %117 = vector.extract_strided_slice %114 {offsets = [0, 0], sizes = [8, 32], strides = [1, 1]} : vector<8x96xf32> to vector<8x32xf32>
    %118 = vector.extract_strided_slice %114 {offsets = [0, 32], sizes = [8, 32], strides = [1, 1]} : vector<8x96xf32> to vector<8x32xf32>
    %119 = vector.extract_strided_slice %114 {offsets = [0, 64], sizes = [8, 32], strides = [1, 1]} : vector<8x96xf32> to vector<8x32xf32>
    %120 = arith.mulf %118, %97 : vector<8x32xf32>
    %121 = arith.mulf %117, %116 : vector<8x32xf32>
    %122 = arith.addf %120, %121 : vector<8x32xf32>
    %123 = math.tanh %122 : vector<8x32xf32>
    %124 = arith.mulf %119, %123 : vector<8x32xf32>
    %125 = arith.truncf %124 : vector<8x32xf32> to vector<8x32xbf16>
    %c2_46 = arith.constant 2 : index
    %c0_47 = arith.constant 0 : index
    %c0_48 = arith.constant 0 : index
    %126 = vector.load %arg16[%c2_46, %c0_47, %c0_48] : memref<16x8x32xbf16, #tpu.memory_space<vmem>>, vector<1x8x32xbf16>
    %127 = vector.shape_cast %126 : vector<1x8x32xbf16> to vector<8x32xbf16>
    %128 = vector.shape_cast %125 : vector<8x32xbf16> to vector<1x8x32xbf16>
    tpu.vector_store %arg16[%c2_46, %c0_47, %c0_48], %128 {strides = array<i32>} : memref<16x8x32xbf16, #tpu.memory_space<vmem>>, vector<1x8x32xbf16>,
    %c3 = arith.constant 3 : index
    %c0_49 = arith.constant 0 : index
    %c0_50 = arith.constant 0 : index
    %129 = vector.load %arg15[%c3, %c0_49, %c0_50] : memref<16x8x128xf32, #tpu.memory_space<vmem>>, vector<1x8x128xf32>
    %130 = vector.shape_cast %129 : vector<1x8x128xf32> to vector<8x128xf32>
    %131 = arith.truncf %124 : vector<8x32xf32> to vector<8x32xbf16>
    %cst_51 = arith.constant dense<0.000000e+00> : vector<8x128xf32>
    %132 = tpu.matmul %131, %51, %cst_51 {dimension_numbers = #tpu.dot_dimension_numbers<[1], [0], [0], [1], [0, 0, 1, 1], [], []>} : vector<8x32xbf16>, vector<32x128xbf16>, vector<8x128xf32> -> vector<8x128xf32>
    %133 = arith.addf %130, %132 : vector<8x128xf32>
    %134 = vector.extract_strided_slice %133 {offsets = [0, 0], sizes = [8, 96], strides = [1, 1]} : vector<8x128xf32> to vector<8x96xf32>
    %135 = arith.negf %134 : vector<8x96xf32>
    %136 = math.exp %135 : vector<8x96xf32>
    %cst_52 = arith.constant 1.000000e+00 : f32
    %137 = vector.broadcast %cst_52 : f32 to vector<8x96xf32>
    %138 = arith.addf %137, %136 : vector<8x96xf32>
    %139 = arith.divf %137, %138 : vector<8x96xf32>
    %140 = vector.extract_strided_slice %133 {offsets = [0, 96], sizes = [8, 32], strides = [1, 1]} : vector<8x128xf32> to vector<8x32xf32>
    %141 = math.tanh %140 : vector<8x32xf32>
    %142 = vector.extract_strided_slice %139 {offsets = [0, 0], sizes = [8, 32], strides = [1, 1]} : vector<8x96xf32> to vector<8x32xf32>
    %143 = vector.extract_strided_slice %139 {offsets = [0, 32], sizes = [8, 32], strides = [1, 1]} : vector<8x96xf32> to vector<8x32xf32>
    %144 = vector.extract_strided_slice %139 {offsets = [0, 64], sizes = [8, 32], strides = [1, 1]} : vector<8x96xf32> to vector<8x32xf32>
    %145 = arith.mulf %143, %122 : vector<8x32xf32>
    %146 = arith.mulf %142, %141 : vector<8x32xf32>
    %147 = arith.addf %145, %146 : vector<8x32xf32>
    %148 = math.tanh %147 : vector<8x32xf32>
    %149 = arith.mulf %144, %148 : vector<8x32xf32>
    %150 = arith.truncf %149 : vector<8x32xf32> to vector<8x32xbf16>
    %c3_53 = arith.constant 3 : index
    %c0_54 = arith.constant 0 : index
    %c0_55 = arith.constant 0 : index
    %151 = vector.load %arg16[%c3_53, %c0_54, %c0_55] : memref<16x8x32xbf16, #tpu.memory_space<vmem>>, vector<1x8x32xbf16>
    %152 = vector.shape_cast %151 : vector<1x8x32xbf16> to vector<8x32xbf16>
    %153 = vector.shape_cast %150 : vector<8x32xbf16> to vector<1x8x32xbf16>
    tpu.vector_store %arg16[%c3_53, %c0_54, %c0_55], %153 {strides = array<i32>} : memref<16x8x32xbf16, #tpu.memory_space<vmem>>, vector<1x8x32xbf16>,
    %c4 = arith.constant 4 : index
    %c0_56 = arith.constant 0 : index
    %c0_57 = arith.constant 0 : index
    %154 = vector.load %arg15[%c4, %c0_56, %c0_57] : memref<16x8x128xf32, #tpu.memory_space<vmem>>, vector<1x8x128xf32>
    %155 = vector.shape_cast %154 : vector<1x8x128xf32> to vector<8x128xf32>
    %156 = arith.truncf %149 : vector<8x32xf32> to vector<8x32xbf16>
    %cst_58 = arith.constant dense<0.000000e+00> : vector<8x128xf32>
    %157 = tpu.matmul %156, %51, %cst_58 {dimension_numbers = #tpu.dot_dimension_numbers<[1], [0], [0], [1], [0, 0, 1, 1], [], []>} : vector<8x32xbf16>, vector<32x128xbf16>, vector<8x128xf32> -> vector<8x128xf32>
    %158 = arith.addf %155, %157 : vector<8x128xf32>
    %159 = vector.extract_strided_slice %158 {offsets = [0, 0], sizes = [8, 96], strides = [1, 1]} : vector<8x128xf32> to vector<8x96xf32>
    %160 = arith.negf %159 : vector<8x96xf32>
    %161 = math.exp %160 : vector<8x96xf32>
    %cst_59 = arith.constant 1.000000e+00 : f32
    %162 = vector.broadcast %cst_59 : f32 to vector<8x96xf32>
    %163 = arith.addf %162, %161 : vector<8x96xf32>
    %164 = arith.divf %162, %163 : vector<8x96xf32>
    %165 = vector.extract_strided_slice %158 {offsets = [0, 96], sizes = [8, 32], strides = [1, 1]} : vector<8x128xf32> to vector<8x32xf32>
    %166 = math.tanh %165 : vector<8x32xf32>
    %167 = vector.extract_strided_slice %164 {offsets = [0, 0], sizes = [8, 32], strides = [1, 1]} : vector<8x96xf32> to vector<8x32xf32>
    %168 = vector.extract_strided_slice %164 {offsets = [0, 32], sizes = [8, 32], strides = [1, 1]} : vector<8x96xf32> to vector<8x32xf32>
    %169 = vector.extract_strided_slice %164 {offsets = [0, 64], sizes = [8, 32], strides = [1, 1]} : vector<8x96xf32> to vector<8x32xf32>
    %170 = arith.mulf %168, %147 : vector<8x32xf32>
    %171 = arith.mulf %167, %166 : vector<8x32xf32>
    %172 = arith.addf %170, %171 : vector<8x32xf32>
    %173 = math.tanh %172 : vector<8x32xf32>
    %174 = arith.mulf %169, %173 : vector<8x32xf32>
    %175 = arith.truncf %174 : vector<8x32xf32> to vector<8x32xbf16>
    %c4_60 = arith.constant 4 : index
    %c0_61 = arith.constant 0 : index
    %c0_62 = arith.constant 0 : index
    %176 = vector.load %arg16[%c4_60, %c0_61, %c0_62] : memref<16x8x32xbf16, #tpu.memory_space<vmem>>, vector<1x8x32xbf16>
    %177 = vector.shape_cast %176 : vector<1x8x32xbf16> to vector<8x32xbf16>
    %178 = vector.shape_cast %175 : vector<8x32xbf16> to vector<1x8x32xbf16>
    tpu.vector_store %arg16[%c4_60, %c0_61, %c0_62], %178 {strides = array<i32>} : memref<16x8x32xbf16, #tpu.memory_space<vmem>>, vector<1x8x32xbf16>,
    %c5 = arith.constant 5 : index
    %c0_63 = arith.constant 0 : index
    %c0_64 = arith.constant 0 : index
    %179 = vector.load %arg15[%c5, %c0_63, %c0_64] : memref<16x8x128xf32, #tpu.memory_space<vmem>>, vector<1x8x128xf32>
    %180 = vector.shape_cast %179 : vector<1x8x128xf32> to vector<8x128xf32>
    %181 = arith.truncf %174 : vector<8x32xf32> to vector<8x32xbf16>
    %cst_65 = arith.constant dense<0.000000e+00> : vector<8x128xf32>
    %182 = tpu.matmul %181, %51, %cst_65 {dimension_numbers = #tpu.dot_dimension_numbers<[1], [0], [0], [1], [0, 0, 1, 1], [], []>} : vector<8x32xbf16>, vector<32x128xbf16>, vector<8x128xf32> -> vector<8x128xf32>
    %183 = arith.addf %180, %182 : vector<8x128xf32>
    %184 = vector.extract_strided_slice %183 {offsets = [0, 0], sizes = [8, 96], strides = [1, 1]} : vector<8x128xf32> to vector<8x96xf32>
    %185 = arith.negf %184 : vector<8x96xf32>
    %186 = math.exp %185 : vector<8x96xf32>
    %cst_66 = arith.constant 1.000000e+00 : f32
    %187 = vector.broadcast %cst_66 : f32 to vector<8x96xf32>
    %188 = arith.addf %187, %186 : vector<8x96xf32>
    %189 = arith.divf %187, %188 : vector<8x96xf32>
    %190 = vector.extract_strided_slice %183 {offsets = [0, 96], sizes = [8, 32], strides = [1, 1]} : vector<8x128xf32> to vector<8x32xf32>
    %191 = math.tanh %190 : vector<8x32xf32>
    %192 = vector.extract_strided_slice %189 {offsets = [0, 0], sizes = [8, 32], strides = [1, 1]} : vector<8x96xf32> to vector<8x32xf32>
    %193 = vector.extract_strided_slice %189 {offsets = [0, 32], sizes = [8, 32], strides = [1, 1]} : vector<8x96xf32> to vector<8x32xf32>
    %194 = vector.extract_strided_slice %189 {offsets = [0, 64], sizes = [8, 32], strides = [1, 1]} : vector<8x96xf32> to vector<8x32xf32>
    %195 = arith.mulf %193, %172 : vector<8x32xf32>
    %196 = arith.mulf %192, %191 : vector<8x32xf32>
    %197 = arith.addf %195, %196 : vector<8x32xf32>
    %198 = math.tanh %197 : vector<8x32xf32>
    %199 = arith.mulf %194, %198 : vector<8x32xf32>
    %200 = arith.truncf %199 : vector<8x32xf32> to vector<8x32xbf16>
    %c5_67 = arith.constant 5 : index
    %c0_68 = arith.constant 0 : index
    %c0_69 = arith.constant 0 : index
    %201 = vector.load %arg16[%c5_67, %c0_68, %c0_69] : memref<16x8x32xbf16, #tpu.memory_space<vmem>>, vector<1x8x32xbf16>
    %202 = vector.shape_cast %201 : vector<1x8x32xbf16> to vector<8x32xbf16>
    %203 = vector.shape_cast %200 : vector<8x32xbf16> to vector<1x8x32xbf16>
    tpu.vector_store %arg16[%c5_67, %c0_68, %c0_69], %203 {strides = array<i32>} : memref<16x8x32xbf16, #tpu.memory_space<vmem>>, vector<1x8x32xbf16>,
    %c6 = arith.constant 6 : index
    %c0_70 = arith.constant 0 : index
    %c0_71 = arith.constant 0 : index
    %204 = vector.load %arg15[%c6, %c0_70, %c0_71] : memref<16x8x128xf32, #tpu.memory_space<vmem>>, vector<1x8x128xf32>
    %205 = vector.shape_cast %204 : vector<1x8x128xf32> to vector<8x128xf32>
    %206 = arith.truncf %199 : vector<8x32xf32> to vector<8x32xbf16>
    %cst_72 = arith.constant dense<0.000000e+00> : vector<8x128xf32>
    %207 = tpu.matmul %206, %51, %cst_72 {dimension_numbers = #tpu.dot_dimension_numbers<[1], [0], [0], [1], [0, 0, 1, 1], [], []>} : vector<8x32xbf16>, vector<32x128xbf16>, vector<8x128xf32> -> vector<8x128xf32>
    %208 = arith.addf %205, %207 : vector<8x128xf32>
    %209 = vector.extract_strided_slice %208 {offsets = [0, 0], sizes = [8, 96], strides = [1, 1]} : vector<8x128xf32> to vector<8x96xf32>
    %210 = arith.negf %209 : vector<8x96xf32>
    %211 = math.exp %210 : vector<8x96xf32>
    %cst_73 = arith.constant 1.000000e+00 : f32
    %212 = vector.broadcast %cst_73 : f32 to vector<8x96xf32>
    %213 = arith.addf %212, %211 : vector<8x96xf32>
    %214 = arith.divf %212, %213 : vector<8x96xf32>
    %215 = vector.extract_strided_slice %208 {offsets = [0, 96], sizes = [8, 32], strides = [1, 1]} : vector<8x128xf32> to vector<8x32xf32>
    %216 = math.tanh %215 : vector<8x32xf32>
    %217 = vector.extract_strided_slice %214 {offsets = [0, 0], sizes = [8, 32], strides = [1, 1]} : vector<8x96xf32> to vector<8x32xf32>
    %218 = vector.extract_strided_slice %214 {offsets = [0, 32], sizes = [8, 32], strides = [1, 1]} : vector<8x96xf32> to vector<8x32xf32>
    %219 = vector.extract_strided_slice %214 {offsets = [0, 64], sizes = [8, 32], strides = [1, 1]} : vector<8x96xf32> to vector<8x32xf32>
    %220 = arith.mulf %218, %197 : vector<8x32xf32>
    %221 = arith.mulf %217, %216 : vector<8x32xf32>
    %222 = arith.addf %220, %221 : vector<8x32xf32>
    %223 = math.tanh %222 : vector<8x32xf32>
    %224 = arith.mulf %219, %223 : vector<8x32xf32>
    %225 = arith.truncf %224 : vector<8x32xf32> to vector<8x32xbf16>
    %c6_74 = arith.constant 6 : index
    %c0_75 = arith.constant 0 : index
    %c0_76 = arith.constant 0 : index
    %226 = vector.load %arg16[%c6_74, %c0_75, %c0_76] : memref<16x8x32xbf16, #tpu.memory_space<vmem>>, vector<1x8x32xbf16>
    %227 = vector.shape_cast %226 : vector<1x8x32xbf16> to vector<8x32xbf16>
    %228 = vector.shape_cast %225 : vector<8x32xbf16> to vector<1x8x32xbf16>
    tpu.vector_store %arg16[%c6_74, %c0_75, %c0_76], %228 {strides = array<i32>} : memref<16x8x32xbf16, #tpu.memory_space<vmem>>, vector<1x8x32xbf16>,
    %c7 = arith.constant 7 : index
    %c0_77 = arith.constant 0 : index
    %c0_78 = arith.constant 0 : index
    %229 = vector.load %arg15[%c7, %c0_77, %c0_78] : memref<16x8x128xf32, #tpu.memory_space<vmem>>, vector<1x8x128xf32>
    %230 = vector.shape_cast %229 : vector<1x8x128xf32> to vector<8x128xf32>
    %231 = arith.truncf %224 : vector<8x32xf32> to vector<8x32xbf16>
    %cst_79 = arith.constant dense<0.000000e+00> : vector<8x128xf32>
    %232 = tpu.matmul %231, %51, %cst_79 {dimension_numbers = #tpu.dot_dimension_numbers<[1], [0], [0], [1], [0, 0, 1, 1], [], []>} : vector<8x32xbf16>, vector<32x128xbf16>, vector<8x128xf32> -> vector<8x128xf32>
    %233 = arith.addf %230, %232 : vector<8x128xf32>
    %234 = vector.extract_strided_slice %233 {offsets = [0, 0], sizes = [8, 96], strides = [1, 1]} : vector<8x128xf32> to vector<8x96xf32>
    %235 = arith.negf %234 : vector<8x96xf32>
    %236 = math.exp %235 : vector<8x96xf32>
    %cst_80 = arith.constant 1.000000e+00 : f32
    %237 = vector.broadcast %cst_80 : f32 to vector<8x96xf32>
    %238 = arith.addf %237, %236 : vector<8x96xf32>
    %239 = arith.divf %237, %238 : vector<8x96xf32>
    %240 = vector.extract_strided_slice %233 {offsets = [0, 96], sizes = [8, 32], strides = [1, 1]} : vector<8x128xf32> to vector<8x32xf32>
    %241 = math.tanh %240 : vector<8x32xf32>
    %242 = vector.extract_strided_slice %239 {offsets = [0, 0], sizes = [8, 32], strides = [1, 1]} : vector<8x96xf32> to vector<8x32xf32>
    %243 = vector.extract_strided_slice %239 {offsets = [0, 32], sizes = [8, 32], strides = [1, 1]} : vector<8x96xf32> to vector<8x32xf32>
    %244 = vector.extract_strided_slice %239 {offsets = [0, 64], sizes = [8, 32], strides = [1, 1]} : vector<8x96xf32> to vector<8x32xf32>
    %245 = arith.mulf %243, %222 : vector<8x32xf32>
    %246 = arith.mulf %242, %241 : vector<8x32xf32>
    %247 = arith.addf %245, %246 : vector<8x32xf32>
    %248 = math.tanh %247 : vector<8x32xf32>
    %249 = arith.mulf %244, %248 : vector<8x32xf32>
    %250 = arith.truncf %249 : vector<8x32xf32> to vector<8x32xbf16>
    %c7_81 = arith.constant 7 : index
    %c0_82 = arith.constant 0 : index
    %c0_83 = arith.constant 0 : index
    %251 = vector.load %arg16[%c7_81, %c0_82, %c0_83] : memref<16x8x32xbf16, #tpu.memory_space<vmem>>, vector<1x8x32xbf16>
    %252 = vector.shape_cast %251 : vector<1x8x32xbf16> to vector<8x32xbf16>
    %253 = vector.shape_cast %250 : vector<8x32xbf16> to vector<1x8x32xbf16>
    tpu.vector_store %arg16[%c7_81, %c0_82, %c0_83], %253 {strides = array<i32>} : memref<16x8x32xbf16, #tpu.memory_space<vmem>>, vector<1x8x32xbf16>,
    %c8 = arith.constant 8 : index
    %c0_84 = arith.constant 0 : index
    %c0_85 = arith.constant 0 : index
    %254 = vector.load %arg15[%c8, %c0_84, %c0_85] : memref<16x8x128xf32, #tpu.memory_space<vmem>>, vector<1x8x128xf32>
    %255 = vector.shape_cast %254 : vector<1x8x128xf32> to vector<8x128xf32>
    %256 = arith.truncf %249 : vector<8x32xf32> to vector<8x32xbf16>
    %cst_86 = arith.constant dense<0.000000e+00> : vector<8x128xf32>
    %257 = tpu.matmul %256, %51, %cst_86 {dimension_numbers = #tpu.dot_dimension_numbers<[1], [0], [0], [1], [0, 0, 1, 1], [], []>} : vector<8x32xbf16>, vector<32x128xbf16>, vector<8x128xf32> -> vector<8x128xf32>
    %258 = arith.addf %255, %257 : vector<8x128xf32>
    %259 = vector.extract_strided_slice %258 {offsets = [0, 0], sizes = [8, 96], strides = [1, 1]} : vector<8x128xf32> to vector<8x96xf32>
    %260 = arith.negf %259 : vector<8x96xf32>
    %261 = math.exp %260 : vector<8x96xf32>
    %cst_87 = arith.constant 1.000000e+00 : f32
    %262 = vector.broadcast %cst_87 : f32 to vector<8x96xf32>
    %263 = arith.addf %262, %261 : vector<8x96xf32>
    %264 = arith.divf %262, %263 : vector<8x96xf32>
    %265 = vector.extract_strided_slice %258 {offsets = [0, 96], sizes = [8, 32], strides = [1, 1]} : vector<8x128xf32> to vector<8x32xf32>
    %266 = math.tanh %265 : vector<8x32xf32>
    %267 = vector.extract_strided_slice %264 {offsets = [0, 0], sizes = [8, 32], strides = [1, 1]} : vector<8x96xf32> to vector<8x32xf32>
    %268 = vector.extract_strided_slice %264 {offsets = [0, 32], sizes = [8, 32], strides = [1, 1]} : vector<8x96xf32> to vector<8x32xf32>
    %269 = vector.extract_strided_slice %264 {offsets = [0, 64], sizes = [8, 32], strides = [1, 1]} : vector<8x96xf32> to vector<8x32xf32>
    %270 = arith.mulf %268, %247 : vector<8x32xf32>
    %271 = arith.mulf %267, %266 : vector<8x32xf32>
    %272 = arith.addf %270, %271 : vector<8x32xf32>
    %273 = math.tanh %272 : vector<8x32xf32>
    %274 = arith.mulf %269, %273 : vector<8x32xf32>
    %275 = arith.truncf %274 : vector<8x32xf32> to vector<8x32xbf16>
    %c8_88 = arith.constant 8 : index
    %c0_89 = arith.constant 0 : index
    %c0_90 = arith.constant 0 : index
    %276 = vector.load %arg16[%c8_88, %c0_89, %c0_90] : memref<16x8x32xbf16, #tpu.memory_space<vmem>>, vector<1x8x32xbf16>
    %277 = vector.shape_cast %276 : vector<1x8x32xbf16> to vector<8x32xbf16>
    %278 = vector.shape_cast %275 : vector<8x32xbf16> to vector<1x8x32xbf16>
    tpu.vector_store %arg16[%c8_88, %c0_89, %c0_90], %278 {strides = array<i32>} : memref<16x8x32xbf16, #tpu.memory_space<vmem>>, vector<1x8x32xbf16>,
    %c9 = arith.constant 9 : index
    %c0_91 = arith.constant 0 : index
    %c0_92 = arith.constant 0 : index
    %279 = vector.load %arg15[%c9, %c0_91, %c0_92] : memref<16x8x128xf32, #tpu.memory_space<vmem>>, vector<1x8x128xf32>
    %280 = vector.shape_cast %279 : vector<1x8x128xf32> to vector<8x128xf32>
    %281 = arith.truncf %274 : vector<8x32xf32> to vector<8x32xbf16>
    %cst_93 = arith.constant dense<0.000000e+00> : vector<8x128xf32>
    %282 = tpu.matmul %281, %51, %cst_93 {dimension_numbers = #tpu.dot_dimension_numbers<[1], [0], [0], [1], [0, 0, 1, 1], [], []>} : vector<8x32xbf16>, vector<32x128xbf16>, vector<8x128xf32> -> vector<8x128xf32>
    %283 = arith.addf %280, %282 : vector<8x128xf32>
    %284 = vector.extract_strided_slice %283 {offsets = [0, 0], sizes = [8, 96], strides = [1, 1]} : vector<8x128xf32> to vector<8x96xf32>
    %285 = arith.negf %284 : vector<8x96xf32>
    %286 = math.exp %285 : vector<8x96xf32>
    %cst_94 = arith.constant 1.000000e+00 : f32
    %287 = vector.broadcast %cst_94 : f32 to vector<8x96xf32>
    %288 = arith.addf %287, %286 : vector<8x96xf32>
    %289 = arith.divf %287, %288 : vector<8x96xf32>
    %290 = vector.extract_strided_slice %283 {offsets = [0, 96], sizes = [8, 32], strides = [1, 1]} : vector<8x128xf32> to vector<8x32xf32>
    %291 = math.tanh %290 : vector<8x32xf32>
    %292 = vector.extract_strided_slice %289 {offsets = [0, 0], sizes = [8, 32], strides = [1, 1]} : vector<8x96xf32> to vector<8x32xf32>
    %293 = vector.extract_strided_slice %289 {offsets = [0, 32], sizes = [8, 32], strides = [1, 1]} : vector<8x96xf32> to vector<8x32xf32>
    %294 = vector.extract_strided_slice %289 {offsets = [0, 64], sizes = [8, 32], strides = [1, 1]} : vector<8x96xf32> to vector<8x32xf32>
    %295 = arith.mulf %293, %272 : vector<8x32xf32>
    %296 = arith.mulf %292, %291 : vector<8x32xf32>
    %297 = arith.addf %295, %296 : vector<8x32xf32>
    %298 = math.tanh %297 : vector<8x32xf32>
    %299 = arith.mulf %294, %298 : vector<8x32xf32>
    %300 = arith.truncf %299 : vector<8x32xf32> to vector<8x32xbf16>
    %c9_95 = arith.constant 9 : index
    %c0_96 = arith.constant 0 : index
    %c0_97 = arith.constant 0 : index
    %301 = vector.load %arg16[%c9_95, %c0_96, %c0_97] : memref<16x8x32xbf16, #tpu.memory_space<vmem>>, vector<1x8x32xbf16>
    %302 = vector.shape_cast %301 : vector<1x8x32xbf16> to vector<8x32xbf16>
    %303 = vector.shape_cast %300 : vector<8x32xbf16> to vector<1x8x32xbf16>
    tpu.vector_store %arg16[%c9_95, %c0_96, %c0_97], %303 {strides = array<i32>} : memref<16x8x32xbf16, #tpu.memory_space<vmem>>, vector<1x8x32xbf16>,
    %c10 = arith.constant 10 : index
    %c0_98 = arith.constant 0 : index
    %c0_99 = arith.constant 0 : index
    %304 = vector.load %arg15[%c10, %c0_98, %c0_99] : memref<16x8x128xf32, #tpu.memory_space<vmem>>, vector<1x8x128xf32>
    %305 = vector.shape_cast %304 : vector<1x8x128xf32> to vector<8x128xf32>
    %306 = arith.truncf %299 : vector<8x32xf32> to vector<8x32xbf16>
    %cst_100 = arith.constant dense<0.000000e+00> : vector<8x128xf32>
    %307 = tpu.matmul %306, %51, %cst_100 {dimension_numbers = #tpu.dot_dimension_numbers<[1], [0], [0], [1], [0, 0, 1, 1], [], []>} : vector<8x32xbf16>, vector<32x128xbf16>, vector<8x128xf32> -> vector<8x128xf32>
    %308 = arith.addf %305, %307 : vector<8x128xf32>
    %309 = vector.extract_strided_slice %308 {offsets = [0, 0], sizes = [8, 96], strides = [1, 1]} : vector<8x128xf32> to vector<8x96xf32>
    %310 = arith.negf %309 : vector<8x96xf32>
    %311 = math.exp %310 : vector<8x96xf32>
    %cst_101 = arith.constant 1.000000e+00 : f32
    %312 = vector.broadcast %cst_101 : f32 to vector<8x96xf32>
    %313 = arith.addf %312, %311 : vector<8x96xf32>
    %314 = arith.divf %312, %313 : vector<8x96xf32>
    %315 = vector.extract_strided_slice %308 {offsets = [0, 96], sizes = [8, 32], strides = [1, 1]} : vector<8x128xf32> to vector<8x32xf32>
    %316 = math.tanh %315 : vector<8x32xf32>
    %317 = vector.extract_strided_slice %314 {offsets = [0, 0], sizes = [8, 32], strides = [1, 1]} : vector<8x96xf32> to vector<8x32xf32>
    %318 = vector.extract_strided_slice %314 {offsets = [0, 32], sizes = [8, 32], strides = [1, 1]} : vector<8x96xf32> to vector<8x32xf32>
    %319 = vector.extract_strided_slice %314 {offsets = [0, 64], sizes = [8, 32], strides = [1, 1]} : vector<8x96xf32> to vector<8x32xf32>
    %320 = arith.mulf %318, %297 : vector<8x32xf32>
    %321 = arith.mulf %317, %316 : vector<8x32xf32>
    %322 = arith.addf %320, %321 : vector<8x32xf32>
    %323 = math.tanh %322 : vector<8x32xf32>
    %324 = arith.mulf %319, %323 : vector<8x32xf32>
    %325 = arith.truncf %324 : vector<8x32xf32> to vector<8x32xbf16>
    %c10_102 = arith.constant 10 : index
    %c0_103 = arith.constant 0 : index
    %c0_104 = arith.constant 0 : index
    %326 = vector.load %arg16[%c10_102, %c0_103, %c0_104] : memref<16x8x32xbf16, #tpu.memory_space<vmem>>, vector<1x8x32xbf16>
    %327 = vector.shape_cast %326 : vector<1x8x32xbf16> to vector<8x32xbf16>
    %328 = vector.shape_cast %325 : vector<8x32xbf16> to vector<1x8x32xbf16>
    tpu.vector_store %arg16[%c10_102, %c0_103, %c0_104], %328 {strides = array<i32>} : memref<16x8x32xbf16, #tpu.memory_space<vmem>>, vector<1x8x32xbf16>,
    %c11 = arith.constant 11 : index
    %c0_105 = arith.constant 0 : index
    %c0_106 = arith.constant 0 : index
    %329 = vector.load %arg15[%c11, %c0_105, %c0_106] : memref<16x8x128xf32, #tpu.memory_space<vmem>>, vector<1x8x128xf32>
    %330 = vector.shape_cast %329 : vector<1x8x128xf32> to vector<8x128xf32>
    %331 = arith.truncf %324 : vector<8x32xf32> to vector<8x32xbf16>
    %cst_107 = arith.constant dense<0.000000e+00> : vector<8x128xf32>
    %332 = tpu.matmul %331, %51, %cst_107 {dimension_numbers = #tpu.dot_dimension_numbers<[1], [0], [0], [1], [0, 0, 1, 1], [], []>} : vector<8x32xbf16>, vector<32x128xbf16>, vector<8x128xf32> -> vector<8x128xf32>
    %333 = arith.addf %330, %332 : vector<8x128xf32>
    %334 = vector.extract_strided_slice %333 {offsets = [0, 0], sizes = [8, 96], strides = [1, 1]} : vector<8x128xf32> to vector<8x96xf32>
    %335 = arith.negf %334 : vector<8x96xf32>
    %336 = math.exp %335 : vector<8x96xf32>
    %cst_108 = arith.constant 1.000000e+00 : f32
    %337 = vector.broadcast %cst_108 : f32 to vector<8x96xf32>
    %338 = arith.addf %337, %336 : vector<8x96xf32>
    %339 = arith.divf %337, %338 : vector<8x96xf32>
    %340 = vector.extract_strided_slice %333 {offsets = [0, 96], sizes = [8, 32], strides = [1, 1]} : vector<8x128xf32> to vector<8x32xf32>
    %341 = math.tanh %340 : vector<8x32xf32>
    %342 = vector.extract_strided_slice %339 {offsets = [0, 0], sizes = [8, 32], strides = [1, 1]} : vector<8x96xf32> to vector<8x32xf32>
    %343 = vector.extract_strided_slice %339 {offsets = [0, 32], sizes = [8, 32], strides = [1, 1]} : vector<8x96xf32> to vector<8x32xf32>
    %344 = vector.extract_strided_slice %339 {offsets = [0, 64], sizes = [8, 32], strides = [1, 1]} : vector<8x96xf32> to vector<8x32xf32>
    %345 = arith.mulf %343, %322 : vector<8x32xf32>
    %346 = arith.mulf %342, %341 : vector<8x32xf32>
    %347 = arith.addf %345, %346 : vector<8x32xf32>
    %348 = math.tanh %347 : vector<8x32xf32>
    %349 = arith.mulf %344, %348 : vector<8x32xf32>
    %350 = arith.truncf %349 : vector<8x32xf32> to vector<8x32xbf16>
    %c11_109 = arith.constant 11 : index
    %c0_110 = arith.constant 0 : index
    %c0_111 = arith.constant 0 : index
    %351 = vector.load %arg16[%c11_109, %c0_110, %c0_111] : memref<16x8x32xbf16, #tpu.memory_space<vmem>>, vector<1x8x32xbf16>
    %352 = vector.shape_cast %351 : vector<1x8x32xbf16> to vector<8x32xbf16>
    %353 = vector.shape_cast %350 : vector<8x32xbf16> to vector<1x8x32xbf16>
    tpu.vector_store %arg16[%c11_109, %c0_110, %c0_111], %353 {strides = array<i32>} : memref<16x8x32xbf16, #tpu.memory_space<vmem>>, vector<1x8x32xbf16>,
    %c12 = arith.constant 12 : index
    %c0_112 = arith.constant 0 : index
    %c0_113 = arith.constant 0 : index
    %354 = vector.load %arg15[%c12, %c0_112, %c0_113] : memref<16x8x128xf32, #tpu.memory_space<vmem>>, vector<1x8x128xf32>
    %355 = vector.shape_cast %354 : vector<1x8x128xf32> to vector<8x128xf32>
    %356 = arith.truncf %349 : vector<8x32xf32> to vector<8x32xbf16>
    %cst_114 = arith.constant dense<0.000000e+00> : vector<8x128xf32>
    %357 = tpu.matmul %356, %51, %cst_114 {dimension_numbers = #tpu.dot_dimension_numbers<[1], [0], [0], [1], [0, 0, 1, 1], [], []>} : vector<8x32xbf16>, vector<32x128xbf16>, vector<8x128xf32> -> vector<8x128xf32>
    %358 = arith.addf %355, %357 : vector<8x128xf32>
    %359 = vector.extract_strided_slice %358 {offsets = [0, 0], sizes = [8, 96], strides = [1, 1]} : vector<8x128xf32> to vector<8x96xf32>
    %360 = arith.negf %359 : vector<8x96xf32>
    %361 = math.exp %360 : vector<8x96xf32>
    %cst_115 = arith.constant 1.000000e+00 : f32
    %362 = vector.broadcast %cst_115 : f32 to vector<8x96xf32>
    %363 = arith.addf %362, %361 : vector<8x96xf32>
    %364 = arith.divf %362, %363 : vector<8x96xf32>
    %365 = vector.extract_strided_slice %358 {offsets = [0, 96], sizes = [8, 32], strides = [1, 1]} : vector<8x128xf32> to vector<8x32xf32>
    %366 = math.tanh %365 : vector<8x32xf32>
    %367 = vector.extract_strided_slice %364 {offsets = [0, 0], sizes = [8, 32], strides = [1, 1]} : vector<8x96xf32> to vector<8x32xf32>
    %368 = vector.extract_strided_slice %364 {offsets = [0, 32], sizes = [8, 32], strides = [1, 1]} : vector<8x96xf32> to vector<8x32xf32>
    %369 = vector.extract_strided_slice %364 {offsets = [0, 64], sizes = [8, 32], strides = [1, 1]} : vector<8x96xf32> to vector<8x32xf32>
    %370 = arith.mulf %368, %347 : vector<8x32xf32>
    %371 = arith.mulf %367, %366 : vector<8x32xf32>
    %372 = arith.addf %370, %371 : vector<8x32xf32>
    %373 = math.tanh %372 : vector<8x32xf32>
    %374 = arith.mulf %369, %373 : vector<8x32xf32>
    %375 = arith.truncf %374 : vector<8x32xf32> to vector<8x32xbf16>
    %c12_116 = arith.constant 12 : index
    %c0_117 = arith.constant 0 : index
    %c0_118 = arith.constant 0 : index
    %376 = vector.load %arg16[%c12_116, %c0_117, %c0_118] : memref<16x8x32xbf16, #tpu.memory_space<vmem>>, vector<1x8x32xbf16>
    %377 = vector.shape_cast %376 : vector<1x8x32xbf16> to vector<8x32xbf16>
    %378 = vector.shape_cast %375 : vector<8x32xbf16> to vector<1x8x32xbf16>
    tpu.vector_store %arg16[%c12_116, %c0_117, %c0_118], %378 {strides = array<i32>} : memref<16x8x32xbf16, #tpu.memory_space<vmem>>, vector<1x8x32xbf16>,
    %c13 = arith.constant 13 : index
    %c0_119 = arith.constant 0 : index
    %c0_120 = arith.constant 0 : index
    %379 = vector.load %arg15[%c13, %c0_119, %c0_120] : memref<16x8x128xf32, #tpu.memory_space<vmem>>, vector<1x8x128xf32>
    %380 = vector.shape_cast %379 : vector<1x8x128xf32> to vector<8x128xf32>
    %381 = arith.truncf %374 : vector<8x32xf32> to vector<8x32xbf16>
    %cst_121 = arith.constant dense<0.000000e+00> : vector<8x128xf32>
    %382 = tpu.matmul %381, %51, %cst_121 {dimension_numbers = #tpu.dot_dimension_numbers<[1], [0], [0], [1], [0, 0, 1, 1], [], []>} : vector<8x32xbf16>, vector<32x128xbf16>, vector<8x128xf32> -> vector<8x128xf32>
    %383 = arith.addf %380, %382 : vector<8x128xf32>
    %384 = vector.extract_strided_slice %383 {offsets = [0, 0], sizes = [8, 96], strides = [1, 1]} : vector<8x128xf32> to vector<8x96xf32>
    %385 = arith.negf %384 : vector<8x96xf32>
    %386 = math.exp %385 : vector<8x96xf32>
    %cst_122 = arith.constant 1.000000e+00 : f32
    %387 = vector.broadcast %cst_122 : f32 to vector<8x96xf32>
    %388 = arith.addf %387, %386 : vector<8x96xf32>
    %389 = arith.divf %387, %388 : vector<8x96xf32>
    %390 = vector.extract_strided_slice %383 {offsets = [0, 96], sizes = [8, 32], strides = [1, 1]} : vector<8x128xf32> to vector<8x32xf32>
    %391 = math.tanh %390 : vector<8x32xf32>
    %392 = vector.extract_strided_slice %389 {offsets = [0, 0], sizes = [8, 32], strides = [1, 1]} : vector<8x96xf32> to vector<8x32xf32>
    %393 = vector.extract_strided_slice %389 {offsets = [0, 32], sizes = [8, 32], strides = [1, 1]} : vector<8x96xf32> to vector<8x32xf32>
    %394 = vector.extract_strided_slice %389 {offsets = [0, 64], sizes = [8, 32], strides = [1, 1]} : vector<8x96xf32> to vector<8x32xf32>
    %395 = arith.mulf %393, %372 : vector<8x32xf32>
    %396 = arith.mulf %392, %391 : vector<8x32xf32>
    %397 = arith.addf %395, %396 : vector<8x32xf32>
    %398 = math.tanh %397 : vector<8x32xf32>
    %399 = arith.mulf %394, %398 : vector<8x32xf32>
    %400 = arith.truncf %399 : vector<8x32xf32> to vector<8x32xbf16>
    %c13_123 = arith.constant 13 : index
    %c0_124 = arith.constant 0 : index
    %c0_125 = arith.constant 0 : index
    %401 = vector.load %arg16[%c13_123, %c0_124, %c0_125] : memref<16x8x32xbf16, #tpu.memory_space<vmem>>, vector<1x8x32xbf16>
    %402 = vector.shape_cast %401 : vector<1x8x32xbf16> to vector<8x32xbf16>
    %403 = vector.shape_cast %400 : vector<8x32xbf16> to vector<1x8x32xbf16>
    tpu.vector_store %arg16[%c13_123, %c0_124, %c0_125], %403 {strides = array<i32>} : memref<16x8x32xbf16, #tpu.memory_space<vmem>>, vector<1x8x32xbf16>,
    %c14 = arith.constant 14 : index
    %c0_126 = arith.constant 0 : index
    %c0_127 = arith.constant 0 : index
    %404 = vector.load %arg15[%c14, %c0_126, %c0_127] : memref<16x8x128xf32, #tpu.memory_space<vmem>>, vector<1x8x128xf32>
    %405 = vector.shape_cast %404 : vector<1x8x128xf32> to vector<8x128xf32>
    %406 = arith.truncf %399 : vector<8x32xf32> to vector<8x32xbf16>
    %cst_128 = arith.constant dense<0.000000e+00> : vector<8x128xf32>
    %407 = tpu.matmul %406, %51, %cst_128 {dimension_numbers = #tpu.dot_dimension_numbers<[1], [0], [0], [1], [0, 0, 1, 1], [], []>} : vector<8x32xbf16>, vector<32x128xbf16>, vector<8x128xf32> -> vector<8x128xf32>
    %408 = arith.addf %405, %407 : vector<8x128xf32>
    %409 = vector.extract_strided_slice %408 {offsets = [0, 0], sizes = [8, 96], strides = [1, 1]} : vector<8x128xf32> to vector<8x96xf32>
    %410 = arith.negf %409 : vector<8x96xf32>
    %411 = math.exp %410 : vector<8x96xf32>
    %cst_129 = arith.constant 1.000000e+00 : f32
    %412 = vector.broadcast %cst_129 : f32 to vector<8x96xf32>
    %413 = arith.addf %412, %411 : vector<8x96xf32>
    %414 = arith.divf %412, %413 : vector<8x96xf32>
    %415 = vector.extract_strided_slice %408 {offsets = [0, 96], sizes = [8, 32], strides = [1, 1]} : vector<8x128xf32> to vector<8x32xf32>
    %416 = math.tanh %415 : vector<8x32xf32>
    %417 = vector.extract_strided_slice %414 {offsets = [0, 0], sizes = [8, 32], strides = [1, 1]} : vector<8x96xf32> to vector<8x32xf32>
    %418 = vector.extract_strided_slice %414 {offsets = [0, 32], sizes = [8, 32], strides = [1, 1]} : vector<8x96xf32> to vector<8x32xf32>
    %419 = vector.extract_strided_slice %414 {offsets = [0, 64], sizes = [8, 32], strides = [1, 1]} : vector<8x96xf32> to vector<8x32xf32>
    %420 = arith.mulf %418, %397 : vector<8x32xf32>
    %421 = arith.mulf %417, %416 : vector<8x32xf32>
    %422 = arith.addf %420, %421 : vector<8x32xf32>
    %423 = math.tanh %422 : vector<8x32xf32>
    %424 = arith.mulf %419, %423 : vector<8x32xf32>
    %425 = arith.truncf %424 : vector<8x32xf32> to vector<8x32xbf16>
    %c14_130 = arith.constant 14 : index
    %c0_131 = arith.constant 0 : index
    %c0_132 = arith.constant 0 : index
    %426 = vector.load %arg16[%c14_130, %c0_131, %c0_132] : memref<16x8x32xbf16, #tpu.memory_space<vmem>>, vector<1x8x32xbf16>
    %427 = vector.shape_cast %426 : vector<1x8x32xbf16> to vector<8x32xbf16>
    %428 = vector.shape_cast %425 : vector<8x32xbf16> to vector<1x8x32xbf16>
    tpu.vector_store %arg16[%c14_130, %c0_131, %c0_132], %428 {strides = array<i32>} : memref<16x8x32xbf16, #tpu.memory_space<vmem>>, vector<1x8x32xbf16>,
    %c15 = arith.constant 15 : index
    %c0_133 = arith.constant 0 : index
    %c0_134 = arith.constant 0 : index
    %429 = vector.load %arg15[%c15, %c0_133, %c0_134] : memref<16x8x128xf32, #tpu.memory_space<vmem>>, vector<1x8x128xf32>
    %430 = vector.shape_cast %429 : vector<1x8x128xf32> to vector<8x128xf32>
    %431 = arith.truncf %424 : vector<8x32xf32> to vector<8x32xbf16>
    %cst_135 = arith.constant dense<0.000000e+00> : vector<8x128xf32>
    %432 = tpu.matmul %431, %51, %cst_135 {dimension_numbers = #tpu.dot_dimension_numbers<[1], [0], [0], [1], [0, 0, 1, 1], [], []>} : vector<8x32xbf16>, vector<32x128xbf16>, vector<8x128xf32> -> vector<8x128xf32>
    %433 = arith.addf %430, %432 : vector<8x128xf32>
    %434 = vector.extract_strided_slice %433 {offsets = [0, 0], sizes = [8, 96], strides = [1, 1]} : vector<8x128xf32> to vector<8x96xf32>
    %435 = arith.negf %434 : vector<8x96xf32>
    %436 = math.exp %435 : vector<8x96xf32>
    %cst_136 = arith.constant 1.000000e+00 : f32
    %437 = vector.broadcast %cst_136 : f32 to vector<8x96xf32>
    %438 = arith.addf %437, %436 : vector<8x96xf32>
    %439 = arith.divf %437, %438 : vector<8x96xf32>
    %440 = vector.extract_strided_slice %433 {offsets = [0, 96], sizes = [8, 32], strides = [1, 1]} : vector<8x128xf32> to vector<8x32xf32>
    %441 = math.tanh %440 : vector<8x32xf32>
    %442 = vector.extract_strided_slice %439 {offsets = [0, 0], sizes = [8, 32], strides = [1, 1]} : vector<8x96xf32> to vector<8x32xf32>
    %443 = vector.extract_strided_slice %439 {offsets = [0, 32], sizes = [8, 32], strides = [1, 1]} : vector<8x96xf32> to vector<8x32xf32>
    %444 = vector.extract_strided_slice %439 {offsets = [0, 64], sizes = [8, 32], strides = [1, 1]} : vector<8x96xf32> to vector<8x32xf32>
    %445 = arith.mulf %443, %422 : vector<8x32xf32>
    %446 = arith.mulf %442, %441 : vector<8x32xf32>
    %447 = arith.addf %445, %446 : vector<8x32xf32>
    %448 = math.tanh %447 : vector<8x32xf32>
    %449 = arith.mulf %444, %448 : vector<8x32xf32>
    %450 = arith.truncf %449 : vector<8x32xf32> to vector<8x32xbf16>
    %c15_137 = arith.constant 15 : index
    %c0_138 = arith.constant 0 : index
    %c0_139 = arith.constant 0 : index
    %451 = vector.load %arg16[%c15_137, %c0_138, %c0_139] : memref<16x8x32xbf16, #tpu.memory_space<vmem>>, vector<1x8x32xbf16>
    %452 = vector.shape_cast %451 : vector<1x8x32xbf16> to vector<8x32xbf16>
    %453 = vector.shape_cast %450 : vector<8x32xbf16> to vector<1x8x32xbf16>
    tpu.vector_store %arg16[%c15_137, %c0_138, %c0_139], %453 {strides = array<i32>} : memref<16x8x32xbf16, #tpu.memory_space<vmem>>, vector<1x8x32xbf16>,
    %c0_140 = arith.constant 0 : index
    %c0_141 = arith.constant 0 : index
    %c0_142 = arith.constant 0 : index
    %454 = vector.load %arg16[%c0_140, %c0_141, %c0_142] : memref<16x8x32xbf16, #tpu.memory_space<vmem>>, vector<16x8x32xbf16>
    %455 = vector.shape_cast %454 : vector<16x8x32xbf16> to vector<128x32xbf16>
    %c0_143 = arith.constant 0 : index
    %c0_144 = arith.constant 0 : index
    %456 = vector.load %arg9[%c0_143, %c0_144] : memref<32x128xbf16, #tpu.memory_space<vmem>>, vector<32x128xbf16>
    %c0_145 = arith.constant 0 : index
    %c0_146 = arith.constant 0 : index
    %457 = vector.load %arg11[%c0_145, %c0_146] : memref<1x128xf32, #tpu.memory_space<vmem>>, vector<1x128xf32>
    %cst_147 = arith.constant dense<0.000000e+00> : vector<128x128xf32>
    %458 = tpu.matmul %455, %456, %cst_147 {dimension_numbers = #tpu.dot_dimension_numbers<[1], [0], [0], [1], [0, 0, 1, 1], [], []>} : vector<128x32xbf16>, vector<32x128xbf16>, vector<128x128xf32> -> vector<128x128xf32>
    %459 = vector.broadcast %457 : vector<1x128xf32> to vector<128x128xf32>
    %460 = arith.addf %458, %459 : vector<128x128xf32>
    %461 = vector.shape_cast %460 : vector<128x128xf32> to vector<16x8x128xf32>
    %c0_148 = arith.constant 0 : index
    %c0_149 = arith.constant 0 : index
    %c0_150 = arith.constant 0 : index
    %462 = vector.load %arg15[%c0_148, %c0_149, %c0_150] : memref<16x8x128xf32, #tpu.memory_space<vmem>>, vector<16x8x128xf32>
    tpu.vector_store %arg15[%c0_148, %c0_149, %c0_150], %461 {strides = array<i32>} : memref<16x8x128xf32, #tpu.memory_space<vmem>>, vector<16x8x128xf32>,
    %c0_151 = arith.constant 0 : index
    %c0_152 = arith.constant 0 : index
    %463 = vector.load %arg10[%c0_151, %c0_152] : memref<32x128xbf16, #tpu.memory_space<vmem>>, vector<32x128xbf16>
    %cst_153 = arith.constant 0.000000e+00 : f32
    %464 = vector.broadcast %cst_153 : f32 to vector<8x32xf32>
    %cst_154 = arith.constant 0.000000e+00 : f32
    %465 = vector.broadcast %cst_154 : f32 to vector<8x32xf32>
    %c0_155 = arith.constant 0 : index
    %c0_156 = arith.constant 0 : index
    %c0_157 = arith.constant 0 : index
    %466 = vector.load %arg15[%c0_155, %c0_156, %c0_157] : memref<16x8x128xf32, #tpu.memory_space<vmem>>, vector<1x8x128xf32>
    %467 = vector.shape_cast %466 : vector<1x8x128xf32> to vector<8x128xf32>
    %468 = arith.truncf %464 : vector<8x32xf32> to vector<8x32xbf16>
    %cst_158 = arith.constant dense<0.000000e+00> : vector<8x128xf32>
    %469 = tpu.matmul %468, %463, %cst_158 {dimension_numbers = #tpu.dot_dimension_numbers<[1], [0], [0], [1], [0, 0, 1, 1], [], []>} : vector<8x32xbf16>, vector<32x128xbf16>, vector<8x128xf32> -> vector<8x128xf32>
    %470 = arith.addf %467, %469 : vector<8x128xf32>
    %471 = vector.extract_strided_slice %470 {offsets = [0, 0], sizes = [8, 96], strides = [1, 1]} : vector<8x128xf32> to vector<8x96xf32>
    %472 = arith.negf %471 : vector<8x96xf32>
    %473 = math.exp %472 : vector<8x96xf32>
    %cst_159 = arith.constant 1.000000e+00 : f32
    %474 = vector.broadcast %cst_159 : f32 to vector<8x96xf32>
    %475 = arith.addf %474, %473 : vector<8x96xf32>
    %476 = arith.divf %474, %475 : vector<8x96xf32>
    %477 = vector.extract_strided_slice %470 {offsets = [0, 96], sizes = [8, 32], strides = [1, 1]} : vector<8x128xf32> to vector<8x32xf32>
    %478 = math.tanh %477 : vector<8x32xf32>
    %479 = vector.extract_strided_slice %476 {offsets = [0, 0], sizes = [8, 32], strides = [1, 1]} : vector<8x96xf32> to vector<8x32xf32>
    %480 = vector.extract_strided_slice %476 {offsets = [0, 32], sizes = [8, 32], strides = [1, 1]} : vector<8x96xf32> to vector<8x32xf32>
    %481 = vector.extract_strided_slice %476 {offsets = [0, 64], sizes = [8, 32], strides = [1, 1]} : vector<8x96xf32> to vector<8x32xf32>
    %482 = arith.mulf %480, %465 : vector<8x32xf32>
    %483 = arith.mulf %479, %478 : vector<8x32xf32>
    %484 = arith.addf %482, %483 : vector<8x32xf32>
    %485 = math.tanh %484 : vector<8x32xf32>
    %486 = arith.mulf %481, %485 : vector<8x32xf32>
    %c1_160 = arith.constant 1 : index
    %c0_161 = arith.constant 0 : index
    %c0_162 = arith.constant 0 : index
    %487 = vector.load %arg15[%c1_160, %c0_161, %c0_162] : memref<16x8x128xf32, #tpu.memory_space<vmem>>, vector<1x8x128xf32>
    %488 = vector.shape_cast %487 : vector<1x8x128xf32> to vector<8x128xf32>
    %489 = arith.truncf %486 : vector<8x32xf32> to vector<8x32xbf16>
    %cst_163 = arith.constant dense<0.000000e+00> : vector<8x128xf32>
    %490 = tpu.matmul %489, %463, %cst_163 {dimension_numbers = #tpu.dot_dimension_numbers<[1], [0], [0], [1], [0, 0, 1, 1], [], []>} : vector<8x32xbf16>, vector<32x128xbf16>, vector<8x128xf32> -> vector<8x128xf32>
    %491 = arith.addf %488, %490 : vector<8x128xf32>
    %492 = vector.extract_strided_slice %491 {offsets = [0, 0], sizes = [8, 96], strides = [1, 1]} : vector<8x128xf32> to vector<8x96xf32>
    %493 = arith.negf %492 : vector<8x96xf32>
    %494 = math.exp %493 : vector<8x96xf32>
    %cst_164 = arith.constant 1.000000e+00 : f32
    %495 = vector.broadcast %cst_164 : f32 to vector<8x96xf32>
    %496 = arith.addf %495, %494 : vector<8x96xf32>
    %497 = arith.divf %495, %496 : vector<8x96xf32>
    %498 = vector.extract_strided_slice %491 {offsets = [0, 96], sizes = [8, 32], strides = [1, 1]} : vector<8x128xf32> to vector<8x32xf32>
    %499 = math.tanh %498 : vector<8x32xf32>
    %500 = vector.extract_strided_slice %497 {offsets = [0, 0], sizes = [8, 32], strides = [1, 1]} : vector<8x96xf32> to vector<8x32xf32>
    %501 = vector.extract_strided_slice %497 {offsets = [0, 32], sizes = [8, 32], strides = [1, 1]} : vector<8x96xf32> to vector<8x32xf32>
    %502 = vector.extract_strided_slice %497 {offsets = [0, 64], sizes = [8, 32], strides = [1, 1]} : vector<8x96xf32> to vector<8x32xf32>
    %503 = arith.mulf %501, %484 : vector<8x32xf32>
    %504 = arith.mulf %500, %499 : vector<8x32xf32>
    %505 = arith.addf %503, %504 : vector<8x32xf32>
    %506 = math.tanh %505 : vector<8x32xf32>
    %507 = arith.mulf %502, %506 : vector<8x32xf32>
    %c2_165 = arith.constant 2 : index
    %c0_166 = arith.constant 0 : index
    %c0_167 = arith.constant 0 : index
    %508 = vector.load %arg15[%c2_165, %c0_166, %c0_167] : memref<16x8x128xf32, #tpu.memory_space<vmem>>, vector<1x8x128xf32>
    %509 = vector.shape_cast %508 : vector<1x8x128xf32> to vector<8x128xf32>
    %510 = arith.truncf %507 : vector<8x32xf32> to vector<8x32xbf16>
    %cst_168 = arith.constant dense<0.000000e+00> : vector<8x128xf32>
    %511 = tpu.matmul %510, %463, %cst_168 {dimension_numbers = #tpu.dot_dimension_numbers<[1], [0], [0], [1], [0, 0, 1, 1], [], []>} : vector<8x32xbf16>, vector<32x128xbf16>, vector<8x128xf32> -> vector<8x128xf32>
    %512 = arith.addf %509, %511 : vector<8x128xf32>
    %513 = vector.extract_strided_slice %512 {offsets = [0, 0], sizes = [8, 96], strides = [1, 1]} : vector<8x128xf32> to vector<8x96xf32>
    %514 = arith.negf %513 : vector<8x96xf32>
    %515 = math.exp %514 : vector<8x96xf32>
    %cst_169 = arith.constant 1.000000e+00 : f32
    %516 = vector.broadcast %cst_169 : f32 to vector<8x96xf32>
    %517 = arith.addf %516, %515 : vector<8x96xf32>
    %518 = arith.divf %516, %517 : vector<8x96xf32>
    %519 = vector.extract_strided_slice %512 {offsets = [0, 96], sizes = [8, 32], strides = [1, 1]} : vector<8x128xf32> to vector<8x32xf32>
    %520 = math.tanh %519 : vector<8x32xf32>
    %521 = vector.extract_strided_slice %518 {offsets = [0, 0], sizes = [8, 32], strides = [1, 1]} : vector<8x96xf32> to vector<8x32xf32>
    %522 = vector.extract_strided_slice %518 {offsets = [0, 32], sizes = [8, 32], strides = [1, 1]} : vector<8x96xf32> to vector<8x32xf32>
    %523 = vector.extract_strided_slice %518 {offsets = [0, 64], sizes = [8, 32], strides = [1, 1]} : vector<8x96xf32> to vector<8x32xf32>
    %524 = arith.mulf %522, %505 : vector<8x32xf32>
    %525 = arith.mulf %521, %520 : vector<8x32xf32>
    %526 = arith.addf %524, %525 : vector<8x32xf32>
    %527 = math.tanh %526 : vector<8x32xf32>
    %528 = arith.mulf %523, %527 : vector<8x32xf32>
    %c3_170 = arith.constant 3 : index
    %c0_171 = arith.constant 0 : index
    %c0_172 = arith.constant 0 : index
    %529 = vector.load %arg15[%c3_170, %c0_171, %c0_172] : memref<16x8x128xf32, #tpu.memory_space<vmem>>, vector<1x8x128xf32>
    %530 = vector.shape_cast %529 : vector<1x8x128xf32> to vector<8x128xf32>
    %531 = arith.truncf %528 : vector<8x32xf32> to vector<8x32xbf16>
    %cst_173 = arith.constant dense<0.000000e+00> : vector<8x128xf32>
    %532 = tpu.matmul %531, %463, %cst_173 {dimension_numbers = #tpu.dot_dimension_numbers<[1], [0], [0], [1], [0, 0, 1, 1], [], []>} : vector<8x32xbf16>, vector<32x128xbf16>, vector<8x128xf32> -> vector<8x128xf32>
    %533 = arith.addf %530, %532 : vector<8x128xf32>
    %534 = vector.extract_strided_slice %533 {offsets = [0, 0], sizes = [8, 96], strides = [1, 1]} : vector<8x128xf32> to vector<8x96xf32>
    %535 = arith.negf %534 : vector<8x96xf32>
    %536 = math.exp %535 : vector<8x96xf32>
    %cst_174 = arith.constant 1.000000e+00 : f32
    %537 = vector.broadcast %cst_174 : f32 to vector<8x96xf32>
    %538 = arith.addf %537, %536 : vector<8x96xf32>
    %539 = arith.divf %537, %538 : vector<8x96xf32>
    %540 = vector.extract_strided_slice %533 {offsets = [0, 96], sizes = [8, 32], strides = [1, 1]} : vector<8x128xf32> to vector<8x32xf32>
    %541 = math.tanh %540 : vector<8x32xf32>
    %542 = vector.extract_strided_slice %539 {offsets = [0, 0], sizes = [8, 32], strides = [1, 1]} : vector<8x96xf32> to vector<8x32xf32>
    %543 = vector.extract_strided_slice %539 {offsets = [0, 32], sizes = [8, 32], strides = [1, 1]} : vector<8x96xf32> to vector<8x32xf32>
    %544 = vector.extract_strided_slice %539 {offsets = [0, 64], sizes = [8, 32], strides = [1, 1]} : vector<8x96xf32> to vector<8x32xf32>
    %545 = arith.mulf %543, %526 : vector<8x32xf32>
    %546 = arith.mulf %542, %541 : vector<8x32xf32>
    %547 = arith.addf %545, %546 : vector<8x32xf32>
    %548 = math.tanh %547 : vector<8x32xf32>
    %549 = arith.mulf %544, %548 : vector<8x32xf32>
    %c4_175 = arith.constant 4 : index
    %c0_176 = arith.constant 0 : index
    %c0_177 = arith.constant 0 : index
    %550 = vector.load %arg15[%c4_175, %c0_176, %c0_177] : memref<16x8x128xf32, #tpu.memory_space<vmem>>, vector<1x8x128xf32>
    %551 = vector.shape_cast %550 : vector<1x8x128xf32> to vector<8x128xf32>
    %552 = arith.truncf %549 : vector<8x32xf32> to vector<8x32xbf16>
    %cst_178 = arith.constant dense<0.000000e+00> : vector<8x128xf32>
    %553 = tpu.matmul %552, %463, %cst_178 {dimension_numbers = #tpu.dot_dimension_numbers<[1], [0], [0], [1], [0, 0, 1, 1], [], []>} : vector<8x32xbf16>, vector<32x128xbf16>, vector<8x128xf32> -> vector<8x128xf32>
    %554 = arith.addf %551, %553 : vector<8x128xf32>
    %555 = vector.extract_strided_slice %554 {offsets = [0, 0], sizes = [8, 96], strides = [1, 1]} : vector<8x128xf32> to vector<8x96xf32>
    %556 = arith.negf %555 : vector<8x96xf32>
    %557 = math.exp %556 : vector<8x96xf32>
    %cst_179 = arith.constant 1.000000e+00 : f32
    %558 = vector.broadcast %cst_179 : f32 to vector<8x96xf32>
    %559 = arith.addf %558, %557 : vector<8x96xf32>
    %560 = arith.divf %558, %559 : vector<8x96xf32>
    %561 = vector.extract_strided_slice %554 {offsets = [0, 96], sizes = [8, 32], strides = [1, 1]} : vector<8x128xf32> to vector<8x32xf32>
    %562 = math.tanh %561 : vector<8x32xf32>
    %563 = vector.extract_strided_slice %560 {offsets = [0, 0], sizes = [8, 32], strides = [1, 1]} : vector<8x96xf32> to vector<8x32xf32>
    %564 = vector.extract_strided_slice %560 {offsets = [0, 32], sizes = [8, 32], strides = [1, 1]} : vector<8x96xf32> to vector<8x32xf32>
    %565 = vector.extract_strided_slice %560 {offsets = [0, 64], sizes = [8, 32], strides = [1, 1]} : vector<8x96xf32> to vector<8x32xf32>
    %566 = arith.mulf %564, %547 : vector<8x32xf32>
    %567 = arith.mulf %563, %562 : vector<8x32xf32>
    %568 = arith.addf %566, %567 : vector<8x32xf32>
    %569 = math.tanh %568 : vector<8x32xf32>
    %570 = arith.mulf %565, %569 : vector<8x32xf32>
    %c5_180 = arith.constant 5 : index
    %c0_181 = arith.constant 0 : index
    %c0_182 = arith.constant 0 : index
    %571 = vector.load %arg15[%c5_180, %c0_181, %c0_182] : memref<16x8x128xf32, #tpu.memory_space<vmem>>, vector<1x8x128xf32>
    %572 = vector.shape_cast %571 : vector<1x8x128xf32> to vector<8x128xf32>
    %573 = arith.truncf %570 : vector<8x32xf32> to vector<8x32xbf16>
    %cst_183 = arith.constant dense<0.000000e+00> : vector<8x128xf32>
    %574 = tpu.matmul %573, %463, %cst_183 {dimension_numbers = #tpu.dot_dimension_numbers<[1], [0], [0], [1], [0, 0, 1, 1], [], []>} : vector<8x32xbf16>, vector<32x128xbf16>, vector<8x128xf32> -> vector<8x128xf32>
    %575 = arith.addf %572, %574 : vector<8x128xf32>
    %576 = vector.extract_strided_slice %575 {offsets = [0, 0], sizes = [8, 96], strides = [1, 1]} : vector<8x128xf32> to vector<8x96xf32>
    %577 = arith.negf %576 : vector<8x96xf32>
    %578 = math.exp %577 : vector<8x96xf32>
    %cst_184 = arith.constant 1.000000e+00 : f32
    %579 = vector.broadcast %cst_184 : f32 to vector<8x96xf32>
    %580 = arith.addf %579, %578 : vector<8x96xf32>
    %581 = arith.divf %579, %580 : vector<8x96xf32>
    %582 = vector.extract_strided_slice %575 {offsets = [0, 96], sizes = [8, 32], strides = [1, 1]} : vector<8x128xf32> to vector<8x32xf32>
    %583 = math.tanh %582 : vector<8x32xf32>
    %584 = vector.extract_strided_slice %581 {offsets = [0, 0], sizes = [8, 32], strides = [1, 1]} : vector<8x96xf32> to vector<8x32xf32>
    %585 = vector.extract_strided_slice %581 {offsets = [0, 32], sizes = [8, 32], strides = [1, 1]} : vector<8x96xf32> to vector<8x32xf32>
    %586 = vector.extract_strided_slice %581 {offsets = [0, 64], sizes = [8, 32], strides = [1, 1]} : vector<8x96xf32> to vector<8x32xf32>
    %587 = arith.mulf %585, %568 : vector<8x32xf32>
    %588 = arith.mulf %584, %583 : vector<8x32xf32>
    %589 = arith.addf %587, %588 : vector<8x32xf32>
    %590 = math.tanh %589 : vector<8x32xf32>
    %591 = arith.mulf %586, %590 : vector<8x32xf32>
    %c6_185 = arith.constant 6 : index
    %c0_186 = arith.constant 0 : index
    %c0_187 = arith.constant 0 : index
    %592 = vector.load %arg15[%c6_185, %c0_186, %c0_187] : memref<16x8x128xf32, #tpu.memory_space<vmem>>, vector<1x8x128xf32>
    %593 = vector.shape_cast %592 : vector<1x8x128xf32> to vector<8x128xf32>
    %594 = arith.truncf %591 : vector<8x32xf32> to vector<8x32xbf16>
    %cst_188 = arith.constant dense<0.000000e+00> : vector<8x128xf32>
    %595 = tpu.matmul %594, %463, %cst_188 {dimension_numbers = #tpu.dot_dimension_numbers<[1], [0], [0], [1], [0, 0, 1, 1], [], []>} : vector<8x32xbf16>, vector<32x128xbf16>, vector<8x128xf32> -> vector<8x128xf32>
    %596 = arith.addf %593, %595 : vector<8x128xf32>
    %597 = vector.extract_strided_slice %596 {offsets = [0, 0], sizes = [8, 96], strides = [1, 1]} : vector<8x128xf32> to vector<8x96xf32>
    %598 = arith.negf %597 : vector<8x96xf32>
    %599 = math.exp %598 : vector<8x96xf32>
    %cst_189 = arith.constant 1.000000e+00 : f32
    %600 = vector.broadcast %cst_189 : f32 to vector<8x96xf32>
    %601 = arith.addf %600, %599 : vector<8x96xf32>
    %602 = arith.divf %600, %601 : vector<8x96xf32>
    %603 = vector.extract_strided_slice %596 {offsets = [0, 96], sizes = [8, 32], strides = [1, 1]} : vector<8x128xf32> to vector<8x32xf32>
    %604 = math.tanh %603 : vector<8x32xf32>
    %605 = vector.extract_strided_slice %602 {offsets = [0, 0], sizes = [8, 32], strides = [1, 1]} : vector<8x96xf32> to vector<8x32xf32>
    %606 = vector.extract_strided_slice %602 {offsets = [0, 32], sizes = [8, 32], strides = [1, 1]} : vector<8x96xf32> to vector<8x32xf32>
    %607 = vector.extract_strided_slice %602 {offsets = [0, 64], sizes = [8, 32], strides = [1, 1]} : vector<8x96xf32> to vector<8x32xf32>
    %608 = arith.mulf %606, %589 : vector<8x32xf32>
    %609 = arith.mulf %605, %604 : vector<8x32xf32>
    %610 = arith.addf %608, %609 : vector<8x32xf32>
    %611 = math.tanh %610 : vector<8x32xf32>
    %612 = arith.mulf %607, %611 : vector<8x32xf32>
    %c7_190 = arith.constant 7 : index
    %c0_191 = arith.constant 0 : index
    %c0_192 = arith.constant 0 : index
    %613 = vector.load %arg15[%c7_190, %c0_191, %c0_192] : memref<16x8x128xf32, #tpu.memory_space<vmem>>, vector<1x8x128xf32>
    %614 = vector.shape_cast %613 : vector<1x8x128xf32> to vector<8x128xf32>
    %615 = arith.truncf %612 : vector<8x32xf32> to vector<8x32xbf16>
    %cst_193 = arith.constant dense<0.000000e+00> : vector<8x128xf32>
    %616 = tpu.matmul %615, %463, %cst_193 {dimension_numbers = #tpu.dot_dimension_numbers<[1], [0], [0], [1], [0, 0, 1, 1], [], []>} : vector<8x32xbf16>, vector<32x128xbf16>, vector<8x128xf32> -> vector<8x128xf32>
    %617 = arith.addf %614, %616 : vector<8x128xf32>
    %618 = vector.extract_strided_slice %617 {offsets = [0, 0], sizes = [8, 96], strides = [1, 1]} : vector<8x128xf32> to vector<8x96xf32>
    %619 = arith.negf %618 : vector<8x96xf32>
    %620 = math.exp %619 : vector<8x96xf32>
    %cst_194 = arith.constant 1.000000e+00 : f32
    %621 = vector.broadcast %cst_194 : f32 to vector<8x96xf32>
    %622 = arith.addf %621, %620 : vector<8x96xf32>
    %623 = arith.divf %621, %622 : vector<8x96xf32>
    %624 = vector.extract_strided_slice %617 {offsets = [0, 96], sizes = [8, 32], strides = [1, 1]} : vector<8x128xf32> to vector<8x32xf32>
    %625 = math.tanh %624 : vector<8x32xf32>
    %626 = vector.extract_strided_slice %623 {offsets = [0, 0], sizes = [8, 32], strides = [1, 1]} : vector<8x96xf32> to vector<8x32xf32>
    %627 = vector.extract_strided_slice %623 {offsets = [0, 32], sizes = [8, 32], strides = [1, 1]} : vector<8x96xf32> to vector<8x32xf32>
    %628 = vector.extract_strided_slice %623 {offsets = [0, 64], sizes = [8, 32], strides = [1, 1]} : vector<8x96xf32> to vector<8x32xf32>
    %629 = arith.mulf %627, %610 : vector<8x32xf32>
    %630 = arith.mulf %626, %625 : vector<8x32xf32>
    %631 = arith.addf %629, %630 : vector<8x32xf32>
    %632 = math.tanh %631 : vector<8x32xf32>
    %633 = arith.mulf %628, %632 : vector<8x32xf32>
    %c8_195 = arith.constant 8 : index
    %c0_196 = arith.constant 0 : index
    %c0_197 = arith.constant 0 : index
    %634 = vector.load %arg15[%c8_195, %c0_196, %c0_197] : memref<16x8x128xf32, #tpu.memory_space<vmem>>, vector<1x8x128xf32>
    %635 = vector.shape_cast %634 : vector<1x8x128xf32> to vector<8x128xf32>
    %636 = arith.truncf %633 : vector<8x32xf32> to vector<8x32xbf16>
    %cst_198 = arith.constant dense<0.000000e+00> : vector<8x128xf32>
    %637 = tpu.matmul %636, %463, %cst_198 {dimension_numbers = #tpu.dot_dimension_numbers<[1], [0], [0], [1], [0, 0, 1, 1], [], []>} : vector<8x32xbf16>, vector<32x128xbf16>, vector<8x128xf32> -> vector<8x128xf32>
    %638 = arith.addf %635, %637 : vector<8x128xf32>
    %639 = vector.extract_strided_slice %638 {offsets = [0, 0], sizes = [8, 96], strides = [1, 1]} : vector<8x128xf32> to vector<8x96xf32>
    %640 = arith.negf %639 : vector<8x96xf32>
    %641 = math.exp %640 : vector<8x96xf32>
    %cst_199 = arith.constant 1.000000e+00 : f32
    %642 = vector.broadcast %cst_199 : f32 to vector<8x96xf32>
    %643 = arith.addf %642, %641 : vector<8x96xf32>
    %644 = arith.divf %642, %643 : vector<8x96xf32>
    %645 = vector.extract_strided_slice %638 {offsets = [0, 96], sizes = [8, 32], strides = [1, 1]} : vector<8x128xf32> to vector<8x32xf32>
    %646 = math.tanh %645 : vector<8x32xf32>
    %647 = vector.extract_strided_slice %644 {offsets = [0, 0], sizes = [8, 32], strides = [1, 1]} : vector<8x96xf32> to vector<8x32xf32>
    %648 = vector.extract_strided_slice %644 {offsets = [0, 32], sizes = [8, 32], strides = [1, 1]} : vector<8x96xf32> to vector<8x32xf32>
    %649 = vector.extract_strided_slice %644 {offsets = [0, 64], sizes = [8, 32], strides = [1, 1]} : vector<8x96xf32> to vector<8x32xf32>
    %650 = arith.mulf %648, %631 : vector<8x32xf32>
    %651 = arith.mulf %647, %646 : vector<8x32xf32>
    %652 = arith.addf %650, %651 : vector<8x32xf32>
    %653 = math.tanh %652 : vector<8x32xf32>
    %654 = arith.mulf %649, %653 : vector<8x32xf32>
    %c9_200 = arith.constant 9 : index
    %c0_201 = arith.constant 0 : index
    %c0_202 = arith.constant 0 : index
    %655 = vector.load %arg15[%c9_200, %c0_201, %c0_202] : memref<16x8x128xf32, #tpu.memory_space<vmem>>, vector<1x8x128xf32>
    %656 = vector.shape_cast %655 : vector<1x8x128xf32> to vector<8x128xf32>
    %657 = arith.truncf %654 : vector<8x32xf32> to vector<8x32xbf16>
    %cst_203 = arith.constant dense<0.000000e+00> : vector<8x128xf32>
    %658 = tpu.matmul %657, %463, %cst_203 {dimension_numbers = #tpu.dot_dimension_numbers<[1], [0], [0], [1], [0, 0, 1, 1], [], []>} : vector<8x32xbf16>, vector<32x128xbf16>, vector<8x128xf32> -> vector<8x128xf32>
    %659 = arith.addf %656, %658 : vector<8x128xf32>
    %660 = vector.extract_strided_slice %659 {offsets = [0, 0], sizes = [8, 96], strides = [1, 1]} : vector<8x128xf32> to vector<8x96xf32>
    %661 = arith.negf %660 : vector<8x96xf32>
    %662 = math.exp %661 : vector<8x96xf32>
    %cst_204 = arith.constant 1.000000e+00 : f32
    %663 = vector.broadcast %cst_204 : f32 to vector<8x96xf32>
    %664 = arith.addf %663, %662 : vector<8x96xf32>
    %665 = arith.divf %663, %664 : vector<8x96xf32>
    %666 = vector.extract_strided_slice %659 {offsets = [0, 96], sizes = [8, 32], strides = [1, 1]} : vector<8x128xf32> to vector<8x32xf32>
    %667 = math.tanh %666 : vector<8x32xf32>
    %668 = vector.extract_strided_slice %665 {offsets = [0, 0], sizes = [8, 32], strides = [1, 1]} : vector<8x96xf32> to vector<8x32xf32>
    %669 = vector.extract_strided_slice %665 {offsets = [0, 32], sizes = [8, 32], strides = [1, 1]} : vector<8x96xf32> to vector<8x32xf32>
    %670 = vector.extract_strided_slice %665 {offsets = [0, 64], sizes = [8, 32], strides = [1, 1]} : vector<8x96xf32> to vector<8x32xf32>
    %671 = arith.mulf %669, %652 : vector<8x32xf32>
    %672 = arith.mulf %668, %667 : vector<8x32xf32>
    %673 = arith.addf %671, %672 : vector<8x32xf32>
    %674 = math.tanh %673 : vector<8x32xf32>
    %675 = arith.mulf %670, %674 : vector<8x32xf32>
    %c10_205 = arith.constant 10 : index
    %c0_206 = arith.constant 0 : index
    %c0_207 = arith.constant 0 : index
    %676 = vector.load %arg15[%c10_205, %c0_206, %c0_207] : memref<16x8x128xf32, #tpu.memory_space<vmem>>, vector<1x8x128xf32>
    %677 = vector.shape_cast %676 : vector<1x8x128xf32> to vector<8x128xf32>
    %678 = arith.truncf %675 : vector<8x32xf32> to vector<8x32xbf16>
    %cst_208 = arith.constant dense<0.000000e+00> : vector<8x128xf32>
    %679 = tpu.matmul %678, %463, %cst_208 {dimension_numbers = #tpu.dot_dimension_numbers<[1], [0], [0], [1], [0, 0, 1, 1], [], []>} : vector<8x32xbf16>, vector<32x128xbf16>, vector<8x128xf32> -> vector<8x128xf32>
    %680 = arith.addf %677, %679 : vector<8x128xf32>
    %681 = vector.extract_strided_slice %680 {offsets = [0, 0], sizes = [8, 96], strides = [1, 1]} : vector<8x128xf32> to vector<8x96xf32>
    %682 = arith.negf %681 : vector<8x96xf32>
    %683 = math.exp %682 : vector<8x96xf32>
    %cst_209 = arith.constant 1.000000e+00 : f32
    %684 = vector.broadcast %cst_209 : f32 to vector<8x96xf32>
    %685 = arith.addf %684, %683 : vector<8x96xf32>
    %686 = arith.divf %684, %685 : vector<8x96xf32>
    %687 = vector.extract_strided_slice %680 {offsets = [0, 96], sizes = [8, 32], strides = [1, 1]} : vector<8x128xf32> to vector<8x32xf32>
    %688 = math.tanh %687 : vector<8x32xf32>
    %689 = vector.extract_strided_slice %686 {offsets = [0, 0], sizes = [8, 32], strides = [1, 1]} : vector<8x96xf32> to vector<8x32xf32>
    %690 = vector.extract_strided_slice %686 {offsets = [0, 32], sizes = [8, 32], strides = [1, 1]} : vector<8x96xf32> to vector<8x32xf32>
    %691 = vector.extract_strided_slice %686 {offsets = [0, 64], sizes = [8, 32], strides = [1, 1]} : vector<8x96xf32> to vector<8x32xf32>
    %692 = arith.mulf %690, %673 : vector<8x32xf32>
    %693 = arith.mulf %689, %688 : vector<8x32xf32>
    %694 = arith.addf %692, %693 : vector<8x32xf32>
    %695 = math.tanh %694 : vector<8x32xf32>
    %696 = arith.mulf %691, %695 : vector<8x32xf32>
    %c11_210 = arith.constant 11 : index
    %c0_211 = arith.constant 0 : index
    %c0_212 = arith.constant 0 : index
    %697 = vector.load %arg15[%c11_210, %c0_211, %c0_212] : memref<16x8x128xf32, #tpu.memory_space<vmem>>, vector<1x8x128xf32>
    %698 = vector.shape_cast %697 : vector<1x8x128xf32> to vector<8x128xf32>
    %699 = arith.truncf %696 : vector<8x32xf32> to vector<8x32xbf16>
    %cst_213 = arith.constant dense<0.000000e+00> : vector<8x128xf32>
    %700 = tpu.matmul %699, %463, %cst_213 {dimension_numbers = #tpu.dot_dimension_numbers<[1], [0], [0], [1], [0, 0, 1, 1], [], []>} : vector<8x32xbf16>, vector<32x128xbf16>, vector<8x128xf32> -> vector<8x128xf32>
    %701 = arith.addf %698, %700 : vector<8x128xf32>
    %702 = vector.extract_strided_slice %701 {offsets = [0, 0], sizes = [8, 96], strides = [1, 1]} : vector<8x128xf32> to vector<8x96xf32>
    %703 = arith.negf %702 : vector<8x96xf32>
    %704 = math.exp %703 : vector<8x96xf32>
    %cst_214 = arith.constant 1.000000e+00 : f32
    %705 = vector.broadcast %cst_214 : f32 to vector<8x96xf32>
    %706 = arith.addf %705, %704 : vector<8x96xf32>
    %707 = arith.divf %705, %706 : vector<8x96xf32>
    %708 = vector.extract_strided_slice %701 {offsets = [0, 96], sizes = [8, 32], strides = [1, 1]} : vector<8x128xf32> to vector<8x32xf32>
    %709 = math.tanh %708 : vector<8x32xf32>
    %710 = vector.extract_strided_slice %707 {offsets = [0, 0], sizes = [8, 32], strides = [1, 1]} : vector<8x96xf32> to vector<8x32xf32>
    %711 = vector.extract_strided_slice %707 {offsets = [0, 32], sizes = [8, 32], strides = [1, 1]} : vector<8x96xf32> to vector<8x32xf32>
    %712 = vector.extract_strided_slice %707 {offsets = [0, 64], sizes = [8, 32], strides = [1, 1]} : vector<8x96xf32> to vector<8x32xf32>
    %713 = arith.mulf %711, %694 : vector<8x32xf32>
    %714 = arith.mulf %710, %709 : vector<8x32xf32>
    %715 = arith.addf %713, %714 : vector<8x32xf32>
    %716 = math.tanh %715 : vector<8x32xf32>
    %717 = arith.mulf %712, %716 : vector<8x32xf32>
    %c12_215 = arith.constant 12 : index
    %c0_216 = arith.constant 0 : index
    %c0_217 = arith.constant 0 : index
    %718 = vector.load %arg15[%c12_215, %c0_216, %c0_217] : memref<16x8x128xf32, #tpu.memory_space<vmem>>, vector<1x8x128xf32>
    %719 = vector.shape_cast %718 : vector<1x8x128xf32> to vector<8x128xf32>
    %720 = arith.truncf %717 : vector<8x32xf32> to vector<8x32xbf16>
    %cst_218 = arith.constant dense<0.000000e+00> : vector<8x128xf32>
    %721 = tpu.matmul %720, %463, %cst_218 {dimension_numbers = #tpu.dot_dimension_numbers<[1], [0], [0], [1], [0, 0, 1, 1], [], []>} : vector<8x32xbf16>, vector<32x128xbf16>, vector<8x128xf32> -> vector<8x128xf32>
    %722 = arith.addf %719, %721 : vector<8x128xf32>
    %723 = vector.extract_strided_slice %722 {offsets = [0, 0], sizes = [8, 96], strides = [1, 1]} : vector<8x128xf32> to vector<8x96xf32>
    %724 = arith.negf %723 : vector<8x96xf32>
    %725 = math.exp %724 : vector<8x96xf32>
    %cst_219 = arith.constant 1.000000e+00 : f32
    %726 = vector.broadcast %cst_219 : f32 to vector<8x96xf32>
    %727 = arith.addf %726, %725 : vector<8x96xf32>
    %728 = arith.divf %726, %727 : vector<8x96xf32>
    %729 = vector.extract_strided_slice %722 {offsets = [0, 96], sizes = [8, 32], strides = [1, 1]} : vector<8x128xf32> to vector<8x32xf32>
    %730 = math.tanh %729 : vector<8x32xf32>
    %731 = vector.extract_strided_slice %728 {offsets = [0, 0], sizes = [8, 32], strides = [1, 1]} : vector<8x96xf32> to vector<8x32xf32>
    %732 = vector.extract_strided_slice %728 {offsets = [0, 32], sizes = [8, 32], strides = [1, 1]} : vector<8x96xf32> to vector<8x32xf32>
    %733 = vector.extract_strided_slice %728 {offsets = [0, 64], sizes = [8, 32], strides = [1, 1]} : vector<8x96xf32> to vector<8x32xf32>
    %734 = arith.mulf %732, %715 : vector<8x32xf32>
    %735 = arith.mulf %731, %730 : vector<8x32xf32>
    %736 = arith.addf %734, %735 : vector<8x32xf32>
    %737 = math.tanh %736 : vector<8x32xf32>
    %738 = arith.mulf %733, %737 : vector<8x32xf32>
    %c13_220 = arith.constant 13 : index
    %c0_221 = arith.constant 0 : index
    %c0_222 = arith.constant 0 : index
    %739 = vector.load %arg15[%c13_220, %c0_221, %c0_222] : memref<16x8x128xf32, #tpu.memory_space<vmem>>, vector<1x8x128xf32>
    %740 = vector.shape_cast %739 : vector<1x8x128xf32> to vector<8x128xf32>
    %741 = arith.truncf %738 : vector<8x32xf32> to vector<8x32xbf16>
    %cst_223 = arith.constant dense<0.000000e+00> : vector<8x128xf32>
    %742 = tpu.matmul %741, %463, %cst_223 {dimension_numbers = #tpu.dot_dimension_numbers<[1], [0], [0], [1], [0, 0, 1, 1], [], []>} : vector<8x32xbf16>, vector<32x128xbf16>, vector<8x128xf32> -> vector<8x128xf32>
    %743 = arith.addf %740, %742 : vector<8x128xf32>
    %744 = vector.extract_strided_slice %743 {offsets = [0, 0], sizes = [8, 96], strides = [1, 1]} : vector<8x128xf32> to vector<8x96xf32>
    %745 = arith.negf %744 : vector<8x96xf32>
    %746 = math.exp %745 : vector<8x96xf32>
    %cst_224 = arith.constant 1.000000e+00 : f32
    %747 = vector.broadcast %cst_224 : f32 to vector<8x96xf32>
    %748 = arith.addf %747, %746 : vector<8x96xf32>
    %749 = arith.divf %747, %748 : vector<8x96xf32>
    %750 = vector.extract_strided_slice %743 {offsets = [0, 96], sizes = [8, 32], strides = [1, 1]} : vector<8x128xf32> to vector<8x32xf32>
    %751 = math.tanh %750 : vector<8x32xf32>
    %752 = vector.extract_strided_slice %749 {offsets = [0, 0], sizes = [8, 32], strides = [1, 1]} : vector<8x96xf32> to vector<8x32xf32>
    %753 = vector.extract_strided_slice %749 {offsets = [0, 32], sizes = [8, 32], strides = [1, 1]} : vector<8x96xf32> to vector<8x32xf32>
    %754 = vector.extract_strided_slice %749 {offsets = [0, 64], sizes = [8, 32], strides = [1, 1]} : vector<8x96xf32> to vector<8x32xf32>
    %755 = arith.mulf %753, %736 : vector<8x32xf32>
    %756 = arith.mulf %752, %751 : vector<8x32xf32>
    %757 = arith.addf %755, %756 : vector<8x32xf32>
    %758 = math.tanh %757 : vector<8x32xf32>
    %759 = arith.mulf %754, %758 : vector<8x32xf32>
    %c14_225 = arith.constant 14 : index
    %c0_226 = arith.constant 0 : index
    %c0_227 = arith.constant 0 : index
    %760 = vector.load %arg15[%c14_225, %c0_226, %c0_227] : memref<16x8x128xf32, #tpu.memory_space<vmem>>, vector<1x8x128xf32>
    %761 = vector.shape_cast %760 : vector<1x8x128xf32> to vector<8x128xf32>
    %762 = arith.truncf %759 : vector<8x32xf32> to vector<8x32xbf16>
    %cst_228 = arith.constant dense<0.000000e+00> : vector<8x128xf32>
    %763 = tpu.matmul %762, %463, %cst_228 {dimension_numbers = #tpu.dot_dimension_numbers<[1], [0], [0], [1], [0, 0, 1, 1], [], []>} : vector<8x32xbf16>, vector<32x128xbf16>, vector<8x128xf32> -> vector<8x128xf32>
    %764 = arith.addf %761, %763 : vector<8x128xf32>
    %765 = vector.extract_strided_slice %764 {offsets = [0, 0], sizes = [8, 96], strides = [1, 1]} : vector<8x128xf32> to vector<8x96xf32>
    %766 = arith.negf %765 : vector<8x96xf32>
    %767 = math.exp %766 : vector<8x96xf32>
    %cst_229 = arith.constant 1.000000e+00 : f32
    %768 = vector.broadcast %cst_229 : f32 to vector<8x96xf32>
    %769 = arith.addf %768, %767 : vector<8x96xf32>
    %770 = arith.divf %768, %769 : vector<8x96xf32>
    %771 = vector.extract_strided_slice %764 {offsets = [0, 96], sizes = [8, 32], strides = [1, 1]} : vector<8x128xf32> to vector<8x32xf32>
    %772 = math.tanh %771 : vector<8x32xf32>
    %773 = vector.extract_strided_slice %770 {offsets = [0, 0], sizes = [8, 32], strides = [1, 1]} : vector<8x96xf32> to vector<8x32xf32>
    %774 = vector.extract_strided_slice %770 {offsets = [0, 32], sizes = [8, 32], strides = [1, 1]} : vector<8x96xf32> to vector<8x32xf32>
    %775 = vector.extract_strided_slice %770 {offsets = [0, 64], sizes = [8, 32], strides = [1, 1]} : vector<8x96xf32> to vector<8x32xf32>
    %776 = arith.mulf %774, %757 : vector<8x32xf32>
    %777 = arith.mulf %773, %772 : vector<8x32xf32>
    %778 = arith.addf %776, %777 : vector<8x32xf32>
    %779 = math.tanh %778 : vector<8x32xf32>
    %780 = arith.mulf %775, %779 : vector<8x32xf32>
    %c15_230 = arith.constant 15 : index
    %c0_231 = arith.constant 0 : index
    %c0_232 = arith.constant 0 : index
    %781 = vector.load %arg15[%c15_230, %c0_231, %c0_232] : memref<16x8x128xf32, #tpu.memory_space<vmem>>, vector<1x8x128xf32>
    %782 = vector.shape_cast %781 : vector<1x8x128xf32> to vector<8x128xf32>
    %783 = arith.truncf %780 : vector<8x32xf32> to vector<8x32xbf16>
    %cst_233 = arith.constant dense<0.000000e+00> : vector<8x128xf32>
    %784 = tpu.matmul %783, %463, %cst_233 {dimension_numbers = #tpu.dot_dimension_numbers<[1], [0], [0], [1], [0, 0, 1, 1], [], []>} : vector<8x32xbf16>, vector<32x128xbf16>, vector<8x128xf32> -> vector<8x128xf32>
    %785 = arith.addf %782, %784 : vector<8x128xf32>
    %786 = vector.extract_strided_slice %785 {offsets = [0, 0], sizes = [8, 96], strides = [1, 1]} : vector<8x128xf32> to vector<8x96xf32>
    %787 = arith.negf %786 : vector<8x96xf32>
    %788 = math.exp %787 : vector<8x96xf32>
    %cst_234 = arith.constant 1.000000e+00 : f32
    %789 = vector.broadcast %cst_234 : f32 to vector<8x96xf32>
    %790 = arith.addf %789, %788 : vector<8x96xf32>
    %791 = arith.divf %789, %790 : vector<8x96xf32>
    %792 = vector.extract_strided_slice %785 {offsets = [0, 96], sizes = [8, 32], strides = [1, 1]} : vector<8x128xf32> to vector<8x32xf32>
    %793 = math.tanh %792 : vector<8x32xf32>
    %794 = vector.extract_strided_slice %791 {offsets = [0, 0], sizes = [8, 32], strides = [1, 1]} : vector<8x96xf32> to vector<8x32xf32>
    %795 = vector.extract_strided_slice %791 {offsets = [0, 32], sizes = [8, 32], strides = [1, 1]} : vector<8x96xf32> to vector<8x32xf32>
    %796 = vector.extract_strided_slice %791 {offsets = [0, 64], sizes = [8, 32], strides = [1, 1]} : vector<8x96xf32> to vector<8x32xf32>
    %797 = arith.mulf %795, %778 : vector<8x32xf32>
    %798 = arith.mulf %794, %793 : vector<8x32xf32>
    %799 = arith.addf %797, %798 : vector<8x32xf32>
    %800 = math.tanh %799 : vector<8x32xf32>
    %801 = arith.mulf %796, %800 : vector<8x32xf32>
    %c0_235 = arith.constant 0 : index
    %c0_236 = arith.constant 0 : index
    %802 = vector.load %arg12[%c0_235, %c0_236] : memref<32x128xf32, #tpu.memory_space<vmem>>, vector<32x128xf32>
    %cst_237 = arith.constant dense<0.000000e+00> : vector<8x128xf32>
    %803 = tpu.matmul %801, %802, %cst_237 {dimension_numbers = #tpu.dot_dimension_numbers<[1], [0], [0], [1], [0, 0, 1, 1], [], []>} : vector<8x32xf32>, vector<32x128xf32>, vector<8x128xf32> -> vector<8x128xf32>
    %c0_238 = arith.constant 0 : index
    %c0_239 = arith.constant 0 : index
    %804 = vector.load %arg13[%c0_238, %c0_239] : memref<1x128xf32, #tpu.memory_space<vmem>>, vector<1x128xf32>
    %805 = vector.broadcast %804 : vector<1x128xf32> to vector<8x128xf32>
    %806 = arith.addf %803, %805 : vector<8x128xf32>
    %c0_240 = arith.constant 0 : index
    %c0_241 = arith.constant 0 : index
    %807 = vector.load %arg14[%c0_240, %c0_241] : memref<8x128xf32, #tpu.memory_space<vmem>>, vector<8x128xf32>
    tpu.vector_store %arg14[%c0_240, %c0_241], %806 {strides = array<i32>} : memref<8x128xf32, #tpu.memory_space<vmem>>, vector<8x128xf32>,
    return
  }
  func.func @transform_0(%arg0: i32) -> (i32, i32, i32) {
    %c0_i32 = arith.constant 0 : i32
    %c0_i32_0 = arith.constant 0 : i32
    %c0_i32_1 = arith.constant 0 : i32
    return %c0_i32, %arg0, %c0_i32_0 : i32, i32, i32
  }
  func.func @transform_1(%arg0: i32) -> (i32, i32) {
    %c0_i32 = arith.constant 0 : i32
    %c0_i32_0 = arith.constant 0 : i32
    %c0_i32_1 = arith.constant 0 : i32
    return %c0_i32, %c0_i32_0 : i32, i32
  }
  func.func @transform_2(%arg0: i32) -> (i32, i32) {
    %c0_i32 = arith.constant 0 : i32
    %c0_i32_0 = arith.constant 0 : i32
    %c0_i32_1 = arith.constant 0 : i32
    return %c0_i32, %c0_i32_0 : i32, i32
  }
  func.func @transform_3(%arg0: i32) -> (i32, i32) {
    %c0_i32 = arith.constant 0 : i32
    %c0_i32_0 = arith.constant 0 : i32
    %c0_i32_1 = arith.constant 0 : i32
    return %c0_i32, %c0_i32_0 : i32, i32
  }
  func.func @transform_4(%arg0: i32) -> (i32, i32) {
    %c0_i32 = arith.constant 0 : i32
    %c0_i32_0 = arith.constant 0 : i32
    %c0_i32_1 = arith.constant 0 : i32
    return %c0_i32, %c0_i32_0 : i32, i32
  }
  func.func @transform_5(%arg0: i32) -> (i32, i32) {
    %c0_i32 = arith.constant 0 : i32
    %c0_i32_0 = arith.constant 0 : i32
    %c0_i32_1 = arith.constant 0 : i32
    return %c0_i32, %c0_i32_0 : i32, i32
  }
  func.func @transform_6(%arg0: i32) -> (i32, i32) {
    %c0_i32 = arith.constant 0 : i32
    %c0_i32_0 = arith.constant 0 : i32
    %c0_i32_1 = arith.constant 0 : i32
    return %c0_i32, %c0_i32_0 : i32, i32
  }
  func.func @transform_7(%arg0: i32) -> (i32, i32) {
    %c0_i32 = arith.constant 0 : i32
    %c0_i32_0 = arith.constant 0 : i32
    %c0_i32_1 = arith.constant 0 : i32
    return %c0_i32, %c0_i32_0 : i32, i32
  }
  func.func @transform_8(%arg0: i32) -> (i32, i32) {
    %c0_i32 = arith.constant 0 : i32
    %c0_i32_0 = arith.constant 0 : i32
    %c0_i32_1 = arith.constant 0 : i32
    return %c0_i32, %c0_i32_0 : i32, i32
  }
  func.func @transform_9(%arg0: i32) -> (i32, i32) {
    %c0_i32 = arith.constant 0 : i32
    %c0_i32_0 = arith.constant 0 : i32
    %c0_i32_1 = arith.constant 0 : i32
    return %c0_i32, %c0_i32_0 : i32, i32
  }
  func.func @transform_10(%arg0: i32) -> (i32, i32) {
    %c0_i32 = arith.constant 0 : i32
    %c0_i32_0 = arith.constant 0 : i32
    %c0_i32_1 = arith.constant 0 : i32
    return %c0_i32, %c0_i32_0 : i32, i32
  }
  func.func @transform_11(%arg0: i32) -> (i32, i32) {
    %c0_i32 = arith.constant 0 : i32
    %c0_i32_0 = arith.constant 0 : i32
    %c0_i32_1 = arith.constant 0 : i32
    return %c0_i32, %c0_i32_0 : i32, i32
  }
  func.func @transform_12(%arg0: i32) -> (i32, i32) {
    %c0_i32 = arith.constant 0 : i32
    %c0_i32_0 = arith.constant 0 : i32
    %c0_i32_1 = arith.constant 0 : i32
    return %c0_i32, %c0_i32_0 : i32, i32
  }
  func.func @transform_13(%arg0: i32) -> (i32, i32) {
    %c0_i32 = arith.constant 0 : i32
    %c0_i32_0 = arith.constant 0 : i32
    return %arg0, %c0_i32 : i32, i32
  }
}

</mosaic_0001>

<bundles_post_ra>
// kernel: cnn_lstm_forward.1
= control target key start
LH: loop header
LB: loop body
LE: loop exit
PB: predicated region body
PF: predicated region fallthrough
CT: control target
= control target key end

     0   :  { %vm127_vm0 = vcmask 1043456   ;;  %vm102_vm1 = vcmask 64512   ;;  %v4847_v1 = vmov 0.0   ;;  %s4848_s27 = smov 32   ;;  %s4849_s26 = smov 96   ;;  %v4850_v29 = vmov 0   ;;  %s5903_s1 = inlined_call_operand.vmem [shape: bf16[8,96], index: 1, kind: input, shape index: {}]   ;;  %s5904_s0 = inlined_call_operand.vmem [shape: bf16[16,8,8], index: 0, kind: input, shape index: {}]   ;;  %s5905_s2 = inlined_call_operand.vmem [shape: f32[1,32], index: 2, kind: input, shape index: {}]   ;;  %s5906_s3 = inlined_call_operand.vmem [shape: bf16[32,192], index: 3, kind: input, shape index: {}]   ;;  %s5907_s4 = inlined_call_operand.vmem [shape: f32[1,64], index: 4, kind: input, shape index: {}]   ;;  %s5908_s5 = inlined_call_operand.vmem [shape: bf16[64,128], index: 5, kind: input, shape index: {}]   ;;  %s5909_s6 = inlined_call_operand.vmem [shape: bf16[32,128], index: 6, kind: input, shape index: {}]   ;;  %s5910_s7 = inlined_call_operand.vmem [shape: f32[1,128], index: 7, kind: input, shape index: {}]   ;;  %s5911_s8 = inlined_call_operand.vmem [shape: bf16[32,128], index: 8, kind: input, shape index: {}]   ;;  %s5912_s9 = inlined_call_operand.vmem [shape: bf16[32,128], index: 9, kind: input, shape index: {}]   ;;  %s5913_s10 = inlined_call_operand.vmem [shape: f32[1,128], index: 10, kind: input, shape index: {}]   ;;  %s5914_s11 = inlined_call_operand.vmem [shape: f32[32,128], index: 11, kind: input, shape index: {}]   ;;  %s5915_s12 = inlined_call_operand.vmem [shape: f32[1,128], index: 12, kind: input, shape index: {}]   ;;  %s5916_s13 = inlined_call_operand.vmem [shape: f32[8,128], index: 13, kind: output, shape index: {}]  }
   0x1   :  { %v61_v0 = vld [vmem:[%s5903_s1] sm:$0xf]  ;;  %244 = vrot.lane.b32.xlu0 %v4847_v1, %s4848_s27  ;;  %v4555_v4 = vld [vmem:[%s5904_s0 + $0x8] sm:$0xff]   ;;  %v4556_v5 = vld [vmem:[%s5904_s0 + $0x10] sm:$0xff]   ;;  %567 = vmatprep.mubr.bf16.mxu1 %v4850_v29  ;;  %vm510_vm2 = vcmask 261120   ;;  %vm4852_vm3 = vmmov 0  }
   0x2   :  { %4546 = vmatprep.subr.msk.bf16.mxu0 %vm127_vm0, %v61_v0  ;;  %v129_v2 = vsel %vm127_vm0, %v61_v0, 0  ;;  %v4554_v3 = vld [vmem:[%s5904_s0] sm:$0xff]   ;;  %v4557_v6 = vld [vmem:[%s5904_s0 + $0x18] sm:$0xff]   ;;  %v4559_v8 = vld [vmem:[%s5904_s0 + $0x28] sm:$0xff]   ;;  %vm954_vm4 = vcmask 523264   ;;  %vm1184_vm5 = vcmask 257024  }
   0x3   :  { %4212 = vmatpush3.bf16.msra.mxu0 %v129_v2  ;;  %4213 = vmatprep.mubr.msk.bf16.mxu0 %vm102_vm1, %v4554_v3  ;;  %v4558_v7 = vld [vmem:[%s5904_s0 + $0x20] sm:$0xff]   ;;  %v4560_v9 = vld [vmem:[%s5904_s0 + $0x30] sm:$0xff]   ;;  %v4561_v10 = vld [vmem:[%s5904_s0 + $0x38] sm:$0xff]  }
   0x4   :  { %v3901_v15 = vld [vmem:[%s5905_s2] ss:$0 sm:$0xff]  ;;  %v4562_v28 = vld [vmem:[%s5906_s3 + $0x4] ss:$8 sps:$4 sm:$0xff]   ;;  %v4565_v31 = vld [vmem:[%s5906_s3 + $0x14] ss:$8 sps:$4 sm:$0xff]  }
   0x5   :  { %v4564_v30 = vld [vmem:[%s5906_s3] ss:$8 sps:$4 sm:$0xff]   ;;  %535 = vmatprep.subr.bf16.mxu1 %v4562_v28  ;;  %v4567_v32 = vld [vmem:[%s5906_s3 + $0x10] ss:$8 sps:$4 sm:$0xff]   ;;  %s4851_s3 = smov 64  }
   0x6   :  { %4214 = vmatmul.mubr.msk.bf16.vlgmr.msra.gmra.mrb[0].mxu0 %vm102_vm1, %v4555_v4  ;;  %536 = vmatpush1.bf16.msra.mxu1 %v4564_v30 }
   0x7   :  { %4217 = vmatprep.mubr.msk.bf16.mxu0 %vm102_vm1, %v4556_v5  ;;  %537 = vmatprep.subr.bf16.mxu1 %v4565_v31 }
   0xa   :  { %538 = vmatpush1.bf16.msra.mxu1 %v4567_v32 }
   0xb   :  { %4261 = vmatprep.subr.bf16.mxu1 %v4847_v1 }
   0xe   :  { %4218 = vmatmul.mubr.msk.bf16.gmra.mrb[4].mxu0 %vm102_vm1, %v4557_v6 }
   0xf   :  { %4221 = vmatprep.mubr.msk.bf16.mxu0 %vm102_vm1, %v4558_v7 }
  0x16   :  { %4222 = vmatmul.mubr.msk.bf16.gmra.mrb[8].mxu0 %vm102_vm1, %v4559_v8 }
  0x17   :  { %4225 = vmatprep.mubr.msk.bf16.mxu0 %vm102_vm1, %v4560_v9 }
  0x1e   :  { %4226 = vmatmul.mubr.msk.bf16.gmra.mrb[12].mxu0 %vm102_vm1, %v4561_v10 }
  0x73   :  { %v245_v33 = vpop.permute.xlu0 %244 }
  0xd9   :  { %v4961_v11 = vpop.f32.mrb[0].mxu0 }
  0xda   :  { %311 = vrot.lane.b32.xlu1 %v4961_v11, %s4849_s26  ;;  %v4965_v12 = vpop.f32.mrb[1].mxu0 }
  0xdb   :  { %246 = vrot.lane.b32.xlu0 %v4965_v12, %s4848_s27  ;;  %v4969_v13 = vpop.f32.mrb[2].mxu0  ;;  %v292_v37 = vadd.f32 %v245_v33, %v4965_v12 }
  0xdc   :  { %v168_v14 = vpop.f32.mrb[3].mxu0 }
  0xde   :  { %309 = vrot.lane.b32.xlu1 %v168_v14, %s4849_s26 }
  0xdf   :  { %379 = vrot.lane.b32.xlu0 %v3901_v15, %s4848_s27 }
  0xe1   :  { %v4976_v16 = vpop.f32.mrb[4].mxu0 }
  0xe2   :  { %248 = vrot.lane.b32.xlu1 %v168_v14, %s4848_s27  ;;  %v4979_v17 = vpop.f32.mrb[5].mxu0 }
  0xe3   :  { %250 = vrot.lane.b32.xlu0 %v4961_v11, %s4848_s27  ;;  %v4983_v18 = vpop.f32.mrb[6].mxu0 }
  0xe4   :  { %v4985_v19 = vpop.f32.mrb[7].mxu0 }
  0xe6   :  { %313 = vrot.lane.b32.xlu1 %v4969_v13, %s4849_s26 }
  0xe7   :  { %315 = vrot.lane.b32.xlu0 %v4979_v17, %s4849_s26 }
  0xe9   :  { %v4991_v20 = vpop.f32.mrb[8].mxu0 }
  0xea   :  { %252 = vrot.lane.b32.xlu1 %v4969_v13, %s4848_s27  ;;  %v4995_v21 = vpop.f32.mrb[9].mxu0 }
  0xeb   :  { %254 = vrot.lane.b32.xlu0 %v4979_v17, %s4848_s27  ;;  %v4999_v22 = vpop.f32.mrb[10].mxu0 }
  0xec   :  { %v5001_v23 = vpop.f32.mrb[11].mxu0 }
  0xee   :  { %317 = vrot.lane.b32.xlu1 %v4985_v19, %s4849_s26 }
  0xef   :  { %319 = vrot.lane.b32.xlu0 %v4976_v16, %s4849_s26 }
  0xf1   :  { %v5007_v24 = vpop.f32.mrb[12].mxu0 }
  0xf2   :  { %256 = vrot.lane.b32.xlu1 %v4985_v19, %s4848_s27  ;;  %v5011_v25 = vpop.f32.mrb[13].mxu0 }
  0xf3   :  { %258 = vrot.lane.b32.xlu0 %v4976_v16, %s4848_s27  ;;  %v5015_v26 = vpop.f32.mrb[14].mxu0 }
  0xf4   :  { %v5017_v27 = vpop.f32.mrb[15].mxu0 }
  0xf6   :  { %321 = vrot.lane.b32.xlu1 %v4983_v18, %s4849_s26 }
  0xf7   :  { %323 = vrot.lane.b32.xlu0 %v4995_v21, %s4849_s26 }
  0xfa   :  { %260 = vrot.lane.b32.xlu1 %v4983_v18, %s4848_s27 }
  0xfb   :  { %262 = vrot.lane.b32.xlu0 %v4995_v21, %s4848_s27 }
  0xfe   :  { %325 = vrot.lane.b32.xlu1 %v5001_v23, %s4849_s26 }
  0xff   :  { %327 = vrot.lane.b32.xlu0 %v4991_v20, %s4849_s26 }
 0x102   :  { %264 = vrot.lane.b32.xlu1 %v5001_v23, %s4848_s27 }
 0x103   :  { %266 = vrot.lane.b32.xlu0 %v4991_v20, %s4848_s27 }
 0x106   :  { %329 = vrot.lane.b32.xlu1 %v4999_v22, %s4849_s26 }
 0x107   :  { %331 = vrot.lane.b32.xlu0 %v5011_v25, %s4849_s26 }
 0x10a   :  { %268 = vrot.lane.b32.xlu1 %v4999_v22, %s4848_s27 }
 0x10b   :  { %270 = vrot.lane.b32.xlu0 %v5011_v25, %s4848_s27 }
 0x10e   :  { %333 = vrot.lane.b32.xlu1 %v5017_v27, %s4849_s26 }
 0x10f   :  { %335 = vrot.lane.b32.xlu0 %v5007_v24, %s4849_s26 }
 0x112   :  { %272 = vrot.lane.b32.xlu1 %v5017_v27, %s4848_s27 }
 0x113   :  { %274 = vrot.lane.b32.xlu0 %v5007_v24, %s4848_s27 }
 0x116   :  { %337 = vrot.lane.b32.xlu1 %v5015_v26, %s4849_s26 }
 0x117   :  { %339 = vrot.lane.b32.xlu0 %v4847_v1, %s4849_s26 }
 0x14c   :  { %v312_v34 = vpop.permute.xlu1 %311 }
 0x14d   :  { %v247_v35 = vpop.permute.xlu0 %246 }
 0x14e   :  { %v293_v36 = vadd.f32 %v247_v35, %v168_v14 }
 0x150   :  { %v358_v38 = vadd.f32 %v312_v34, %v293_v36  ;;  %v310_v39 = vpop.permute.xlu1 %309 }
 0x151   :  { %v357_v40 = vadd.f32 %v310_v39, %v292_v37  ;;  %v5070_v41 = vpop.permute.xlu0 %379 }
 0x152   :  { %v383_v42 = vadd.f32 %v5070_v41, %v358_v38 }
 0x153   :  { %v382_v43 = vadd.f32 %v5070_v41, %v357_v40 }
 0x154   :  { %v249_v44 = vpop.permute.xlu1 %248  ;;  %v399_v45 = vmax.f32 %v383_v42, 0.0 }
 0x155   :  { %v251_v46 = vpop.permute.xlu0 %250  ;;  %v398_v47 = vmax.f32 %v382_v43, 0.0  ;;  %v294_v48 = vadd.f32 %v4961_v11, %v249_v44 }
 0x156   :  { %v295_v50 = vadd.f32 %v4969_v13, %v251_v46 }
 0x157   :  { %v4047_v49 = vpack.c.bf16 %v399_v45, %v398_v47 }
 0x158   :  { %v314_v51 = vpop.permute.xlu1 %313 }
 0x159   :  { %v359_v52 = vadd.f32 %v314_v51, %v294_v48  ;;  %v316_v53 = vpop.permute.xlu0 %315  ;;  %474 = vrot.lane.b32.xlu1 %v4047_v49, %s4849_s26 }
 0x15a   :  { %v360_v54 = vadd.f32 %v316_v53, %v295_v50 }
 0x15b   :  { %v384_v55 = vadd.f32 %v5070_v41, %v359_v52 }
 0x15c   :  { %v385_v56 = vadd.f32 %v5070_v41, %v360_v54  ;;  %v253_v57 = vpop.permute.xlu1 %252 }
 0x15d   :  { %v400_v58 = vmax.f32 %v384_v55, 0.0  ;;  %v255_v59 = vpop.permute.xlu0 %254  ;;  %v296_v61 = vadd.f32 %v253_v57, %v4979_v17 }
 0x15e   :  { %v401_v60 = vmax.f32 %v385_v56, 0.0  ;;  %v297_v62 = vadd.f32 %v255_v59, %v4985_v19 }
 0x160   :  { %v318_v63 = vpop.permute.xlu1 %317  ;;  %v4048_v0 = vpack.c.bf16 %v401_v60, %v400_v58 }
 0x161   :  { %v361_v2 = vadd.f32 %v318_v63, %v296_v61  ;;  %v320_v3 = vpop.permute.xlu0 %319 }
 0x162   :  { %v362_v4 = vadd.f32 %v320_v3, %v297_v62  ;;  %476 = vrot.lane.b32.xlu0 %v4048_v0, %s4849_s26 }
 0x163   :  { %v386_v5 = vadd.f32 %v5070_v41, %v361_v2 }
 0x164   :  { %v387_v6 = vadd.f32 %v5070_v41, %v362_v4  ;;  %v257_v7 = vpop.permute.xlu1 %256 }
 0x165   :  { %v402_v8 = vmax.f32 %v386_v5, 0.0  ;;  %v259_v9 = vpop.permute.xlu0 %258  ;;  %v298_v11 = vadd.f32 %v4976_v16, %v257_v7 }
 0x166   :  { %v403_v10 = vmax.f32 %v387_v6, 0.0  ;;  %v299_v12 = vadd.f32 %v4983_v18, %v259_v9 }
 0x168   :  { %v322_v13 = vpop.permute.xlu1 %321  ;;  %v4049_v14 = vpack.c.bf16 %v403_v10, %v402_v8 }
 0x169   :  { %v363_v15 = vadd.f32 %v322_v13, %v298_v11  ;;  %v324_v17 = vpop.permute.xlu0 %323 }
 0x16a   :  { %v364_v19 = vadd.f32 %v324_v17, %v299_v12  ;;  %478 = vrot.lane.b32.xlu1 %v4049_v14, %s4849_s26 }
 0x16b   :  { %v388_v28 = vadd.f32 %v5070_v41, %v363_v15 }
 0x16c   :  { %v389_v30 = vadd.f32 %v5070_v41, %v364_v19  ;;  %v261_v31 = vpop.permute.xlu1 %260 }
 0x16d   :  { %v404_v32 = vmax.f32 %v388_v28, 0.0  ;;  %v263_v33 = vpop.permute.xlu0 %262  ;;  %v300_v35 = vadd.f32 %v261_v31, %v4995_v21 }
 0x16e   :  { %v405_v34 = vmax.f32 %v389_v30, 0.0  ;;  %v301_v16 = vadd.f32 %v263_v33, %v5001_v23 }
 0x170   :  { %v326_v18 = vpop.permute.xlu1 %325  ;;  %v4050_v36 = vpack.c.bf16 %v405_v34, %v404_v32 }
 0x171   :  { %v365_v37 = vadd.f32 %v326_v18, %v300_v35  ;;  %v328_v38 = vpop.permute.xlu0 %327 }
 0x172   :  { %v366_v39 = vadd.f32 %v328_v38, %v301_v16  ;;  %480 = vrot.lane.b32.xlu0 %v4050_v36, %s4849_s26 }
 0x173   :  { %v390_v40 = vadd.f32 %v5070_v41, %v365_v37 }
 0x174   :  { %v391_v42 = vadd.f32 %v5070_v41, %v366_v39  ;;  %v265_v43 = vpop.permute.xlu1 %264 }
 0x175   :  { %v406_v44 = vmax.f32 %v390_v40, 0.0  ;;  %v267_v45 = vpop.permute.xlu0 %266  ;;  %v302_v47 = vadd.f32 %v4991_v20, %v265_v43 }
 0x176   :  { %v407_v46 = vmax.f32 %v391_v42, 0.0  ;;  %v303_v21 = vadd.f32 %v4999_v22, %v267_v45 }
 0x178   :  { %v330_v23 = vpop.permute.xlu1 %329  ;;  %v4051_v48 = vpack.c.bf16 %v407_v46, %v406_v44 }
 0x179   :  { %v367_v49 = vadd.f32 %v330_v23, %v302_v47  ;;  %v332_v50 = vpop.permute.xlu0 %331 }
 0x17a   :  { %v368_v51 = vadd.f32 %v332_v50, %v303_v21  ;;  %482 = vrot.lane.b32.xlu1 %v4051_v48, %s4849_s26 }
 0x17b   :  { %v392_v52 = vadd.f32 %v5070_v41, %v367_v49 }
 0x17c   :  { %v393_v53 = vadd.f32 %v5070_v41, %v368_v51  ;;  %v269_v54 = vpop.permute.xlu1 %268 }
 0x17d   :  { %v408_v55 = vmax.f32 %v392_v52, 0.0  ;;  %v271_v56 = vpop.permute.xlu0 %270  ;;  %v304_v58 = vadd.f32 %v269_v54, %v5011_v25 }
 0x17e   :  { %v409_v57 = vmax.f32 %v393_v53, 0.0  ;;  %v305_v20 = vadd.f32 %v271_v56, %v5017_v27 }
 0x180   :  { %v334_v22 = vpop.permute.xlu1 %333  ;;  %v4052_v59 = vpack.c.bf16 %v409_v57, %v408_v55 }
 0x181   :  { %v369_v60 = vadd.f32 %v334_v22, %v304_v58  ;;  %v336_v61 = vpop.permute.xlu0 %335 }
 0x182   :  { %v370_v62 = vadd.f32 %v336_v61, %v305_v20  ;;  %484 = vrot.lane.b32.xlu0 %v4052_v59, %s4849_s26  ;;  %v4569_v61 = vld [vmem:[%s5908_s5 + $0x8] sm:$0xff]  }
 0x183   :  { %v394_v63 = vadd.f32 %v5070_v41, %v369_v60  ;;  %v4568_v60 = vld [vmem:[%s5908_s5] sm:$0xff]  }
 0x184   :  { %v395_v0 = vadd.f32 %v5070_v41, %v370_v62  ;;  %v273_v2 = vpop.permute.xlu1 %272  ;;  %4229 = vmatprep.subr.bf16.mxu0 %v4568_v60 }
 0x185   :  { %v410_v3 = vmax.f32 %v394_v63, 0.0  ;;  %v275_v4 = vpop.permute.xlu0 %274  ;;  %v306_v6 = vadd.f32 %v5007_v24, %v273_v2  ;;  %v3922_v24 = vld [vmem:[%s5907_s4] ss:$0 sm:$0xff]  ;;  %4230 = vmatpush3.bf16.msra.mxu0 %v4568_v60 }
 0x186   :  { %v411_v5 = vmax.f32 %v395_v0, 0.0  ;;  %v307_v25 = vadd.f32 %v5015_v26, %v275_v4  ;;  %4231 = vmatprep.subr.bf16.mxu0 %v4569_v61  ;;  %v4570_v4 = vld [vmem:[%s5908_s5 + $0x10] sm:$0xff]  }
 0x188   :  { %v338_v27 = vpop.permute.xlu1 %337  ;;  %v4053_v7 = vpack.c.bf16 %v411_v5, %v410_v3 }
 0x189   :  { %v371_v8 = vadd.f32 %v338_v27, %v306_v6  ;;  %v340_v9 = vpop.permute.xlu0 %339  ;;  %4232 = vmatpush3.bf16.msra.mxu0 %v4569_v61 }
 0x18a   :  { %v372_v10 = vadd.f32 %v340_v9, %v307_v25  ;;  %486 = vrot.lane.b32.xlu1 %v4053_v7, %s4849_s26  ;;  %4233 = vmatprep.subr.bf16.mxu0 %v4570_v4  ;;  %v4571_v25 = vld [vmem:[%s5908_s5 + $0x18] sm:$0xff]  }
 0x18b   :  { %v396_v11 = vadd.f32 %v5070_v41, %v371_v8 }
 0x18c   :  { %v397_v12 = vadd.f32 %v5070_v41, %v372_v10 }
 0x18d   :  { %v412_v13 = vmax.f32 %v396_v11, 0.0  ;;  %4234 = vmatpush3.bf16.msra.mxu0 %v4570_v4 }
 0x18e   :  { %v413_v14 = vmax.f32 %v397_v12, 0.0  ;;  %662 = vrot.lane.b32.xlu1 %v4847_v1, %s4851_s3  ;;  %4235 = vmatprep.subr.bf16.mxu0 %v4571_v25 }
 0x190   :  { %v4054_v26 = vpack.c.bf16 %v413_v14, %v412_v13 }
 0x191   :  { %4236 = vmatpush3.bf16.msra.mxu0 %v4571_v25 }
 0x192   :  { %488 = vrot.lane.b32.xlu0 %v4054_v26, %s4849_s26  ;;  %808 = vrot.lane.b32.xlu1 %v3922_v24, %s4851_s3 }
 0x193   :  { %4253 = vmatprep.subr.bf16.mxu0 %v4847_v1 }
 0x1cb   :  { %v475_v15 = vpop.permute.xlu1 %474 }
 0x1cc   :  { %3914 = vmatmul.mubr.msk.bf16.vlgmr.msra.gmra.mrb[0].mxu1 %vm510_vm2, %v475_v15 }
 0x1cd   :  { %576 = vmatprep.mubr.bf16.mxu1 %v4850_v29 }
 0x1d4   :  { %v477_v41 = vpop.permute.xlu0 %476 }
 0x1d5   :  { %3915 = vmatmul.mubr.msk.bf16.gmra.mrb[4].mxu1 %vm510_vm2, %v477_v41 }
 0x1d6   :  { %586 = vmatprep.mubr.bf16.mxu1 %v4850_v29 }
 0x1dc   :  { %v479_v17 = vpop.permute.xlu1 %478 }
 0x1dd   :  { %3916 = vmatmul.mubr.msk.bf16.gmra.mrb[8].mxu1 %vm510_vm2, %v479_v17 }
 0x1de   :  { %596 = vmatprep.mubr.bf16.mxu1 %v4850_v29 }
 0x1e4   :  { %v481_v19 = vpop.permute.xlu0 %480 }
 0x1e5   :  { %3917 = vmatmul.mubr.msk.bf16.gmra.mrb[12].mxu1 %vm510_vm2, %v481_v19 }
 0x1e6   :  { %606 = vmatprep.mubr.bf16.mxu1 %v4850_v29 }
 0x1ec   :  { %v483_v28 = vpop.permute.xlu1 %482 }
 0x1ed   :  { %3918 = vmatmul.mubr.msk.bf16.gmra.mrb[16].mxu1 %vm510_vm2, %v483_v28 }
 0x1ee   :  { %616 = vmatprep.mubr.bf16.mxu1 %v4850_v29 }
 0x1f4   :  { %v485_v30 = vpop.permute.xlu0 %484 }
 0x1f5   :  { %3919 = vmatmul.mubr.msk.bf16.gmra.mrb[20].mxu1 %vm510_vm2, %v485_v30 }
 0x1f6   :  { %626 = vmatprep.mubr.bf16.mxu1 %v4850_v29 }
 0x1fc   :  { %v487_v31 = vpop.permute.xlu1 %486 }
 0x1fd   :  { %3920 = vmatmul.mubr.msk.bf16.gmra.mrb[24].mxu1 %vm510_vm2, %v487_v31 }
 0x1fe   :  { %636 = vmatprep.mubr.bf16.mxu1 %v4850_v29 }
 0x200   :  { %v5214_v62 = vpop.permute.xlu1 %662 }
 0x204   :  { %v489_v32 = vpop.permute.xlu0 %488  ;;  %v5216_v63 = vpop.permute.xlu1 %808 }
 0x205   :  { %3921 = vmatmul.mubr.msk.bf16.gmra.mrb[28].mxu1 %vm510_vm2, %v489_v32 }
 0x206   :  { %4265 = vmatprep.mubr.msk.bf16.mxu1 %vm4852_vm3, %v4847_v1 }
 0x29f   :  { %v5131_v33 = vpop.f32.mrb[0].mxu1 }
 0x2a0   :  { %664 = vrot.lane.b32.xlu0 %v5131_v33, %s4851_s3  ;;  %v571_v34 = vpop.f32.mrb[1].mxu1  ;;  %v710_v5 = vadd.f32 %v5214_v62, %v5131_v33 }
 0x2a1   :  { %v5135_v35 = vpop.f32.mrb[2].mxu1 }
 0x2a2   :  { %v574_v16 = vpop.f32.mrb[3].mxu1  ;;  %666 = vrot.lane.b32.xlu1 %v5135_v35, %s4851_s3 }
 0x2a6   :  { %741 = vrot.lane.b32.xlu1 %v574_v16, %s4851_s3 }
 0x2a8   :  { %v5140_v18 = vpop.f32.mrb[4].mxu1 }
 0x2a9   :  { %668 = vrot.lane.b32.xlu0 %v5140_v18, %s4851_s3  ;;  %v580_v36 = vpop.f32.mrb[5].mxu1 }
 0x2aa   :  { %v5144_v37 = vpop.f32.mrb[6].mxu1 }
 0x2ab   :  { %v584_v38 = vpop.f32.mrb[7].mxu1 }
 0x2ac   :  { %745 = vrot.lane.b32.xlu1 %v584_v38, %s4851_s3 }
 0x2ad   :  { %743 = vrot.lane.b32.xlu0 %v580_v36, %s4851_s3 }
 0x2b0   :  { %v5148_v39 = vpop.f32.mrb[8].mxu1 }
 0x2b1   :  { %670 = vrot.lane.b32.xlu0 %v5144_v37, %s4851_s3  ;;  %v590_v40 = vpop.f32.mrb[9].mxu1  ;;  %672 = vrot.lane.b32.xlu1 %v5148_v39, %s4851_s3 }
 0x2b2   :  { %v5154_v42 = vpop.f32.mrb[10].mxu1 }
 0x2b3   :  { %v594_v43 = vpop.f32.mrb[11].mxu1 }
 0x2b5   :  { %747 = vrot.lane.b32.xlu0 %v590_v40, %s4851_s3 }
 0x2b8   :  { %v5157_v44 = vpop.f32.mrb[12].mxu1 }
 0x2b9   :  { %674 = vrot.lane.b32.xlu0 %v5154_v42, %s4851_s3  ;;  %v600_v45 = vpop.f32.mrb[13].mxu1  ;;  %676 = vrot.lane.b32.xlu1 %v5157_v44, %s4851_s3 }
 0x2ba   :  { %v5163_v46 = vpop.f32.mrb[14].mxu1 }
 0x2bb   :  { %v604_v47 = vpop.f32.mrb[15].mxu1 }
 0x2bd   :  { %749 = vrot.lane.b32.xlu0 %v594_v43, %s4851_s3  ;;  %751 = vrot.lane.b32.xlu1 %v600_v45, %s4851_s3 }
 0x2c0   :  { %v5167_v21 = vpop.f32.mrb[16].mxu1 }
 0x2c1   :  { %678 = vrot.lane.b32.xlu0 %v5163_v46, %s4851_s3  ;;  %v610_v23 = vpop.f32.mrb[17].mxu1  ;;  %680 = vrot.lane.b32.xlu1 %v5167_v21, %s4851_s3 }
 0x2c2   :  { %v5173_v48 = vpop.f32.mrb[18].mxu1 }
 0x2c3   :  { %v614_v49 = vpop.f32.mrb[19].mxu1 }
 0x2c5   :  { %753 = vrot.lane.b32.xlu0 %v604_v47, %s4851_s3  ;;  %755 = vrot.lane.b32.xlu1 %v610_v23, %s4851_s3 }
 0x2c8   :  { %v5177_v50 = vpop.f32.mrb[20].mxu1 }
 0x2c9   :  { %682 = vrot.lane.b32.xlu0 %v5173_v48, %s4851_s3  ;;  %v620_v51 = vpop.f32.mrb[21].mxu1  ;;  %684 = vrot.lane.b32.xlu1 %v5177_v50, %s4851_s3 }
 0x2ca   :  { %v5183_v52 = vpop.f32.mrb[22].mxu1 }
 0x2cb   :  { %v624_v53 = vpop.f32.mrb[23].mxu1 }
 0x2cd   :  { %757 = vrot.lane.b32.xlu0 %v614_v49, %s4851_s3  ;;  %759 = vrot.lane.b32.xlu1 %v620_v51, %s4851_s3 }
 0x2d0   :  { %v5187_v54 = vpop.f32.mrb[24].mxu1 }
 0x2d1   :  { %686 = vrot.lane.b32.xlu0 %v5183_v52, %s4851_s3  ;;  %688 = vrot.lane.b32.xlu1 %v5187_v54, %s4851_s3  ;;  %v630_v55 = vpop.f32.mrb[25].mxu1 }
 0x2d2   :  { %v5193_v56 = vpop.f32.mrb[26].mxu1 }
 0x2d3   :  { %v634_v57 = vpop.f32.mrb[27].mxu1 }
 0x2d5   :  { %761 = vrot.lane.b32.xlu0 %v624_v53, %s4851_s3  ;;  %763 = vrot.lane.b32.xlu1 %v630_v55, %s4851_s3 }
 0x2d8   :  { %v5197_v58 = vpop.f32.mrb[28].mxu1 }
 0x2d9   :  { %690 = vrot.lane.b32.xlu0 %v5193_v56, %s4851_s3  ;;  %692 = vrot.lane.b32.xlu1 %v5197_v58, %s4851_s3  ;;  %v640_v20 = vpop.f32.mrb[29].mxu1 }
 0x2da   :  { %v5203_v22 = vpop.f32.mrb[30].mxu1 }
 0x2db   :  { %v644_v59 = vpop.f32.mrb[31].mxu1 }
 0x2dd   :  { %765 = vrot.lane.b32.xlu0 %v634_v57, %s4851_s3  ;;  %767 = vrot.lane.b32.xlu1 %v640_v20, %s4851_s3 }
 0x2e1   :  { %769 = vrot.lane.b32.xlu0 %v644_v59, %s4851_s3 }
 0x312   :  { %v665_v2 = vpop.permute.xlu0 %664 }
 0x313   :  { %v711_v7 = vadd.f32 %v665_v2, %v5135_v35 }
 0x314   :  { %v667_v0 = vpop.permute.xlu1 %666 }
 0x315   :  { %v712_v12 = vadd.f32 %v667_v0, %v5140_v18 }
 0x318   :  { %v742_v3 = vpop.permute.xlu1 %741 }
 0x319   :  { %v786_v27 = vadd.f32 %v742_v3, %v710_v5 }
 0x31b   :  { %v669_v6 = vpop.permute.xlu0 %668  ;;  %v811_v9 = vadd.f32 %v5216_v63, %v786_v27 }
 0x31c   :  { %v713_v41 = vadd.f32 %v669_v6, %v5144_v37 }
 0x31d   :  { %v827_v24 = vmax.f32 %v811_v9, 0.0 }
 0x31e   :  { %v746_v11 = vpop.permute.xlu1 %745 }
 0x31f   :  { %v744_v8 = vpop.permute.xlu0 %743  ;;  %v788_v26 = vadd.f32 %v746_v11, %v712_v12 }
 0x320   :  { %v787_v10 = vadd.f32 %v744_v8, %v711_v7 }
 0x321   :  { %v813_v30 = vadd.f32 %v5216_v63, %v788_v26 }
 0x322   :  { %v812_v13 = vadd.f32 %v5216_v63, %v787_v10 }
 0x323   :  { %v671_v14 = vpop.permute.xlu0 %670  ;;  %v673_v19 = vpop.permute.xlu1 %672  ;;  %v829_v35 = vmax.f32 %v813_v30, 0.0 }
 0x324   :  { %v828_v15 = vmax.f32 %v812_v13, 0.0  ;;  %v714_v18 = vadd.f32 %v671_v14, %v5148_v39  ;;  %v715_v36 = vadd.f32 %v673_v19, %v5154_v42  ;;  %v5243_v39 = vld [vmem:[%s5909_s6] sm:$0xff]  }
 0x325   :  { %4262 = vmatpush3.bf16.msra.mxu1 %v5243_v39 }
 0x326   :  { %v4055_v17 = vpack.c.bf16 %v828_v15, %v827_v24  ;;  %4263 = vmatprep.subr.bf16.mxu1 %v4847_v1  ;;  %v5260_v24 = vld [vmem:[%s5909_s6 + $0x8] sm:$0xff]  }
 0x327   :  { %v748_v28 = vpop.permute.xlu0 %747 }
 0x328   :  { %v789_v31 = vadd.f32 %v748_v28, %v713_v41  ;;  %914 = vrot.lane.b32.xlu1 %v4055_v17, %s4851_s3 }
 0x329   :  { %4264 = vmatpush3.bf16.msra.mxu1 %v5260_v24 }
 0x32a   :  { %v814_v32 = vadd.f32 %v5216_v63, %v789_v31  ;;  %4277 = vmatprep.subr.bf16.mxu1 %v4847_v1 }
 0x32b   :  { %v675_v33 = vpop.permute.xlu0 %674  ;;  %v677_v34 = vpop.permute.xlu1 %676 }
 0x32c   :  { %v830_v16 = vmax.f32 %v814_v32, 0.0  ;;  %v716_v42 = vadd.f32 %v675_v33, %v5157_v44  ;;  %v717_v57 = vadd.f32 %v677_v34, %v5163_v46 }
 0x32e   :  { %v4056_v38 = vpack.c.bf16 %v830_v16, %v829_v35 }
 0x32f   :  { %v750_v37 = vpop.permute.xlu0 %749  ;;  %v752_v40 = vpop.permute.xlu1 %751 }
 0x330   :  { %v790_v43 = vadd.f32 %v750_v37, %v714_v18  ;;  %v791_v45 = vadd.f32 %v752_v40, %v715_v36  ;;  %916 = vrot.lane.b32.xlu0 %v4056_v38, %s4851_s3 }
 0x332   :  { %v815_v47 = vadd.f32 %v5216_v63, %v790_v43  ;;  %v816_v23 = vadd.f32 %v5216_v63, %v791_v45 }
 0x333   :  { %v679_v49 = vpop.permute.xlu0 %678  ;;  %v681_v51 = vpop.permute.xlu1 %680 }
 0x334   :  { %v831_v53 = vmax.f32 %v815_v47, 0.0  ;;  %v832_v55 = vmax.f32 %v816_v23, 0.0  ;;  %v718_v46 = vadd.f32 %v679_v49, %v5167_v21  ;;  %v719_v25 = vadd.f32 %v681_v51, %v5173_v48 }
 0x336   :  { %v4057_v20 = vpack.c.bf16 %v832_v55, %v831_v53 }
 0x337   :  { %v754_v59 = vpop.permute.xlu0 %753  ;;  %v756_v60 = vpop.permute.xlu1 %755 }
 0x338   :  { %v792_v61 = vadd.f32 %v754_v59, %v716_v42  ;;  %v793_v0 = vadd.f32 %v756_v60, %v717_v57  ;;  %918 = vrot.lane.b32.xlu1 %v4057_v20, %s4851_s3 }
 0x33a   :  { %v817_v2 = vadd.f32 %v5216_v63, %v792_v61  ;;  %v818_v3 = vadd.f32 %v5216_v63, %v793_v0 }
 0x33b   :  { %v683_v4 = vpop.permute.xlu0 %682  ;;  %v685_v5 = vpop.permute.xlu1 %684 }
 0x33c   :  { %v833_v44 = vmax.f32 %v817_v2, 0.0  ;;  %v834_v6 = vmax.f32 %v818_v3, 0.0  ;;  %v720_v26 = vadd.f32 %v683_v4, %v5177_v50  ;;  %v721_v15 = vadd.f32 %v685_v5, %v5183_v52  ;;  %v3923_v4 = vld [vmem:[%s5910_s7] ss:$0 sm:$0xff] }
 0x33e   :  { %v4058_v27 = vpack.c.bf16 %v834_v6, %v833_v44 }
 0x33f   :  { %v758_v7 = vpop.permute.xlu0 %757  ;;  %v760_v8 = vpop.permute.xlu1 %759 }
 0x340   :  { %v794_v9 = vadd.f32 %v758_v7, %v718_v46  ;;  %v795_v10 = vadd.f32 %v760_v8, %v719_v25  ;;  %920 = vrot.lane.b32.xlu0 %v4058_v27, %s4851_s3 }
 0x342   :  { %v819_v11 = vadd.f32 %v5216_v63, %v794_v9  ;;  %v820_v12 = vadd.f32 %v5216_v63, %v795_v10 }
 0x343   :  { %v687_v13 = vpop.permute.xlu0 %686  ;;  %v689_v14 = vpop.permute.xlu1 %688 }
 0x344   :  { %v835_v21 = vmax.f32 %v819_v11, 0.0  ;;  %v836_v48 = vmax.f32 %v820_v12, 0.0  ;;  %v722_v52 = vadd.f32 %v687_v13, %v5187_v54  ;;  %v723_v18 = vadd.f32 %v689_v14, %v5193_v56 }
 0x346   :  { %v4059_v41 = vpack.c.bf16 %v836_v48, %v835_v21 }
 0x347   :  { %v762_v17 = vpop.permute.xlu0 %761  ;;  %v764_v19 = vpop.permute.xlu1 %763 }
 0x348   :  { %v796_v28 = vadd.f32 %v762_v17, %v720_v26  ;;  %v797_v30 = vadd.f32 %v764_v19, %v721_v15  ;;  %922 = vrot.lane.b32.xlu1 %v4059_v41, %s4851_s3 }
 0x34a   :  { %v821_v31 = vadd.f32 %v5216_v63, %v796_v28  ;;  %v822_v32 = vadd.f32 %v5216_v63, %v797_v30 }
 0x34b   :  { %v691_v33 = vpop.permute.xlu0 %690  ;;  %v693_v34 = vpop.permute.xlu1 %692 }
 0x34c   :  { %v837_v35 = vmax.f32 %v821_v31, 0.0  ;;  %v838_v16 = vmax.f32 %v822_v32, 0.0  ;;  %v725_v50 = vadd.f32 %v693_v34, %v5203_v22  ;;  %v724_v47 = vadd.f32 %v691_v33, %v5197_v58 }
 0x34e   :  { %v4060_v36 = vpack.c.bf16 %v838_v16, %v837_v35  ;;  %v801_v40 = vadd.f32 %v725_v50, %v5214_v62 }
 0x34f   :  { %v766_v38 = vpop.permute.xlu0 %765  ;;  %v768_v37 = vpop.permute.xlu1 %767 }
 0x350   :  { %v798_v43 = vadd.f32 %v766_v38, %v722_v52  ;;  %v799_v45 = vadd.f32 %v768_v37, %v723_v18  ;;  %924 = vrot.lane.b32.xlu0 %v4060_v36, %s4851_s3  ;;  %v826_v23 = vadd.f32 %v5216_v63, %v801_v40 }
 0x352   :  { %v823_v22 = vadd.f32 %v5216_v63, %v798_v43  ;;  %v824_v54 = vadd.f32 %v5216_v63, %v799_v45  ;;  %v842_v57 = vmax.f32 %v826_v23, 0.0 }
 0x353   :  { %v770_v56 = vpop.permute.xlu0 %769 }
 0x354   :  { %v839_v49 = vmax.f32 %v823_v22, 0.0  ;;  %v840_v51 = vmax.f32 %v824_v54, 0.0  ;;  %v800_v62 = vadd.f32 %v770_v56, %v724_v47 }
 0x356   :  { %v825_v53 = vadd.f32 %v5216_v63, %v800_v62  ;;  %v4061_v55 = vpack.c.bf16 %v840_v51, %v839_v49 }
 0x358   :  { %v841_v42 = vmax.f32 %v825_v53, 0.0  ;;  %926 = vrot.lane.b32.xlu1 %v4061_v55, %s4851_s3 }
 0x35a   :  { %v4062_v20 = vpack.c.bf16 %v842_v57, %v841_v42 }
 0x35c   :  { %928 = vrot.lane.b32.xlu0 %v4062_v20, %s4851_s3 }
 0x39a   :  { %v915_v58 = vpop.permute.xlu1 %914 }
 0x39b   :  { %4237 = vmatprep.mubr.msk.bf16.mxu0 %vm954_vm4, %v915_v58 }
 0x3a2   :  { %v917_v59 = vpop.permute.xlu0 %916 }
 0x3a3   :  { %4238 = vmatmul.mubr.msk.bf16.vlgmr.msra.gmra.mrb[16].mxu0 %vm954_vm4, %v917_v59 }
 0x3a4   :  { %4254 = vmatpush3.bf16.msra.mxu0 %v5243_v39 }
 0x3a5   :  { %4255 = vmatprep.subr.bf16.mxu0 %v4847_v1 }
 0x3a8   :  { %4256 = vmatpush3.bf16.msra.mxu0 %v5260_v24 }
 0x3a9   :  { %4269 = vmatprep.subr.bf16.mxu0 %v4847_v1 }
 0x3aa   :  { %v919_v63 = vpop.permute.xlu1 %918 }
 0x3ab   :  { %4241 = vmatprep.mubr.msk.bf16.mxu0 %vm954_vm4, %v919_v63 }
 0x3b2   :  { %v921_v60 = vpop.permute.xlu0 %920 }
 0x3b3   :  { %4242 = vmatmul.mubr.msk.bf16.gmra.mrb[20].mxu0 %vm954_vm4, %v921_v60 }
 0x3ba   :  { %v923_v61 = vpop.permute.xlu1 %922 }
 0x3bb   :  { %4245 = vmatprep.mubr.msk.bf16.mxu0 %vm954_vm4, %v923_v61 }
 0x3c2   :  { %v925_v0 = vpop.permute.xlu0 %924 }
 0x3c3   :  { %4246 = vmatmul.mubr.msk.bf16.gmra.mrb[24].mxu0 %vm954_vm4, %v925_v0 }
 0x3ca   :  { %v927_v2 = vpop.permute.xlu1 %926 }
 0x3cb   :  { %4249 = vmatprep.mubr.msk.bf16.mxu0 %vm954_vm4, %v927_v2 }
 0x3ce   :  { %v929_v3 = vpop.permute.xlu0 %928 }
 0x3cf   :  { %4250 = vmatmul.mubr.msk.bf16.gmra.mrb[28].mxu0 %vm954_vm4, %v929_v3 }
 0x3d0   :  { %4257 = vmatprep.mubr.msk.bf16.mxu0 %vm4852_vm3, %v4847_v1 }
 0x3d7   :  { %4258 = vmatmul.mubr.bf16.vlgmr.msra.gmra.mrb[32].mxu0 %v4850_v29 }
 0x3d8   :  { %4270 = vmatpush3.bf16.msra.mxu0 %v5243_v39  ;;  %4273 = vmatprep.mubr.msk.bf16.mxu0 %vm4852_vm3, %v4847_v1 }
 0x3d9   :  { %4271 = vmatprep.subr.bf16.mxu0 %v4847_v1 }
 0x3dc   :  { %4272 = vmatpush3.bf16.msra.mxu0 %v5260_v24 }
 0x3dd   :  { %4285 = vmatprep.subr.bf16.mxu0 %v4847_v1 }
 0x476   :  { %v4239_v5 = vpop.f32.mrb[16].mxu0 }
 0x477   :  { %v5307_v44 = vadd.f32 %v4239_v5, %v3923_v4  ;;  %v1013_v6 = vpop.f32.mrb[17].mxu0 }
 0x478   :  { %v4240_v46 = vpop.f32.mrb[18].mxu0  ;;  %v1014_v18 = vadd.f32 %v3923_v4, %v1013_v6 }
 0x479   :  { %v5309_v25 = vadd.f32 %v4240_v46, %v3923_v4  ;;  %v1016_v27 = vpop.f32.mrb[19].mxu0 }
 0x47a   :  { %v1017_v7 = vadd.f32 %v3923_v4, %v1016_v27 }
 0x486   :  { %v4243_v8 = vpop.f32.mrb[20].mxu0 }
 0x487   :  { %v5311_v9 = vadd.f32 %v4243_v8, %v3923_v4  ;;  %v1029_v10 = vpop.f32.mrb[21].mxu0 }
 0x488   :  { %v5313_v11 = vadd.f32 %v3923_v4, %v1029_v10  ;;  %v4244_v12 = vpop.f32.mrb[22].mxu0 }
 0x489   :  { %v5315_v13 = vadd.f32 %v4244_v12, %v3923_v4  ;;  %v1032_v14 = vpop.f32.mrb[23].mxu0 }
 0x48a   :  { %v5317_v21 = vadd.f32 %v3923_v4, %v1032_v14 }
 0x496   :  { %v4247_v48 = vpop.f32.mrb[24].mxu0 }
 0x497   :  { %v5319_v26 = vadd.f32 %v4247_v48, %v3923_v4  ;;  %v1045_v15 = vpop.f32.mrb[25].mxu0 }
 0x498   :  { %v5321_v41 = vadd.f32 %v3923_v4, %v1045_v15  ;;  %v4248_v17 = vpop.f32.mrb[26].mxu0 }
 0x499   :  { %v5323_v19 = vadd.f32 %v4248_v17, %v3923_v4  ;;  %v1048_v28 = vpop.f32.mrb[27].mxu0 }
 0x49a   :  { %v5325_v30 = vadd.f32 %v3923_v4, %v1048_v28 }
 0x4a2   :  { %v4251_v31 = vpop.f32.mrb[28].mxu0 }
 0x4a3   :  { %v5327_v32 = vadd.f32 %v4251_v31, %v3923_v4  ;;  %v1061_v33 = vpop.f32.mrb[29].mxu0 }
 0x4a4   :  { %v5329_v34 = vadd.f32 %v3923_v4, %v1061_v33  ;;  %v4252_v35 = vpop.f32.mrb[30].mxu0 }
 0x4a5   :  { %v5331_v16 = vadd.f32 %v4252_v35, %v3923_v4  ;;  %v1064_v50 = vpop.f32.mrb[31].mxu0 }
 0x4a6   :  { %v5333_v52 = vadd.f32 %v3923_v4, %v1064_v50 }
 0x4aa   :  { %v1146_v36 = vpop.f32.mrb[32].mxu0 }
 0x4ab   :  { %v1152_v38 = vadd.f32 %v1146_v36, %v1014_v18  ;;  %v4259_v37 = vpop.f32.mrb[33].mxu0 }
 0x4ac   :  { %v1149_v40 = vpop.f32.mrb[34].mxu0 }
 0x4ad   :  { %4586 = vtanh.f32 %v1152_v38  ;;  %v4260_v43 = vpop.f32.mrb[35].mxu0  ;;  %v3946_v47 = vmul.f32 -1.442695, %v1152_v38 }
 0x4af   :  { %4588 = vpow2.f32 %v3946_v47 }
 0x4b7   :  { %v4587_v45 = vpop.eup %4586 }
 0x4b8   :  { %1162 = vrot.lane.b32.xlu1 %v4587_v45, %s4848_s27 }
 0x4b9   :  { %v4589_v22 = vpop.eup %4588 }
 0x4ba   :  { %v1156_v54 = vadd.f32 1.0, %v4589_v22 }
 0x4bc   :  { %4590 = vrcp.f32 %v1156_v54 }
 0x4c6   :  { %v4591_v56 = vpop.eup %4590 }
 0x4c7   :  { %v1160_v51 = vmul.f32 0.0, %v4591_v56 }
 0x52a   :  { %v1163_v23 = vpop.permute.xlu1 %1162 }
 0x52b   :  { %v1165_v49 = vmul.f32 %v4591_v56, %v1163_v23 }
 0x52d   :  { %1167 = vrot.lane.b32.xlu0 %v1165_v49, %s4848_s27 }
 0x59f   :  { %v1168_v62 = vpop.permute.xlu0 %1167 }
 0x5a0   :  { %v1170_v53 = vadd.f32 %v1168_v62, %v1160_v51 }
 0x5a2   :  { %4592 = vtanh.f32 %v1170_v53 }
 0x5ac   :  { %v4593_v55 = vpop.eup %4592 }
 0x5ad   :  { %1173 = vrot.lane.b32.xlu1 %v4593_v55, %s4848_s27 }
 0x61f   :  { %v1174_v42 = vpop.permute.xlu1 %1173 }
 0x620   :  { %v1176_v57 = vmul.f32 %v4591_v56, %v1174_v42 }
 0x622   :  { %v5338_v20 = vpack.c.bf16 %v1176_v57, %v1176_v57 }
 0x624   :  { %1188 = vrot.lane.b32.xlu0 %v5338_v20, %s4851_s3 }
 0x696   :  { %v1189_v58 = vpop.permute.xlu0 %1188 }
 0x697   :  { %4266 = vmatmul.mubr.msk.bf16.vlgmr.msra.gmra.mrb[32].mxu1 %vm510_vm2, %v1189_v58 }
 0x698   :  { %4278 = vmatpush3.bf16.msra.mxu1 %v5243_v39  ;;  %4281 = vmatprep.mubr.msk.bf16.mxu1 %vm4852_vm3, %v4847_v1 }
 0x699   :  { %4279 = vmatprep.subr.bf16.mxu1 %v4847_v1 }
 0x69c   :  { %4280 = vmatpush3.bf16.msra.mxu1 %v5260_v24 }
 0x69d   :  { %4293 = vmatprep.subr.bf16.mxu1 %v4847_v1 }
 0x76a   :  { %v1227_v59 = vpop.f32.mrb[32].mxu1 }
 0x76b   :  { %v1233_v63 = vadd.f32 %v1227_v59, %v1017_v7  ;;  %v4267_v60 = vpop.f32.mrb[33].mxu1 }
 0x76c   :  { %v1230_v61 = vpop.f32.mrb[34].mxu1 }
 0x76d   :  { %4594 = vtanh.f32 %v1233_v63  ;;  %v4268_v0 = vpop.f32.mrb[35].mxu1  ;;  %v3949_v3 = vmul.f32 -1.442695, %v1233_v63 }
 0x76f   :  { %4596 = vpow2.f32 %v3949_v3 }
 0x777   :  { %v4595_v2 = vpop.eup %4594 }
 0x778   :  { %1243 = vrot.lane.b32.xlu1 %v4595_v2, %s4848_s27 }
 0x779   :  { %v4597_v4 = vpop.eup %4596 }
 0x77a   :  { %v1237_v5 = vadd.f32 1.0, %v4597_v4 }
 0x77c   :  { %4598 = vrcp.f32 %v1237_v5 }
 0x786   :  { %v4599_v6 = vpop.eup %4598 }
 0x787   :  { %v1241_v8 = vmul.f32 %v4599_v6, %v1170_v53 }
 0x7ea   :  { %v1244_v46 = vpop.permute.xlu1 %1243 }
 0x7eb   :  { %v1246_v27 = vmul.f32 %v4599_v6, %v1244_v46 }
 0x7ed   :  { %1248 = vrot.lane.b32.xlu0 %v1246_v27, %s4848_s27 }
 0x85f   :  { %v1249_v10 = vpop.permute.xlu0 %1248 }
 0x860   :  { %v1251_v7 = vadd.f32 %v1249_v10, %v1241_v8 }
 0x862   :  { %4600 = vtanh.f32 %v1251_v7 }
 0x86c   :  { %v4601_v12 = vpop.eup %4600 }
 0x86d   :  { %1254 = vrot.lane.b32.xlu1 %v4601_v12, %s4848_s27 }
 0x8df   :  { %v1255_v14 = vpop.permute.xlu1 %1254 }
 0x8e0   :  { %v1257_v48 = vmul.f32 %v4599_v6, %v1255_v14 }
 0x8e2   :  { %v5352_v15 = vpack.c.bf16 %v1257_v48, %v1257_v48 }
 0x8e4   :  { %1269 = vrot.lane.b32.xlu0 %v5352_v15, %s4851_s3 }
 0x956   :  { %v1270_v17 = vpop.permute.xlu0 %1269 }
 0x957   :  { %4274 = vmatmul.mubr.msk.bf16.vlgmr.msra.gmra.mrb[36].mxu0 %vm510_vm2, %v1270_v17 }
 0x958   :  { %4286 = vmatpush3.bf16.msra.mxu0 %v5243_v39  ;;  %4289 = vmatprep.mubr.msk.bf16.mxu0 %vm4852_vm3, %v4847_v1 }
 0x959   :  { %4287 = vmatprep.subr.bf16.mxu0 %v4847_v1 }
 0x95c   :  { %4288 = vmatpush3.bf16.msra.mxu0 %v5260_v24 }
 0x95d   :  { %4301 = vmatprep.subr.bf16.mxu0 %v4847_v1 }
 0xa2a   :  { %v1308_v28 = vpop.f32.mrb[36].mxu0 }
 0xa2b   :  { %v1314_v31 = vadd.f32 %v1308_v28, %v5307_v44  ;;  %v4275_v33 = vpop.f32.mrb[37].mxu0 }
 0xa2c   :  { %v1311_v35 = vpop.f32.mrb[38].mxu0 }
 0xa2d   :  { %4602 = vtanh.f32 %v1314_v31  ;;  %v4276_v50 = vpop.f32.mrb[39].mxu0  ;;  %v3952_v36 = vmul.f32 -1.442695, %v1314_v31 }
 0xa2f   :  { %4604 = vpow2.f32 %v3952_v36 }
 0xa37   :  { %v4603_v18 = vpop.eup %4602 }
 0xa38   :  { %1324 = vrot.lane.b32.xlu1 %v4603_v18, %s4848_s27 }
 0xa39   :  { %v4605_v38 = vpop.eup %4604 }
 0xa3a   :  { %v1318_v37 = vadd.f32 1.0, %v4605_v38 }
 0xa3c   :  { %4606 = vrcp.f32 %v1318_v37 }
 0xa46   :  { %v4607_v40 = vpop.eup %4606 }
 0xa47   :  { %v1322_v47 = vmul.f32 %v4607_v40, %v1251_v7 }
 0xaaa   :  { %v1325_v43 = vpop.permute.xlu1 %1324 }
 0xaab   :  { %v1327_v45 = vmul.f32 %v4607_v40, %v1325_v43 }
 0xaad   :  { %1329 = vrot.lane.b32.xlu0 %v1327_v45, %s4848_s27 }
 0xb1f   :  { %v1330_v22 = vpop.permute.xlu0 %1329 }
 0xb20   :  { %v1332_v44 = vadd.f32 %v1330_v22, %v1322_v47 }
 0xb22   :  { %4608 = vtanh.f32 %v1332_v44 }
 0xb2c   :  { %v4609_v54 = vpop.eup %4608 }
 0xb2d   :  { %1335 = vrot.lane.b32.xlu1 %v4609_v54, %s4848_s27 }
 0xb9f   :  { %v1336_v56 = vpop.permute.xlu1 %1335 }
 0xba0   :  { %v1338_v23 = vmul.f32 %v4607_v40, %v1336_v56 }
 0xba2   :  { %v5367_v49 = vpack.c.bf16 %v1338_v23, %v1338_v23 }
 0xba4   :  { %1350 = vrot.lane.b32.xlu0 %v5367_v49, %s4851_s3 }
 0xc16   :  { %v1351_v51 = vpop.permute.xlu0 %1350 }
 0xc17   :  { %4282 = vmatmul.mubr.msk.bf16.vlgmr.msra.gmra.mrb[36].mxu1 %vm510_vm2, %v1351_v51 }
 0xc18   :  { %4294 = vmatpush3.bf16.msra.mxu1 %v5243_v39  ;;  %4297 = vmatprep.mubr.msk.bf16.mxu1 %vm4852_vm3, %v4847_v1 }
 0xc19   :  { %4295 = vmatprep.subr.bf16.mxu1 %v4847_v1 }
 0xc1c   :  { %4296 = vmatpush3.bf16.msra.mxu1 %v5260_v24 }
 0xc1d   :  { %4309 = vmatprep.subr.bf16.mxu1 %v4847_v1 }
 0xcea   :  { %v1389_v62 = vpop.f32.mrb[36].mxu1 }
 0xceb   :  { %v1395_v53 = vadd.f32 %v1389_v62, %v5309_v25  ;;  %v4283_v55 = vpop.f32.mrb[37].mxu1 }
 0xcec   :  { %v1392_v42 = vpop.f32.mrb[38].mxu1 }
 0xced   :  { %4610 = vtanh.f32 %v1395_v53  ;;  %v4284_v57 = vpop.f32.mrb[39].mxu1  ;;  %v3955_v59 = vmul.f32 -1.442695, %v1395_v53 }
 0xcef   :  { %4612 = vpow2.f32 %v3955_v59 }
 0xcf7   :  { %v4611_v58 = vpop.eup %4610 }
 0xcf8   :  { %1405 = vrot.lane.b32.xlu1 %v4611_v58, %s4848_s27 }
 0xcf9   :  { %v4613_v63 = vpop.eup %4612 }
 0xcfa   :  { %v1399_v60 = vadd.f32 1.0, %v4613_v63 }
 0xcfc   :  { %4614 = vrcp.f32 %v1399_v60 }
 0xd06   :  { %v4615_v61 = vpop.eup %4614 }
 0xd07   :  { %v1403_v3 = vmul.f32 %v4615_v61, %v1332_v44 }
 0xd6a   :  { %v1406_v0 = vpop.permute.xlu1 %1405 }
 0xd6b   :  { %v1408_v2 = vmul.f32 %v4615_v61, %v1406_v0 }
 0xd6d   :  { %1410 = vrot.lane.b32.xlu0 %v1408_v2, %s4848_s27 }
 0xddf   :  { %v1411_v4 = vpop.permute.xlu0 %1410 }
 0xde0   :  { %v1413_v25 = vadd.f32 %v1411_v4, %v1403_v3 }
 0xde2   :  { %4616 = vtanh.f32 %v1413_v25 }
 0xdec   :  { %v4617_v5 = vpop.eup %4616 }
 0xded   :  { %1416 = vrot.lane.b32.xlu1 %v4617_v5, %s4848_s27 }
 0xe5f   :  { %v1417_v6 = vpop.permute.xlu1 %1416 }
 0xe60   :  { %v1419_v46 = vmul.f32 %v4615_v61, %v1417_v6 }
 0xe62   :  { %v5382_v27 = vpack.c.bf16 %v1419_v46, %v1419_v46 }
 0xe64   :  { %1431 = vrot.lane.b32.xlu0 %v5382_v27, %s4851_s3 }
 0xed6   :  { %v1432_v8 = vpop.permute.xlu0 %1431 }
 0xed7   :  { %4290 = vmatmul.mubr.msk.bf16.vlgmr.msra.gmra.mrb[40].mxu0 %vm510_vm2, %v1432_v8 }
 0xed8   :  { %4302 = vmatpush3.bf16.msra.mxu0 %v5243_v39  ;;  %4305 = vmatprep.mubr.msk.bf16.mxu0 %vm4852_vm3, %v4847_v1 }
 0xed9   :  { %4303 = vmatprep.subr.bf16.mxu0 %v4847_v1 }
 0xedc   :  { %4304 = vmatpush3.bf16.msra.mxu0 %v5260_v24 }
 0xedd   :  { %4317 = vmatprep.subr.bf16.mxu0 %v4847_v1 }
 0xfaa   :  { %v1470_v10 = vpop.f32.mrb[40].mxu0 }
 0xfab   :  { %v1476_v7 = vadd.f32 %v1470_v10, %v5313_v11  ;;  %v4291_v12 = vpop.f32.mrb[41].mxu0 }
 0xfac   :  { %v1473_v14 = vpop.f32.mrb[42].mxu0 }
 0xfad   :  { %4618 = vtanh.f32 %v1476_v7  ;;  %v4292_v48 = vpop.f32.mrb[43].mxu0  ;;  %v3958_v28 = vmul.f32 -1.442695, %v1476_v7 }
 0xfaf   :  { %4620 = vpow2.f32 %v3958_v28 }
 0xfb7   :  { %v4619_v17 = vpop.eup %4618 }
 0xfb8   :  { %1486 = vrot.lane.b32.xlu1 %v4619_v17, %s4848_s27 }
 0xfb9   :  { %v4621_v31 = vpop.eup %4620 }
 0xfba   :  { %v1480_v33 = vadd.f32 1.0, %v4621_v31 }
 0xfbc   :  { %4622 = vrcp.f32 %v1480_v33 }
 0xfc6   :  { %v4623_v35 = vpop.eup %4622 }
 0xfc7   :  { %v1484_v36 = vmul.f32 %v4623_v35, %v1413_v25 }
0x102a   :  { %v1487_v50 = vpop.permute.xlu1 %1486 }
0x102b   :  { %v1489_v18 = vmul.f32 %v4623_v35, %v1487_v50 }
0x102d   :  { %1491 = vrot.lane.b32.xlu0 %v1489_v18, %s4848_s27 }
0x109f   :  { %v1492_v38 = vpop.permute.xlu0 %1491 }
0x10a0   :  { %v1494_v11 = vadd.f32 %v1492_v38, %v1484_v36 }
0x10a2   :  { %4624 = vtanh.f32 %v1494_v11 }
0x10ac   :  { %v4625_v37 = vpop.eup %4624 }
0x10ad   :  { %1497 = vrot.lane.b32.xlu1 %v4625_v37, %s4848_s27 }
0x111f   :  { %v1498_v40 = vpop.permute.xlu1 %1497 }
0x1120   :  { %v1500_v43 = vmul.f32 %v4623_v35, %v1498_v40 }
0x1122   :  { %v5397_v45 = vpack.c.bf16 %v1500_v43, %v1500_v43 }
0x1124   :  { %1512 = vrot.lane.b32.xlu0 %v5397_v45, %s4851_s3 }
0x1196   :  { %v1513_v47 = vpop.permute.xlu0 %1512 }
0x1197   :  { %4298 = vmatmul.mubr.msk.bf16.vlgmr.msra.gmra.mrb[40].mxu1 %vm510_vm2, %v1513_v47 }
0x1198   :  { %4310 = vmatpush3.bf16.msra.mxu1 %v5243_v39  ;;  %4313 = vmatprep.mubr.msk.bf16.mxu1 %vm4852_vm3, %v4847_v1 }
0x1199   :  { %4311 = vmatprep.subr.bf16.mxu1 %v4847_v1 }
0x119c   :  { %4312 = vmatpush3.bf16.msra.mxu1 %v5260_v24 }
0x119d   :  { %4325 = vmatprep.subr.bf16.mxu1 %v4847_v1 }
0x126a   :  { %v1551_v22 = vpop.f32.mrb[40].mxu1 }
0x126b   :  { %v1557_v44 = vadd.f32 %v1551_v22, %v5317_v21  ;;  %v4299_v54 = vpop.f32.mrb[41].mxu1 }
0x126c   :  { %v1554_v56 = vpop.f32.mrb[42].mxu1 }
0x126d   :  { %4626 = vtanh.f32 %v1557_v44  ;;  %v4300_v23 = vpop.f32.mrb[43].mxu1  ;;  %v3961_v62 = vmul.f32 -1.442695, %v1557_v44 }
0x126f   :  { %4628 = vpow2.f32 %v3961_v62 }
0x1277   :  { %v4627_v51 = vpop.eup %4626 }
0x1278   :  { %1567 = vrot.lane.b32.xlu1 %v4627_v51, %s4848_s27 }
0x1279   :  { %v4629_v53 = vpop.eup %4628 }
0x127a   :  { %v1561_v55 = vadd.f32 1.0, %v4629_v53 }
0x127c   :  { %4630 = vrcp.f32 %v1561_v55 }
0x1286   :  { %v4631_v42 = vpop.eup %4630 }
0x1287   :  { %v1565_v59 = vmul.f32 %v4631_v42, %v1494_v11 }
0x12ea   :  { %v1568_v57 = vpop.permute.xlu1 %1567 }
0x12eb   :  { %v1570_v58 = vmul.f32 %v4631_v42, %v1568_v57 }
0x12ed   :  { %1572 = vrot.lane.b32.xlu0 %v1570_v58, %s4848_s27 }
0x135f   :  { %v1573_v63 = vpop.permute.xlu0 %1572 }
0x1360   :  { %v1575_v21 = vadd.f32 %v1573_v63, %v1565_v59 }
0x1362   :  { %4632 = vtanh.f32 %v1575_v21 }
0x136c   :  { %v4633_v60 = vpop.eup %4632 }
0x136d   :  { %1578 = vrot.lane.b32.xlu1 %v4633_v60, %s4848_s27 }
0x13df   :  { %v1579_v61 = vpop.permute.xlu1 %1578 }
0x13e0   :  { %v1581_v0 = vmul.f32 %v4631_v42, %v1579_v61 }
0x13e2   :  { %v5412_v2 = vpack.c.bf16 %v1581_v0, %v1581_v0 }
0x13e4   :  { %1593 = vrot.lane.b32.xlu0 %v5412_v2, %s4851_s3 }
0x1456   :  { %v1594_v3 = vpop.permute.xlu0 %1593 }
0x1457   :  { %4306 = vmatmul.mubr.msk.bf16.vlgmr.msra.gmra.mrb[44].mxu0 %vm510_vm2, %v1594_v3 }
0x1458   :  { %4318 = vmatpush3.bf16.msra.mxu0 %v5243_v39  ;;  %4321 = vmatprep.mubr.msk.bf16.mxu0 %vm4852_vm3, %v4847_v1 }
0x1459   :  { %4319 = vmatprep.subr.bf16.mxu0 %v4847_v1 }
0x145c   :  { %4320 = vmatpush3.bf16.msra.mxu0 %v5260_v24 }
0x145d   :  { %4333 = vmatprep.subr.bf16.mxu0 %v4847_v1 }
0x152a   :  { %v1632_v4 = vpop.f32.mrb[44].mxu0 }
0x152b   :  { %v1638_v25 = vadd.f32 %v1632_v4, %v5311_v9  ;;  %v4307_v5 = vpop.f32.mrb[45].mxu0 }
0x152c   :  { %v1635_v6 = vpop.f32.mrb[46].mxu0 }
0x152d   :  { %4634 = vtanh.f32 %v1638_v25  ;;  %v4308_v46 = vpop.f32.mrb[47].mxu0  ;;  %v3964_v10 = vmul.f32 -1.442695, %v1638_v25 }
0x152f   :  { %4636 = vpow2.f32 %v3964_v10 }
0x1537   :  { %v4635_v8 = vpop.eup %4634 }
0x1538   :  { %1648 = vrot.lane.b32.xlu1 %v4635_v8, %s4848_s27 }
0x1539   :  { %v4637_v7 = vpop.eup %4636 }
0x153a   :  { %v1642_v12 = vadd.f32 1.0, %v4637_v7 }
0x153c   :  { %4638 = vrcp.f32 %v1642_v12 }
0x1546   :  { %v4639_v14 = vpop.eup %4638 }
0x1547   :  { %v1646_v28 = vmul.f32 %v4639_v14, %v1575_v21 }
0x15aa   :  { %v1649_v48 = vpop.permute.xlu1 %1648 }
0x15ab   :  { %v1651_v17 = vmul.f32 %v4639_v14, %v1649_v48 }
0x15ad   :  { %1653 = vrot.lane.b32.xlu0 %v1651_v17, %s4848_s27 }
0x161f   :  { %v1654_v31 = vpop.permute.xlu0 %1653 }
0x1620   :  { %v1656_v9 = vadd.f32 %v1654_v31, %v1646_v28 }
0x1622   :  { %4640 = vtanh.f32 %v1656_v9 }
0x162c   :  { %v4641_v33 = vpop.eup %4640 }
0x162d   :  { %1659 = vrot.lane.b32.xlu1 %v4641_v33, %s4848_s27 }
0x169f   :  { %v1660_v35 = vpop.permute.xlu1 %1659 }
0x16a0   :  { %v1662_v50 = vmul.f32 %v4639_v14, %v1660_v35 }
0x16a2   :  { %v5427_v18 = vpack.c.bf16 %v1662_v50, %v1662_v50 }
0x16a4   :  { %1674 = vrot.lane.b32.xlu0 %v5427_v18, %s4851_s3 }
0x1716   :  { %v1675_v36 = vpop.permute.xlu0 %1674 }
0x1717   :  { %4314 = vmatmul.mubr.msk.bf16.vlgmr.msra.gmra.mrb[44].mxu1 %vm510_vm2, %v1675_v36 }
0x1718   :  { %4326 = vmatpush3.bf16.msra.mxu1 %v5243_v39  ;;  %4329 = vmatprep.mubr.msk.bf16.mxu1 %vm4852_vm3, %v4847_v1 }
0x1719   :  { %4327 = vmatprep.subr.bf16.mxu1 %v4847_v1 }
0x171c   :  { %4328 = vmatpush3.bf16.msra.mxu1 %v5260_v24 }
0x171d   :  { %4341 = vmatprep.subr.bf16.mxu1 %v4847_v1 }
0x17ea   :  { %v1713_v38 = vpop.f32.mrb[44].mxu1 }
0x17eb   :  { %v1719_v11 = vadd.f32 %v1713_v38, %v5315_v13  ;;  %v4315_v37 = vpop.f32.mrb[45].mxu1 }
0x17ec   :  { %v1716_v40 = vpop.f32.mrb[46].mxu1 }
0x17ed   :  { %4642 = vtanh.f32 %v1719_v11  ;;  %v4316_v43 = vpop.f32.mrb[47].mxu1  ;;  %v3967_v22 = vmul.f32 -1.442695, %v1719_v11 }
0x17ef   :  { %4644 = vpow2.f32 %v3967_v22 }
0x17f7   :  { %v4643_v47 = vpop.eup %4642 }
0x17f8   :  { %1729 = vrot.lane.b32.xlu1 %v4643_v47, %s4848_s27 }
0x17f9   :  { %v4645_v44 = vpop.eup %4644 }
0x17fa   :  { %v1723_v54 = vadd.f32 1.0, %v4645_v44 }
0x17fc   :  { %4646 = vrcp.f32 %v1723_v54 }
0x1806   :  { %v4647_v56 = vpop.eup %4646 }
0x1807   :  { %v1727_v62 = vmul.f32 %v4647_v56, %v1656_v9 }
0x186a   :  { %v1730_v23 = vpop.permute.xlu1 %1729 }
0x186b   :  { %v1732_v51 = vmul.f32 %v4647_v56, %v1730_v23 }
0x186d   :  { %1734 = vrot.lane.b32.xlu0 %v1732_v51, %s4848_s27 }
0x18df   :  { %v1735_v53 = vpop.permute.xlu0 %1734 }
0x18e0   :  { %v1737_v13 = vadd.f32 %v1735_v53, %v1727_v62 }
0x18e2   :  { %4648 = vtanh.f32 %v1737_v13 }
0x18ec   :  { %v4649_v55 = vpop.eup %4648 }
0x18ed   :  { %1740 = vrot.lane.b32.xlu1 %v4649_v55, %s4848_s27 }
0x195f   :  { %v1741_v42 = vpop.permute.xlu1 %1740 }
0x1960   :  { %v1743_v57 = vmul.f32 %v4647_v56, %v1741_v42 }
0x1962   :  { %v5442_v58 = vpack.c.bf16 %v1743_v57, %v1743_v57 }
0x1964   :  { %1755 = vrot.lane.b32.xlu0 %v5442_v58, %s4851_s3 }
0x19d6   :  { %v1756_v59 = vpop.permute.xlu0 %1755 }
0x19d7   :  { %4322 = vmatmul.mubr.msk.bf16.vlgmr.msra.gmra.mrb[48].mxu0 %vm510_vm2, %v1756_v59 }
0x19d8   :  { %4334 = vmatpush3.bf16.msra.mxu0 %v5243_v39  ;;  %4337 = vmatprep.mubr.msk.bf16.mxu0 %vm4852_vm3, %v4847_v1 }
0x19d9   :  { %4335 = vmatprep.subr.bf16.mxu0 %v4847_v1 }
0x19dc   :  { %4336 = vmatpush3.bf16.msra.mxu0 %v5260_v24 }
0x19dd   :  { %4349 = vmatprep.subr.bf16.mxu0 %v4847_v1 }
0x1aaa   :  { %v1794_v63 = vpop.f32.mrb[48].mxu0 }
0x1aab   :  { %v1800_v21 = vadd.f32 %v1794_v63, %v5321_v41  ;;  %v4323_v60 = vpop.f32.mrb[49].mxu0 }
0x1aac   :  { %v1797_v61 = vpop.f32.mrb[50].mxu0 }
0x1aad   :  { %4650 = vtanh.f32 %v1800_v21  ;;  %v4324_v0 = vpop.f32.mrb[51].mxu0  ;;  %v3970_v4 = vmul.f32 -1.442695, %v1800_v21 }
0x1aaf   :  { %4652 = vpow2.f32 %v3970_v4 }
0x1ab7   :  { %v4651_v3 = vpop.eup %4650 }
0x1ab8   :  { %1810 = vrot.lane.b32.xlu1 %v4651_v3, %s4848_s27 }
0x1ab9   :  { %v4653_v25 = vpop.eup %4652 }
0x1aba   :  { %v1804_v5 = vadd.f32 1.0, %v4653_v25 }
0x1abc   :  { %4654 = vrcp.f32 %v1804_v5 }
0x1ac6   :  { %v4655_v6 = vpop.eup %4654 }
0x1ac7   :  { %v1808_v10 = vmul.f32 %v4655_v6, %v1737_v13 }
0x1b2a   :  { %v1811_v46 = vpop.permute.xlu1 %1810 }
0x1b2b   :  { %v1813_v8 = vmul.f32 %v4655_v6, %v1811_v46 }
0x1b2d   :  { %1815 = vrot.lane.b32.xlu0 %v1813_v8, %s4848_s27 }
0x1b9f   :  { %v1816_v7 = vpop.permute.xlu0 %1815 }
0x1ba0   :  { %v1818_v41 = vadd.f32 %v1816_v7, %v1808_v10 }
0x1ba2   :  { %4656 = vtanh.f32 %v1818_v41 }
0x1bac   :  { %v4657_v12 = vpop.eup %4656 }
0x1bad   :  { %1821 = vrot.lane.b32.xlu1 %v4657_v12, %s4848_s27 }
0x1c1f   :  { %v1822_v14 = vpop.permute.xlu1 %1821 }
0x1c20   :  { %v1824_v48 = vmul.f32 %v4655_v6, %v1822_v14 }
0x1c22   :  { %v5457_v17 = vpack.c.bf16 %v1824_v48, %v1824_v48 }
0x1c24   :  { %1836 = vrot.lane.b32.xlu0 %v5457_v17, %s4851_s3 }
0x1c96   :  { %v1837_v28 = vpop.permute.xlu0 %1836 }
0x1c97   :  { %4330 = vmatmul.mubr.msk.bf16.vlgmr.msra.gmra.mrb[48].mxu1 %vm510_vm2, %v1837_v28 }
0x1c98   :  { %4342 = vmatpush3.bf16.msra.mxu1 %v5243_v39  ;;  %4345 = vmatprep.mubr.msk.bf16.mxu1 %vm4852_vm3, %v4847_v1 }
0x1c99   :  { %4343 = vmatprep.subr.bf16.mxu1 %v4847_v1 }
0x1c9c   :  { %4344 = vmatpush3.bf16.msra.mxu1 %v5260_v24 }
0x1c9d   :  { %4357 = vmatprep.subr.bf16.mxu1 %v4847_v1 }
0x1d6a   :  { %v1875_v31 = vpop.f32.mrb[48].mxu1 }
0x1d6b   :  { %v1881_v9 = vadd.f32 %v1875_v31, %v5325_v30  ;;  %v4331_v33 = vpop.f32.mrb[49].mxu1 }
0x1d6c   :  { %v1878_v35 = vpop.f32.mrb[50].mxu1 }
0x1d6d   :  { %4658 = vtanh.f32 %v1881_v9  ;;  %v4332_v50 = vpop.f32.mrb[51].mxu1  ;;  %v3973_v38 = vmul.f32 -1.442695, %v1881_v9 }
0x1d6f   :  { %4660 = vpow2.f32 %v3973_v38 }
0x1d77   :  { %v4659_v36 = vpop.eup %4658 }
0x1d78   :  { %1891 = vrot.lane.b32.xlu1 %v4659_v36, %s4848_s27 }
0x1d79   :  { %v4661_v11 = vpop.eup %4660 }
0x1d7a   :  { %v1885_v37 = vadd.f32 1.0, %v4661_v11 }
0x1d7c   :  { %4662 = vrcp.f32 %v1885_v37 }
0x1d86   :  { %v4663_v40 = vpop.eup %4662 }
0x1d87   :  { %v1889_v22 = vmul.f32 %v4663_v40, %v1818_v41 }
0x1dea   :  { %v1892_v43 = vpop.permute.xlu1 %1891 }
0x1deb   :  { %v1894_v47 = vmul.f32 %v4663_v40, %v1892_v43 }
0x1ded   :  { %1896 = vrot.lane.b32.xlu0 %v1894_v47, %s4848_s27  ;;  %v4842_v47 = vld [vmem:[%s5909_s6] sm:$0xff]  }
0x1e5f   :  { %v1897_v44 = vpop.permute.xlu0 %1896 }
0x1e60   :  { %v1899_v30 = vadd.f32 %v1897_v44, %v1889_v22  ;;  %v4843_v22 = vld [vmem:[%s5909_s6 + $0x8] sm:$0xff]  }
0x1e62   :  { %4664 = vtanh.f32 %v1899_v30 }
0x1e6c   :  { %v4665_v54 = vpop.eup %4664 }
0x1e6d   :  { %1902 = vrot.lane.b32.xlu1 %v4665_v54, %s4848_s27 }
0x1edf   :  { %v1903_v56 = vpop.permute.xlu1 %1902 }
0x1ee0   :  { %v1905_v23 = vmul.f32 %v4663_v40, %v1903_v56 }
0x1ee2   :  { %v5472_v51 = vpack.c.bf16 %v1905_v23, %v1905_v23 }
0x1ee4   :  { %1917 = vrot.lane.b32.xlu0 %v5472_v51, %s4851_s3 }
0x1f56   :  { %v1918_v62 = vpop.permute.xlu0 %1917 }
0x1f57   :  { %4338 = vmatmul.mubr.msk.bf16.vlgmr.msra.gmra.mrb[52].mxu0 %vm510_vm2, %v1918_v62 }
0x1f58   :  { %4350 = vmatpush3.bf16.msra.mxu0 %v5243_v39  ;;  %4353 = vmatprep.mubr.msk.bf16.mxu0 %vm4852_vm3, %v4847_v1 }
0x1f59   :  { %4351 = vmatprep.subr.bf16.mxu0 %v4847_v1 }
0x1f5c   :  { %4352 = vmatpush3.bf16.msra.mxu0 %v5260_v24 }
0x1f5d   :  { %4365 = vmatprep.subr.bf16.mxu0 %v4847_v1 }
0x202a   :  { %v1956_v53 = vpop.f32.mrb[52].mxu0 }
0x202b   :  { %v1962_v13 = vadd.f32 %v1956_v53, %v5319_v26  ;;  %v4339_v55 = vpop.f32.mrb[53].mxu0 }
0x202c   :  { %v1959_v42 = vpop.f32.mrb[54].mxu0 }
0x202d   :  { %4666 = vtanh.f32 %v1962_v13  ;;  %v4340_v57 = vpop.f32.mrb[55].mxu0  ;;  %v3976_v63 = vmul.f32 -1.442695, %v1962_v13 }
0x202f   :  { %4668 = vpow2.f32 %v3976_v63 }
0x2037   :  { %v4667_v59 = vpop.eup %4666 }
0x2038   :  { %1972 = vrot.lane.b32.xlu1 %v4667_v59, %s4848_s27 }
0x2039   :  { %v4669_v21 = vpop.eup %4668 }
0x203a   :  { %v1966_v60 = vadd.f32 1.0, %v4669_v21 }
0x203c   :  { %4670 = vrcp.f32 %v1966_v60 }
0x2046   :  { %v4671_v61 = vpop.eup %4670 }
0x2047   :  { %v1970_v4 = vmul.f32 %v4671_v61, %v1899_v30 }
0x20aa   :  { %v1973_v0 = vpop.permute.xlu1 %1972 }
0x20ab   :  { %v1975_v3 = vmul.f32 %v4671_v61, %v1973_v0 }
0x20ad   :  { %1977 = vrot.lane.b32.xlu0 %v1975_v3, %s4848_s27 }
0x211f   :  { %v1978_v25 = vpop.permute.xlu0 %1977 }
0x2120   :  { %v1980_v26 = vadd.f32 %v1978_v25, %v1970_v4 }
0x2122   :  { %4672 = vtanh.f32 %v1980_v26 }
0x212c   :  { %v4673_v5 = vpop.eup %4672 }
0x212d   :  { %1983 = vrot.lane.b32.xlu1 %v4673_v5, %s4848_s27 }
0x219f   :  { %v1984_v6 = vpop.permute.xlu1 %1983 }
0x21a0   :  { %v1986_v46 = vmul.f32 %v4671_v61, %v1984_v6 }
0x21a2   :  { %v5487_v8 = vpack.c.bf16 %v1986_v46, %v1986_v46 }
0x21a4   :  { %1998 = vrot.lane.b32.xlu0 %v5487_v8, %s4851_s3 }
0x2216   :  { %v1999_v10 = vpop.permute.xlu0 %1998 }
0x2217   :  { %4346 = vmatmul.mubr.msk.bf16.vlgmr.msra.gmra.mrb[52].mxu1 %vm510_vm2, %v1999_v10 }
0x2218   :  { %4358 = vmatpush3.bf16.msra.mxu1 %v5243_v39  ;;  %4361 = vmatprep.mubr.msk.bf16.mxu1 %vm4852_vm3, %v4847_v1 }
0x2219   :  { %4359 = vmatprep.subr.bf16.mxu1 %v4847_v1 }
0x221c   :  { %4360 = vmatpush3.bf16.msra.mxu1 %v5260_v24 }
0x221d   :  { %4373 = vmatprep.subr.bf16.mxu1 %v4847_v1 }
0x22ea   :  { %v2037_v7 = vpop.f32.mrb[52].mxu1 }
0x22eb   :  { %v2043_v41 = vadd.f32 %v2037_v7, %v5323_v19  ;;  %v4347_v12 = vpop.f32.mrb[53].mxu1 }
0x22ec   :  { %v2040_v14 = vpop.f32.mrb[54].mxu1 }
0x22ed   :  { %4674 = vtanh.f32 %v2043_v41  ;;  %v4348_v48 = vpop.f32.mrb[55].mxu1  ;;  %v3979_v39 = vmul.f32 -1.442695, %v2043_v41 }
0x22ef   :  { %4676 = vpow2.f32 %v3979_v39 }
0x22f7   :  { %v4675_v28 = vpop.eup %4674 }
0x22f8   :  { %2053 = vrot.lane.b32.xlu1 %v4675_v28, %s4848_s27 }
0x22f9   :  { %v4677_v31 = vpop.eup %4676 }
0x22fa   :  { %v2047_v9 = vadd.f32 1.0, %v4677_v31 }
0x22fc   :  { %4678 = vrcp.f32 %v2047_v9 }
0x2306   :  { %v4679_v33 = vpop.eup %4678 }
0x2307   :  { %v2051_v50 = vmul.f32 %v4679_v33, %v1980_v26 }
0x236a   :  { %v2054_v35 = vpop.permute.xlu1 %2053 }
0x236b   :  { %v2056_v24 = vmul.f32 %v4679_v33, %v2054_v35 }
0x236d   :  { %2058 = vrot.lane.b32.xlu0 %v2056_v24, %s4848_s27 }
0x23df   :  { %v2059_v36 = vpop.permute.xlu0 %2058 }
0x23e0   :  { %v2061_v19 = vadd.f32 %v2059_v36, %v2051_v50 }
0x23e2   :  { %4680 = vtanh.f32 %v2061_v19 }
0x23ec   :  { %v4681_v38 = vpop.eup %4680 }
0x23ed   :  { %2064 = vrot.lane.b32.xlu1 %v4681_v38, %s4848_s27 }
0x245f   :  { %v2065_v11 = vpop.permute.xlu1 %2064 }
0x2460   :  { %v2067_v37 = vmul.f32 %v4679_v33, %v2065_v11 }
0x2462   :  { %v5502_v40 = vpack.c.bf16 %v2067_v37, %v2067_v37 }
0x2464   :  { %2079 = vrot.lane.b32.xlu0 %v5502_v40, %s4851_s3 }
0x24d6   :  { %v2080_v43 = vpop.permute.xlu0 %2079 }
0x24d7   :  { %4354 = vmatmul.mubr.msk.bf16.vlgmr.msra.gmra.mrb[56].mxu0 %vm510_vm2, %v2080_v43 }
0x24d8   :  { %4366 = vmatpush3.bf16.msra.mxu0 %v4842_v47  ;;  %4369 = vmatprep.mubr.msk.bf16.mxu0 %vm4852_vm3, %v4847_v1 }
0x24d9   :  { %4367 = vmatprep.subr.bf16.mxu0 %v4847_v1 }
0x24dc   :  { %4368 = vmatpush3.bf16.msra.mxu0 %v4843_v22 }
0x25aa   :  { %v2118_v44 = vpop.f32.mrb[56].mxu0 }
0x25ab   :  { %v2124_v30 = vadd.f32 %v2118_v44, %v5329_v34  ;;  %v4355_v54 = vpop.f32.mrb[57].mxu0 }
0x25ac   :  { %v2121_v56 = vpop.f32.mrb[58].mxu0 }
0x25ad   :  { %4682 = vtanh.f32 %v2124_v30  ;;  %v4356_v23 = vpop.f32.mrb[59].mxu0  ;;  %v3982_v53 = vmul.f32 -1.442695, %v2124_v30 }
0x25af   :  { %4684 = vpow2.f32 %v3982_v53 }
0x25b7   :  { %v4683_v62 = vpop.eup %4682 }
0x25b8   :  { %2134 = vrot.lane.b32.xlu1 %v4683_v62, %s4848_s27 }
0x25b9   :  { %v4685_v13 = vpop.eup %4684 }
0x25ba   :  { %v2128_v55 = vadd.f32 1.0, %v4685_v13 }
0x25bc   :  { %4686 = vrcp.f32 %v2128_v55  ;;  %v4574_v55 = vld [vmem:[%s5911_s8] sm:$0xff]  }
0x25bd   :  { %4381 = vmatprep.subr.bf16.mxu0 %v4574_v55 }
0x25c6   :  { %v4687_v42 = vpop.eup %4686 }
0x25c7   :  { %v2132_v63 = vmul.f32 %v4687_v42, %v2061_v19 }
0x262a   :  { %v2135_v57 = vpop.permute.xlu1 %2134 }
0x262b   :  { %v2137_v59 = vmul.f32 %v4687_v42, %v2135_v57 }
0x262d   :  { %2139 = vrot.lane.b32.xlu0 %v2137_v59, %s4848_s27 }
0x269f   :  { %v2140_v21 = vpop.permute.xlu0 %2139 }
0x26a0   :  { %v2142_v34 = vadd.f32 %v2140_v21, %v2132_v63 }
0x26a2   :  { %4688 = vtanh.f32 %v2142_v34 }
0x26ac   :  { %v4689_v60 = vpop.eup %4688 }
0x26ad   :  { %2145 = vrot.lane.b32.xlu1 %v4689_v60, %s4848_s27  ;;  %v5580_v60 = vld [vmem:[%s5912_s9 + $0x8] sm:$0xff]  }
0x271f   :  { %v2146_v61 = vpop.permute.xlu1 %2145 }
0x2720   :  { %v2148_v0 = vmul.f32 %v4687_v42, %v2146_v61 }
0x2722   :  { %v5520_v3 = vpack.c.bf16 %v2148_v0, %v2148_v0 }
0x2724   :  { %2160 = vrot.lane.b32.xlu0 %v5520_v3, %s4851_s3 }
0x2796   :  { %v2161_v4 = vpop.permute.xlu0 %2160 }
0x2797   :  { %4362 = vmatmul.mubr.msk.bf16.vlgmr.msra.gmra.mrb[56].mxu1 %vm510_vm2, %v2161_v4 }
0x2798   :  { %4374 = vmatpush3.bf16.msra.mxu1 %v4842_v47  ;;  %4377 = vmatprep.mubr.msk.bf16.mxu1 %vm4852_vm3, %v4847_v1 }
0x2799   :  { %4375 = vmatprep.subr.bf16.mxu1 %v4847_v1 }
0x279c   :  { %4376 = vmatpush3.bf16.msra.mxu1 %v4843_v22 }
0x279d   :  { %4401 = vmatprep.subr.bf16.mxu1 %v4847_v1 }
0x286a   :  { %v2199_v25 = vpop.f32.mrb[56].mxu1 }
0x286b   :  { %v2205_v26 = vadd.f32 %v2199_v25, %v5333_v52  ;;  %v4363_v5 = vpop.f32.mrb[57].mxu1 }
0x286c   :  { %v2202_v6 = vpop.f32.mrb[58].mxu1 }
0x286d   :  { %4690 = vtanh.f32 %v2205_v26  ;;  %v4364_v46 = vpop.f32.mrb[59].mxu1  ;;  %v3985_v7 = vmul.f32 -1.442695, %v2205_v26 }
0x286f   :  { %4692 = vpow2.f32 %v3985_v7  ;;  %v5608_v7 = vld [vmem:[%s5913_s10] ss:$0 sm:$0xff] }
0x2877   :  { %v4691_v10 = vpop.eup %4690 }
0x2878   :  { %2215 = vrot.lane.b32.xlu1 %v4691_v10, %s4848_s27 }
0x2879   :  { %v4693_v41 = vpop.eup %4692 }
0x287a   :  { %v2209_v12 = vadd.f32 1.0, %v4693_v41 }
0x287c   :  { %4694 = vrcp.f32 %v2209_v12 }
0x2886   :  { %v4695_v14 = vpop.eup %4694 }
0x2887   :  { %v2213_v39 = vmul.f32 %v4695_v14, %v2142_v34 }
0x28ea   :  { %v2216_v48 = vpop.permute.xlu1 %2215 }
0x28eb   :  { %v2218_v28 = vmul.f32 %v4695_v14, %v2216_v48 }
0x28ed   :  { %2220 = vrot.lane.b32.xlu0 %v2218_v28, %s4848_s27 }
0x295f   :  { %v2221_v31 = vpop.permute.xlu0 %2220 }
0x2960   :  { %v2223_v52 = vadd.f32 %v2221_v31, %v2213_v39 }
0x2962   :  { %4696 = vtanh.f32 %v2223_v52 }
0x296c   :  { %v4697_v9 = vpop.eup %4696 }
0x296d   :  { %2226 = vrot.lane.b32.xlu1 %v4697_v9, %s4848_s27 }
0x29df   :  { %v2227_v33 = vpop.permute.xlu1 %2226 }
0x29e0   :  { %v2229_v35 = vmul.f32 %v4695_v14, %v2227_v33 }
0x29e2   :  { %v5533_v24 = vpack.c.bf16 %v2229_v35, %v2229_v35 }
0x29e4   :  { %2241 = vrot.lane.b32.xlu0 %v5533_v24, %s4851_s3 }
0x2a56   :  { %v2242_v50 = vpop.permute.xlu0 %2241 }
0x2a57   :  { %4370 = vmatmul.mubr.msk.bf16.vlgmr.msra.gmra.mrb[60].mxu0 %vm510_vm2, %v2242_v50 }
0x2a58   :  { %4382 = vmatpush3.bf16.msra.mxu0 %v4574_v55 }
0x2b2a   :  { %v2280_v36 = vpop.f32.mrb[60].mxu0 }
0x2b2b   :  { %v2286_v19 = vadd.f32 %v2280_v36, %v5327_v32  ;;  %v4371_v38 = vpop.f32.mrb[61].mxu0 }
0x2b2c   :  { %v2283_v11 = vpop.f32.mrb[62].mxu0 }
0x2b2d   :  { %4698 = vtanh.f32 %v2286_v19  ;;  %v4372_v37 = vpop.f32.mrb[63].mxu0  ;;  %v3988_v47 = vmul.f32 -1.442695, %v2286_v19 }
0x2b2f   :  { %4700 = vpow2.f32 %v3988_v47 }
0x2b37   :  { %v4699_v43 = vpop.eup %4698 }
0x2b38   :  { %2296 = vrot.lane.b32.xlu1 %v4699_v43, %s4848_s27 }
0x2b39   :  { %v4701_v22 = vpop.eup %4700 }
0x2b3a   :  { %v2290_v44 = vadd.f32 1.0, %v4701_v22 }
0x2b3c   :  { %4702 = vrcp.f32 %v2290_v44 }
0x2b46   :  { %v4703_v30 = vpop.eup %4702 }
0x2b47   :  { %v2294_v32 = vmul.f32 %v4703_v30, %v2223_v52 }
0x2baa   :  { %v2297_v54 = vpop.permute.xlu1 %2296 }
0x2bab   :  { %v2299_v56 = vmul.f32 %v4703_v30, %v2297_v54 }
0x2bad   :  { %2301 = vrot.lane.b32.xlu0 %v2299_v56, %s4848_s27 }
0x2bb1   :  { %1181 = vrot.lane.b32.xlu0 %v5338_v20, %s4851_s3  ;;  %v4575_v20 = vld [vmem:[%s5911_s8 + $0x8] sm:$0xff]  }
0x2bb2   :  { %4383 = vmatprep.subr.bf16.mxu0 %v4575_v20 }
0x2bb3   :  { %4384 = vmatpush3.bf16.msra.mxu0 %v4575_v20 }
0x2bb4   :  { %4433 = vmatprep.subr.bf16.mxu0 %v4847_v1 }
0x2bb5   :  { %1343 = vrot.lane.b32.xlu0 %v5367_v49, %s4851_s3 }
0x2c1f   :  { %v2302_v23 = vpop.permute.xlu0 %2301 }
0x2c20   :  { %v5545_v62 = vadd.f32 %v2302_v23, %v2294_v32 }
0x2c22   :  { %4704 = vtanh.f32 %v5545_v62 }
0x2c23   :  { %v1182_v53 = vpop.permute.xlu0 %1181 }
0x2c24   :  { %1185 = vst.msk [vmem:[#allocation3] sm:$0xf] %vm1184_vm5, %v1182_v53 }
0x2c27   :  { %v1344_v13 = vpop.permute.xlu0 %1343 }
0x2c28   :  { %1347 = vst.msk [vmem:[#allocation3 + $0x8] sm:$0xf] %vm1184_vm5, %v1344_v13 }
0x2c2c   :  { %v4705_v49 = vpop.eup %4704 }
0x2c2d   :  { %2307 = vrot.lane.b32.xlu1 %v4705_v49, %s4848_s27 }
0x2c31   :  { %1262 = vrot.lane.b32.xlu1 %v5352_v15, %s4851_s3 }
0x2c35   :  { %1424 = vrot.lane.b32.xlu1 %v5382_v27, %s4851_s3  ;;  %v5572_v27 = vld [vmem:[%s5912_s9] sm:$0xff]  }
0x2c9f   :  { %v2308_v42 = vpop.permute.xlu1 %2307 }
0x2ca0   :  { %v2310_v57 = vmul.f32 %v4703_v30, %v2308_v42 }
0x2ca2   :  { %v5562_v59 = vpack.c.bf16 %v2310_v57, %v2310_v57 }
0x2ca3   :  { %v1263_v63 = vpop.permute.xlu1 %1262 }
0x2ca4   :  { %1266 = vst.msk [vmem:[#allocation3 + $0x4] sm:$0xf] %vm1184_vm5, %v1263_v63  ;;  %2322 = vrot.lane.b32.xlu0 %v5562_v59, %s4851_s3 }
0x2ca7   :  { %v1425_v21 = vpop.permute.xlu1 %1424 }
0x2ca8   :  { %1428 = vst.msk [vmem:[#allocation3 + $0xc] sm:$0xf] %vm1184_vm5, %v1425_v21 }
0x2cab   :  { %v4576_v34 = vld [vmem:[#allocation3] sm:$0xff]  }
0x2cac   :  { %4385 = vmatprep.mubr.msk.bf16.mxu0 %vm510_vm2, %v4576_v34 }
0x2caf   :  { %v4577_v15 = vld [vmem:[#allocation3 + $0x8] sm:$0xff]  }
0x2cb0   :  { %4386 = vmatmul.mubr.msk.bf16.vlgmr.msra.gmra.mrb[64].mxu0 %vm510_vm2, %v4577_v15 }
0x2cb1   :  { %4434 = vmatpush3.bf16.msra.mxu0 %v5572_v27 }
0x2cb2   :  { %4435 = vmatprep.subr.bf16.mxu0 %v4847_v1 }
0x2cb5   :  { %4436 = vmatpush3.bf16.msra.mxu0 %v5580_v60 }
0x2cb6   :  { %4449 = vmatprep.subr.bf16.mxu0 %v4847_v1 }
0x2d16   :  { %v2323_v61 = vpop.permute.xlu0 %2322 }
0x2d17   :  { %4378 = vmatmul.mubr.msk.bf16.vlgmr.msra.gmra.mrb[60].mxu1 %vm510_vm2, %v2323_v61 }
0x2d18   :  { %4402 = vmatpush3.bf16.msra.mxu1 %v5572_v27  ;;  %4405 = vmatprep.mubr.msk.bf16.mxu1 %vm4852_vm3, %v4847_v1 }
0x2d19   :  { %4403 = vmatprep.subr.bf16.mxu1 %v4847_v1 }
0x2d1c   :  { %4404 = vmatpush3.bf16.msra.mxu1 %v5580_v60 }
0x2d1d   :  { %4409 = vmatprep.subr.bf16.mxu1 %v4847_v1 }
0x2d1f   :  { %4406 = vmatmul.mubr.bf16.vlgmr.msra.gmra.mrb[64].mxu1 %v4850_v29 }
0x2d20   :  { %4410 = vmatpush3.bf16.msra.mxu1 %v5572_v27  ;;  %4413 = vmatprep.mubr.msk.bf16.mxu1 %vm4852_vm3, %v4847_v1 }
0x2d21   :  { %4411 = vmatprep.subr.bf16.mxu1 %v4847_v1 }
0x2d24   :  { %4412 = vmatpush3.bf16.msra.mxu1 %v5580_v60 }
0x2d25   :  { %4417 = vmatprep.subr.bf16.mxu1 %v4847_v1 }
0x2d83   :  { %v5598_v0 = vpop.f32.mrb[64].mxu0 }
0x2d84   :  { %v2538_v4 = vpop.f32.mrb[65].mxu0 }
0x2d85   :  { %v5600_v25 = vpop.f32.mrb[66].mxu0  ;;  %v2539_v41 = vadd.f32 %v5608_v7, %v2538_v4 }
0x2d86   :  { %v2541_v26 = vpop.f32.mrb[67].mxu0 }
0x2d87   :  { %v2542_v44 = vadd.f32 %v5608_v7, %v2541_v26 }
0x2dea   :  { %v2361_v5 = vpop.f32.mrb[60].mxu1 }
0x2deb   :  { %v5603_v29 = vadd.f32 %v2361_v5, %v5331_v16  ;;  %v4379_v6 = vpop.f32.mrb[61].mxu1 }
0x2dec   :  { %v2364_v46 = vpop.f32.mrb[62].mxu1  ;;  %v2547_v6 = vadd.f32 %v5598_v0, %v5608_v7 }
0x2ded   :  { %v4380_v10 = vpop.f32.mrb[63].mxu1 }
0x2df2   :  { %v2668_v12 = vpop.f32.mrb[64].mxu1 }
0x2df3   :  { %v2674_v14 = vadd.f32 %v2668_v12, %v2539_v41  ;;  %v4407_v48 = vpop.f32.mrb[65].mxu1 }
0x2df4   :  { %v2671_v28 = vpop.f32.mrb[66].mxu1 }
0x2df5   :  { %4706 = vtanh.f32 %v2674_v14  ;;  %v4408_v39 = vpop.f32.mrb[67].mxu1  ;;  %v4014_v16 = vmul.f32 -1.442695, %v2674_v14 }
0x2df7   :  { %4708 = vpow2.f32 %v4014_v16 }
0x2dff   :  { %v4707_v31 = vpop.eup %4706 }
0x2e00   :  { %2684 = vrot.lane.b32.xlu1 %v4707_v31, %s4848_s27 }
0x2e01   :  { %v4709_v52 = vpop.eup %4708 }
0x2e02   :  { %v2678_v9 = vadd.f32 1.0, %v4709_v52 }
0x2e04   :  { %4710 = vrcp.f32 %v2678_v9 }
0x2e0e   :  { %v4711_v33 = vpop.eup %4710 }
0x2e0f   :  { %v2682_v36 = vmul.f32 0.0, %v4711_v33 }
0x2e72   :  { %v2685_v35 = vpop.permute.xlu1 %2684 }
0x2e73   :  { %v2687_v50 = vmul.f32 %v4711_v33, %v2685_v35 }
0x2e75   :  { %2689 = vrot.lane.b32.xlu0 %v2687_v50, %s4848_s27 }
0x2ee7   :  { %v2690_v19 = vpop.permute.xlu0 %2689 }
0x2ee8   :  { %v2692_v38 = vadd.f32 %v2690_v19, %v2682_v36  ;;  %v3991_v19 = vmul.f32 -1.442695, %v5603_v29 }
0x2eea   :  { %4712 = vtanh.f32 %v2692_v38 }
0x2ef4   :  { %v4713_v11 = vpop.eup %4712 }
0x2ef5   :  { %2695 = vrot.lane.b32.xlu1 %v4713_v11, %s4848_s27 }
0x2f67   :  { %v2696_v37 = vpop.permute.xlu1 %2695 }
0x2f68   :  { %v2698_v43 = vmul.f32 %v4711_v33, %v2696_v37 }
0x2f6a   :  { %v2700_v47 = vpack.c.bf16 %v2698_v43, %v2698_v43 }
0x2f6c   :  { %2702 = vrot.lane.b32.xlu0 %v2700_v47, %s4851_s3 }
0x2fde   :  { %v2703_v22 = vpop.permute.xlu0 %2702 }
0x2fdf   :  { %4414 = vmatmul.mubr.msk.bf16.vlgmr.msra.gmra.mrb[68].mxu1 %vm510_vm2, %v2703_v22 }
0x2fe0   :  { %4418 = vmatpush3.bf16.msra.mxu1 %v5572_v27  ;;  %4421 = vmatprep.mubr.msk.bf16.mxu1 %vm4852_vm3, %v4847_v1 }
0x2fe1   :  { %4419 = vmatprep.subr.bf16.mxu1 %v4847_v1 }
0x2fe4   :  { %4420 = vmatpush3.bf16.msra.mxu1 %v5580_v60 }
0x2fe5   :  { %4425 = vmatprep.subr.bf16.mxu1 %v4847_v1 }
0x30b2   :  { %v2741_v30 = vpop.f32.mrb[68].mxu1 }
0x30b3   :  { %v2747_v54 = vadd.f32 %v2741_v30, %v2542_v44  ;;  %v4415_v56 = vpop.f32.mrb[69].mxu1 }
0x30b4   :  { %v2744_v32 = vpop.f32.mrb[70].mxu1 }
0x30b5   :  { %4714 = vtanh.f32 %v2747_v54  ;;  %v4416_v23 = vpop.f32.mrb[71].mxu1  ;;  %v4016_v13 = vmul.f32 -1.442695, %v2747_v54 }
0x30b7   :  { %4716 = vpow2.f32 %v4016_v13 }
0x30bf   :  { %v4715_v53 = vpop.eup %4714 }
0x30c0   :  { %2757 = vrot.lane.b32.xlu1 %v4715_v53, %s4848_s27 }
0x30c1   :  { %v4717_v55 = vpop.eup %4716 }
0x30c2   :  { %v2751_v20 = vadd.f32 1.0, %v4717_v55 }
0x30c4   :  { %4718 = vrcp.f32 %v2751_v20 }
0x30ce   :  { %v4719_v49 = vpop.eup %4718 }
0x30cf   :  { %v2755_v63 = vmul.f32 %v4719_v49, %v2692_v38 }
0x3132   :  { %v2758_v42 = vpop.permute.xlu1 %2757 }
0x3133   :  { %v2760_v57 = vmul.f32 %v4719_v49, %v2758_v42 }
0x3135   :  { %2762 = vrot.lane.b32.xlu0 %v2760_v57, %s4848_s27 }
0x31a7   :  { %v2763_v21 = vpop.permute.xlu0 %2762 }
0x31a8   :  { %v2765_v34 = vadd.f32 %v2763_v21, %v2755_v63 }
0x31aa   :  { %4720 = vtanh.f32 %v2765_v34 }
0x31b4   :  { %v4721_v15 = vpop.eup %4720 }
0x31b5   :  { %2768 = vrot.lane.b32.xlu1 %v4721_v15, %s4848_s27 }
0x3227   :  { %v2769_v61 = vpop.permute.xlu1 %2768 }
0x3228   :  { %v2771_v4 = vmul.f32 %v4719_v49, %v2769_v61 }
0x322a   :  { %v2773_v26 = vpack.c.bf16 %v2771_v4, %v2771_v4 }
0x322c   :  { %2775 = vrot.lane.b32.xlu0 %v2773_v26, %s4851_s3 }
0x329e   :  { %v2776_v5 = vpop.permute.xlu0 %2775 }
0x329f   :  { %4422 = vmatmul.mubr.msk.bf16.vlgmr.msra.gmra.mrb[72].mxu1 %vm510_vm2, %v2776_v5 }
0x32a0   :  { %4426 = vmatpush3.bf16.msra.mxu1 %v5572_v27  ;;  %4429 = vmatprep.mubr.msk.bf16.mxu1 %vm4852_vm3, %v4847_v1 }
0x32a1   :  { %4427 = vmatprep.subr.bf16.mxu1 %v4847_v1 }
0x32a4   :  { %4428 = vmatpush3.bf16.msra.mxu1 %v5580_v60 }
0x32a5   :  { %4441 = vmatprep.subr.bf16.mxu1 %v4847_v1 }
0x3372   :  { %v2814_v46 = vpop.f32.mrb[72].mxu1 }
0x3373   :  { %v2820_v10 = vadd.f32 %v2814_v46, %v2547_v6  ;;  %v4423_v41 = vpop.f32.mrb[73].mxu1 }
0x3374   :  { %v2817_v12 = vpop.f32.mrb[74].mxu1 }
0x3375   :  { %4722 = vtanh.f32 %v2820_v10  ;;  %v4424_v14 = vpop.f32.mrb[75].mxu1  ;;  %v4018_v28 = vmul.f32 -1.442695, %v2820_v10 }
0x3377   :  { %4724 = vpow2.f32 %v4018_v28 }
0x337f   :  { %v4723_v48 = vpop.eup %4722 }
0x3380   :  { %2830 = vrot.lane.b32.xlu1 %v4723_v48, %s4848_s27 }
0x3381   :  { %v4725_v39 = vpop.eup %4724 }
0x3382   :  { %v2824_v31 = vadd.f32 1.0, %v4725_v39 }
0x3384   :  { %4726 = vrcp.f32 %v2824_v31 }
0x338e   :  { %v4727_v16 = vpop.eup %4726 }
0x338f   :  { %v2828_v0 = vmul.f32 %v4727_v16, %v2765_v34 }
0x33f2   :  { %v2831_v52 = vpop.permute.xlu1 %2830 }
0x33f3   :  { %v2833_v9 = vmul.f32 %v4727_v16, %v2831_v52 }
0x33f5   :  { %2835 = vrot.lane.b32.xlu0 %v2833_v9, %s4848_s27 }
0x3467   :  { %v2836_v33 = vpop.permute.xlu0 %2835 }
0x3468   :  { %v5638_v35 = vadd.f32 %v2836_v33, %v2828_v0 }
0x346a   :  { %4728 = vtanh.f32 %v5638_v35 }
0x346b   :  { %4730 = vtanh.f32 %v5603_v29 }
0x346c   :  { %4732 = vpow2.f32 %v3991_v19 }
0x3474   :  { %v4729_v50 = vpop.eup %4728 }
0x3475   :  { %2841 = vrot.lane.b32.xlu1 %v4729_v50, %s4848_s27  ;;  %v4731_v36 = vpop.eup %4730 }
0x3476   :  { %v4733_v38 = vpop.eup %4732 }
0x3477   :  { %v2371_v11 = vadd.f32 1.0, %v4733_v38 }
0x3479   :  { %2377 = vrot.lane.b32.xlu1 %v4731_v36, %s4848_s27  ;;  %4734 = vrcp.f32 %v2371_v11 }
0x3483   :  { %v5645_v22 = vpop.eup %4734 }
0x3484   :  { %v2375_v29 = vmul.f32 %v5645_v22, %v5545_v62 }
0x34e7   :  { %v2842_v37 = vpop.permute.xlu1 %2841 }
0x34e8   :  { %v2844_v43 = vmul.f32 %v4727_v16, %v2842_v37 }
0x34ea   :  { %v2846_v47 = vpack.c.bf16 %v2844_v43, %v2844_v43 }
0x34eb   :  { %v2378_v44 = vpop.permute.xlu1 %2377 }
0x34ec   :  { %v2380_v30 = vmul.f32 %v5645_v22, %v2378_v44  ;;  %2848 = vrot.lane.b32.xlu0 %v2846_v47, %s4851_s3 }
0x34ee   :  { %2382 = vrot.lane.b32.xlu1 %v2380_v30, %s4848_s27 }
0x355e   :  { %v2849_v54 = vpop.permute.xlu0 %2848 }
0x355f   :  { %4430 = vmatmul.mubr.msk.bf16.vlgmr.msra.gmra.mrb[76].mxu1 %vm510_vm2, %v2849_v54 }
0x3560   :  { %v2383_v56 = vpop.permute.xlu1 %2382  ;;  %4442 = vmatpush3.bf16.msra.mxu1 %v5572_v27  ;;  %4445 = vmatprep.mubr.msk.bf16.mxu1 %vm4852_vm3, %v4847_v1 }
0x3561   :  { %v2385_v32 = vadd.f32 %v2383_v56, %v2375_v29  ;;  %4443 = vmatprep.subr.bf16.mxu1 %v4847_v1 }
0x3563   :  { %4736 = vtanh.f32 %v2385_v32 }
0x3564   :  { %4444 = vmatpush3.bf16.msra.mxu1 %v5580_v60 }
0x3565   :  { %4457 = vmatprep.subr.bf16.mxu1 %v4847_v1 }
0x356d   :  { %v4737_v23 = vpop.eup %4736 }
0x356e   :  { %2388 = vrot.lane.b32.xlu1 %v4737_v23, %s4848_s27 }
0x3572   :  { %1505 = vrot.lane.b32.xlu1 %v5397_v45, %s4851_s3 }
0x3576   :  { %1667 = vrot.lane.b32.xlu1 %v5427_v18, %s4851_s3 }
0x357a   :  { %1829 = vrot.lane.b32.xlu1 %v5457_v17, %s4851_s3 }
0x357e   :  { %1991 = vrot.lane.b32.xlu1 %v5487_v8, %s4851_s3 }
0x3582   :  { %2153 = vrot.lane.b32.xlu1 %v5520_v3, %s4851_s3 }
0x3586   :  { %2315 = vrot.lane.b32.xlu1 %v5562_v59, %s4851_s3  ;;  %v2550_v59 = vadd.f32 %v5600_v25, %v5608_v7 }
0x35e0   :  { %v2389_v62 = vpop.permute.xlu1 %2388 }
0x35e1   :  { %v2391_v46 = vmul.f32 %v5645_v22, %v2389_v62 }
0x35e3   :  { %v4078_v10 = vpack.c.bf16 %v2391_v46, %v2391_v46 }
0x35e4   :  { %v1506_v53 = vpop.permute.xlu1 %1505 }
0x35e5   :  { %1509 = vst.msk [vmem:[#allocation3 + $0x10] sm:$0xf] %vm1184_vm5, %v1506_v53 }
0x35e8   :  { %v1668_v45 = vpop.permute.xlu1 %1667 }
0x35e9   :  { %1671 = vst.msk [vmem:[#allocation3 + $0x18] sm:$0xf] %vm1184_vm5, %v1668_v45 }
0x35ec   :  { %v1830_v18 = vpop.permute.xlu1 %1829 }
0x35ed   :  { %1833 = vst.msk [vmem:[#allocation3 + $0x20] sm:$0xf] %vm1184_vm5, %v1830_v18 }
0x35f0   :  { %v1992_v17 = vpop.permute.xlu1 %1991 }
0x35f1   :  { %1995 = vst.msk [vmem:[#allocation3 + $0x28] sm:$0xf] %vm1184_vm5, %v1992_v17 }
0x35f4   :  { %v2154_v8 = vpop.permute.xlu1 %2153 }
0x35f5   :  { %2157 = vst.msk [vmem:[#allocation3 + $0x30] sm:$0xf] %vm1184_vm5, %v2154_v8 }
0x35f8   :  { %v2316_v3 = vpop.permute.xlu1 %2315 }
0x35f9   :  { %2319 = vst.msk [vmem:[#allocation3 + $0x38] sm:$0xf] %vm1184_vm5, %v2316_v3 }
0x3632   :  { %v2887_v13 = vpop.f32.mrb[76].mxu1 }
0x3633   :  { %v2893_v55 = vadd.f32 %v2887_v13, %v2550_v59  ;;  %v4431_v20 = vpop.f32.mrb[77].mxu1 }
0x3634   :  { %v2890_v49 = vpop.f32.mrb[78].mxu1 }
0x3635   :  { %4738 = vtanh.f32 %v2893_v55  ;;  %v4432_v42 = vpop.f32.mrb[79].mxu1  ;;  %v4020_v63 = vmul.f32 -1.442695, %v2893_v55 }
0x3637   :  { %4740 = vpow2.f32 %v4020_v63 }
0x363f   :  { %v4739_v57 = vpop.eup %4738 }
0x3640   :  { %2903 = vrot.lane.b32.xlu0 %v4739_v57, %s4848_s27 }
0x3641   :  { %v4741_v21 = vpop.eup %4740 }
0x3642   :  { %v2897_v34 = vadd.f32 1.0, %v4741_v21 }
0x3644   :  { %4742 = vrcp.f32 %v2897_v34 }
0x364e   :  { %v4743_v15 = vpop.eup %4742 }
0x364f   :  { %v2901_v25 = vmul.f32 %v4743_v15, %v5638_v35 }
0x36b2   :  { %v2904_v61 = vpop.permute.xlu0 %2903 }
0x36b3   :  { %v2906_v4 = vmul.f32 %v4743_v15, %v2904_v61 }
0x36b5   :  { %2908 = vrot.lane.b32.xlu0 %v2906_v4, %s4848_s27 }
0x3727   :  { %v2909_v26 = vpop.permute.xlu0 %2908 }
0x3728   :  { %v5683_v5 = vadd.f32 %v2909_v26, %v2901_v25 }
0x372a   :  { %4744 = vtanh.f32 %v5683_v5 }
0x3734   :  { %v4745_v6 = vpop.eup %4744 }
0x3735   :  { %2914 = vrot.lane.b32.xlu0 %v4745_v6, %s4848_s27 }
0x3739   :  { %1586 = vrot.lane.b32.xlu0 %v5412_v2, %s4851_s3 }
0x373d   :  { %1748 = vrot.lane.b32.xlu0 %v5442_v58, %s4851_s3 }
0x3741   :  { %1910 = vrot.lane.b32.xlu0 %v5472_v51, %s4851_s3 }
0x3745   :  { %2072 = vrot.lane.b32.xlu0 %v5502_v40, %s4851_s3 }
0x3749   :  { %2234 = vrot.lane.b32.xlu0 %v5533_v24, %s4851_s3 }
0x374d   :  { %2396 = vrot.lane.b32.xlu0 %v4078_v10, %s4851_s3 }
0x37a7   :  { %v2915_v41 = vpop.permute.xlu0 %2914 }
0x37a8   :  { %v2917_v12 = vmul.f32 %v4743_v15, %v2915_v41 }
0x37aa   :  { %v2919_v2 = vpack.c.bf16 %v2917_v12, %v2917_v12 }
0x37ab   :  { %v1587_v14 = vpop.permute.xlu0 %1586 }
0x37ac   :  { %1590 = vst.msk [vmem:[#allocation3 + $0x14] sm:$0xf] %vm1184_vm5, %v1587_v14  ;;  %2921 = vrot.lane.b32.xlu1 %v2919_v2, %s4851_s3 }
0x37af   :  { %v1749_v58 = vpop.permute.xlu0 %1748 }
0x37b0   :  { %1752 = vst.msk [vmem:[#allocation3 + $0x1c] sm:$0xf] %vm1184_vm5, %v1749_v58 }
0x37b3   :  { %v1911_v51 = vpop.permute.xlu0 %1910  ;;  %v4580_v40 = vld [vmem:[#allocation3 + $0x10] sm:$0xff]  }
0x37b4   :  { %1914 = vst.msk [vmem:[#allocation3 + $0x24] sm:$0xf] %vm1184_vm5, %v1911_v51  ;;  %4389 = vmatprep.mubr.msk.bf16.mxu0 %vm510_vm2, %v4580_v40 }
0x37b7   :  { %v2073_v24 = vpop.permute.xlu0 %2072  ;;  %v4581_v48 = vld [vmem:[#allocation3 + $0x18] sm:$0xff]  }
0x37b8   :  { %2076 = vst.msk [vmem:[#allocation3 + $0x2c] sm:$0xf] %vm1184_vm5, %v2073_v24  ;;  %4390 = vmatmul.mubr.msk.bf16.gmra.mrb[68].mxu0 %vm510_vm2, %v4581_v48 }
0x37bb   :  { %v2235_v28 = vpop.permute.xlu0 %2234  ;;  %v4582_v39 = vld [vmem:[#allocation3 + $0x20] sm:$0xff]  }
0x37bc   :  { %2238 = vst.msk [vmem:[#allocation3 + $0x34] sm:$0xf] %vm1184_vm5, %v2235_v28  ;;  %4393 = vmatprep.mubr.msk.bf16.mxu0 %vm510_vm2, %v4582_v39 }
0x37bf   :  { %v2397_v31 = vpop.permute.xlu0 %2396  ;;  %v4583_v16 = vld [vmem:[#allocation3 + $0x28] sm:$0xff]  }
0x37c0   :  { %2400 = vst.msk [vmem:[#allocation3 + $0x3c] sm:$0xf] %vm1184_vm5, %v2397_v31  ;;  %4394 = vmatmul.mubr.msk.bf16.gmra.mrb[72].mxu0 %vm510_vm2, %v4583_v16 }
0x37c3   :  { %v4584_v52 = vld [vmem:[#allocation3 + $0x30] sm:$0xff]  }
0x37c4   :  { %4397 = vmatprep.mubr.msk.bf16.mxu0 %vm510_vm2, %v4584_v52 }
0x37c7   :  { %v4585_v9 = vld [vmem:[#allocation3 + $0x38] sm:$0xff]  }
0x37c8   :  { %4398 = vmatmul.mubr.msk.bf16.gmra.mrb[76].mxu0 %vm510_vm2, %v4585_v9 }
0x37c9   :  { %4437 = vmatprep.mubr.msk.bf16.mxu0 %vm4852_vm3, %v4847_v1 }
0x381e   :  { %v2922_v0 = vpop.permute.xlu1 %2921 }
0x381f   :  { %4438 = vmatmul.mubr.msk.bf16.vlgmr.msra.gmra.mrb[80].mxu0 %vm510_vm2, %v2922_v0 }
0x3820   :  { %4450 = vmatpush3.bf16.msra.mxu0 %v5572_v27  ;;  %4453 = vmatprep.mubr.msk.bf16.mxu0 %vm4852_vm3, %v4847_v1 }
0x3821   :  { %4451 = vmatprep.subr.bf16.mxu0 %v4847_v1 }
0x3824   :  { %4452 = vmatpush3.bf16.msra.mxu0 %v5580_v60 }
0x3825   :  { %4465 = vmatprep.subr.bf16.mxu0 %v4847_v1 }
0x388b   :  { %v5721_v33 = vpop.f32.mrb[68].mxu0 }
0x388c   :  { %v2554_v35 = vpop.f32.mrb[69].mxu0  ;;  %v2563_v39 = vadd.f32 %v5721_v33, %v5608_v7 }
0x388d   :  { %v5723_v50 = vpop.f32.mrb[70].mxu0  ;;  %v2555_v30 = vadd.f32 %v5608_v7, %v2554_v35 }
0x388e   :  { %v2557_v36 = vpop.f32.mrb[71].mxu0 }
0x388f   :  { %v2558_v21 = vadd.f32 %v5608_v7, %v2557_v36 }
0x3893   :  { %v5725_v19 = vpop.f32.mrb[72].mxu0 }
0x3894   :  { %v5727_v38 = vpop.f32.mrb[73].mxu0 }
0x3895   :  { %v5729_v11 = vpop.f32.mrb[74].mxu0 }
0x3896   :  { %v5731_v37 = vpop.f32.mrb[75].mxu0 }
0x389b   :  { %v5733_v43 = vpop.f32.mrb[76].mxu0 }
0x389c   :  { %v5735_v47 = vpop.f32.mrb[77].mxu0 }
0x389d   :  { %v5737_v22 = vpop.f32.mrb[78].mxu0 }
0x389e   :  { %v5739_v44 = vpop.f32.mrb[79].mxu0 }
0x38f2   :  { %v2960_v54 = vpop.f32.mrb[80].mxu0 }
0x38f3   :  { %v2966_v29 = vadd.f32 %v2960_v54, %v2555_v30  ;;  %v4439_v56 = vpop.f32.mrb[81].mxu0 }
0x38f4   :  { %v2963_v32 = vpop.f32.mrb[82].mxu0 }
0x38f5   :  { %4746 = vtanh.f32 %v2966_v29  ;;  %v4440_v23 = vpop.f32.mrb[83].mxu0  ;;  %v4022_v53 = vmul.f32 -1.442695, %v2966_v29 }
0x38f7   :  { %4748 = vpow2.f32 %v4022_v53 }
0x38ff   :  { %v4747_v62 = vpop.eup %4746 }
0x3900   :  { %2976 = vrot.lane.b32.xlu0 %v4747_v62, %s4848_s27 }
0x3901   :  { %v4749_v45 = vpop.eup %4748 }
0x3902   :  { %v2970_v18 = vadd.f32 1.0, %v4749_v45 }
0x3904   :  { %4750 = vrcp.f32 %v2970_v18 }
0x390e   :  { %v4751_v17 = vpop.eup %4750 }
0x390f   :  { %v2974_v59 = vmul.f32 %v4751_v17, %v5683_v5 }
0x3972   :  { %v2977_v8 = vpop.permute.xlu0 %2976 }
0x3973   :  { %v2979_v3 = vmul.f32 %v4751_v17, %v2977_v8 }
0x3975   :  { %2981 = vrot.lane.b32.xlu1 %v2979_v3, %s4848_s27  ;;  %v2566_v3 = vadd.f32 %v5723_v50, %v5608_v7 }
0x39e7   :  { %v2982_v13 = vpop.permute.xlu1 %2981 }
0x39e8   :  { %v2984_v55 = vadd.f32 %v2982_v13, %v2974_v59 }
0x39ea   :  { %4752 = vtanh.f32 %v2984_v55 }
0x39f4   :  { %v4753_v20 = vpop.eup %4752 }
0x39f5   :  { %2987 = vrot.lane.b32.xlu0 %v4753_v20, %s4848_s27 }
0x3a67   :  { %v2988_v49 = vpop.permute.xlu0 %2987 }
0x3a68   :  { %v2990_v42 = vmul.f32 %v4751_v17, %v2988_v49 }
0x3a6a   :  { %v2992_v57 = vpack.c.bf16 %v2990_v42, %v2990_v42 }
0x3a6c   :  { %2994 = vrot.lane.b32.xlu1 %v2992_v57, %s4851_s3 }
0x3ade   :  { %v2995_v63 = vpop.permute.xlu1 %2994 }
0x3adf   :  { %4446 = vmatmul.mubr.msk.bf16.vlgmr.msra.gmra.mrb[80].mxu1 %vm510_vm2, %v2995_v63 }
0x3ae0   :  { %4458 = vmatpush3.bf16.msra.mxu1 %v5572_v27  ;;  %4461 = vmatprep.mubr.msk.bf16.mxu1 %vm4852_vm3, %v4847_v1 }
0x3ae1   :  { %4459 = vmatprep.subr.bf16.mxu1 %v4847_v1 }
0x3ae4   :  { %4460 = vmatpush3.bf16.msra.mxu1 %v5580_v60 }
0x3ae5   :  { %4473 = vmatprep.subr.bf16.mxu1 %v4847_v1 }
0x3bb2   :  { %v3033_v34 = vpop.f32.mrb[80].mxu1 }
0x3bb3   :  { %v3039_v15 = vadd.f32 %v3033_v34, %v2558_v21  ;;  %v4447_v61 = vpop.f32.mrb[81].mxu1 }
0x3bb4   :  { %v3036_v4 = vpop.f32.mrb[82].mxu1 }
0x3bb5   :  { %4754 = vtanh.f32 %v3039_v15  ;;  %v4448_v25 = vpop.f32.mrb[83].mxu1  ;;  %v4024_v5 = vmul.f32 -1.442695, %v3039_v15 }
0x3bb7   :  { %4756 = vpow2.f32 %v4024_v5 }
0x3bbf   :  { %v4755_v26 = vpop.eup %4754 }
0x3bc0   :  { %3049 = vrot.lane.b32.xlu0 %v4755_v26, %s4848_s27 }
0x3bc1   :  { %v4757_v6 = vpop.eup %4756 }
0x3bc2   :  { %v3043_v46 = vadd.f32 1.0, %v4757_v6 }
0x3bc4   :  { %4758 = vrcp.f32 %v3043_v46 }
0x3bce   :  { %v4759_v10 = vpop.eup %4758 }
0x3bcf   :  { %v3047_v2 = vmul.f32 %v4759_v10, %v2984_v55 }
0x3c32   :  { %v3050_v41 = vpop.permute.xlu0 %3049 }
0x3c33   :  { %v3052_v12 = vmul.f32 %v4759_v10, %v3050_v41  ;;  %v2571_v41 = vadd.f32 %v5608_v7, %v5727_v38 }
0x3c35   :  { %3054 = vrot.lane.b32.xlu1 %v3052_v12, %s4848_s27 }
0x3ca7   :  { %v3055_v14 = vpop.permute.xlu1 %3054 }
0x3ca8   :  { %v3057_v58 = vadd.f32 %v3055_v14, %v3047_v2 }
0x3caa   :  { %4760 = vtanh.f32 %v3057_v58 }
0x3cb4   :  { %v4761_v51 = vpop.eup %4760 }
0x3cb5   :  { %3060 = vrot.lane.b32.xlu0 %v4761_v51, %s4848_s27 }
0x3d27   :  { %v3061_v40 = vpop.permute.xlu0 %3060 }
0x3d28   :  { %v3063_v24 = vmul.f32 %v4759_v10, %v3061_v40 }
0x3d2a   :  { %v3065_v48 = vpack.c.bf16 %v3063_v24, %v3063_v24 }
0x3d2c   :  { %3067 = vrot.lane.b32.xlu1 %v3065_v48, %s4851_s3 }
0x3d9e   :  { %v3068_v28 = vpop.permute.xlu1 %3067 }
0x3d9f   :  { %4454 = vmatmul.mubr.msk.bf16.vlgmr.msra.gmra.mrb[84].mxu0 %vm510_vm2, %v3068_v28 }
0x3da0   :  { %4466 = vmatpush3.bf16.msra.mxu0 %v5572_v27  ;;  %4469 = vmatprep.mubr.msk.bf16.mxu0 %vm4852_vm3, %v4847_v1 }
0x3da1   :  { %4467 = vmatprep.subr.bf16.mxu0 %v4847_v1 }
0x3da4   :  { %4468 = vmatpush3.bf16.msra.mxu0 %v5580_v60 }
0x3da5   :  { %4481 = vmatprep.subr.bf16.mxu0 %v4847_v1 }
0x3e72   :  { %v3106_v31 = vpop.f32.mrb[84].mxu0 }
0x3e73   :  { %v3112_v16 = vadd.f32 %v3106_v31, %v2563_v39  ;;  %v4455_v52 = vpop.f32.mrb[85].mxu0 }
0x3e74   :  { %v3109_v9 = vpop.f32.mrb[86].mxu0 }
0x3e75   :  { %4762 = vtanh.f32 %v3112_v16  ;;  %v4456_v0 = vpop.f32.mrb[87].mxu0  ;;  %v4026_v36 = vmul.f32 -1.442695, %v3112_v16 }
0x3e77   :  { %4764 = vpow2.f32 %v4026_v36 }
0x3e7f   :  { %v4763_v35 = vpop.eup %4762 }
0x3e80   :  { %3122 = vrot.lane.b32.xlu0 %v4763_v35, %s4848_s27 }
0x3e81   :  { %v4765_v30 = vpop.eup %4764 }
0x3e82   :  { %v3116_v54 = vadd.f32 1.0, %v4765_v30 }
0x3e84   :  { %4766 = vrcp.f32 %v3116_v54 }
0x3e8e   :  { %v4767_v29 = vpop.eup %4766 }
0x3e8f   :  { %v3120_v33 = vmul.f32 %v4767_v29, %v3057_v58 }
0x3ef2   :  { %v3123_v56 = vpop.permute.xlu0 %3122 }
0x3ef3   :  { %v3125_v32 = vmul.f32 %v4767_v29, %v3123_v56 }
0x3ef5   :  { %3127 = vrot.lane.b32.xlu1 %v3125_v32, %s4848_s27 }
0x3f67   :  { %v3128_v23 = vpop.permute.xlu1 %3127 }
0x3f68   :  { %v3130_v62 = vadd.f32 %v3128_v23, %v3120_v33 }
0x3f6a   :  { %4768 = vtanh.f32 %v3130_v62 }
0x3f74   :  { %v4769_v53 = vpop.eup %4768 }
0x3f75   :  { %3133 = vrot.lane.b32.xlu0 %v4769_v53, %s4848_s27 }
0x3fe7   :  { %v3134_v45 = vpop.permute.xlu0 %3133 }
0x3fe8   :  { %v3136_v18 = vmul.f32 %v4767_v29, %v3134_v45  ;;  %v2574_v29 = vadd.f32 %v5608_v7, %v5731_v37 }
0x3fea   :  { %v3138_v17 = vpack.c.bf16 %v3136_v18, %v3136_v18 }
0x3fec   :  { %3140 = vrot.lane.b32.xlu1 %v3138_v17, %s4851_s3 }
0x405e   :  { %v3141_v8 = vpop.permute.xlu1 %3140 }
0x405f   :  { %4462 = vmatmul.mubr.msk.bf16.vlgmr.msra.gmra.mrb[84].mxu1 %vm510_vm2, %v3141_v8 }
0x4060   :  { %4474 = vmatpush3.bf16.msra.mxu1 %v5572_v27  ;;  %4477 = vmatprep.mubr.msk.bf16.mxu1 %vm4852_vm3, %v4847_v1 }
0x4061   :  { %4475 = vmatprep.subr.bf16.mxu1 %v4847_v1 }
0x4064   :  { %4476 = vmatpush3.bf16.msra.mxu1 %v5580_v60 }
0x4065   :  { %4489 = vmatprep.subr.bf16.mxu1 %v4847_v1 }
0x4132   :  { %v3179_v59 = vpop.f32.mrb[84].mxu1 }
0x4133   :  { %v3185_v13 = vadd.f32 %v3179_v59, %v2566_v3  ;;  %v4463_v55 = vpop.f32.mrb[85].mxu1 }
0x4134   :  { %v3182_v20 = vpop.f32.mrb[86].mxu1 }
0x4135   :  { %4770 = vtanh.f32 %v3185_v13  ;;  %v4464_v49 = vpop.f32.mrb[87].mxu1  ;;  %v4028_v57 = vmul.f32 -1.442695, %v3185_v13 }
0x4137   :  { %4772 = vpow2.f32 %v4028_v57 }
0x413f   :  { %v4771_v42 = vpop.eup %4770 }
0x4140   :  { %3195 = vrot.lane.b32.xlu0 %v4771_v42, %s4848_s27 }
0x4141   :  { %v4773_v63 = vpop.eup %4772 }
0x4142   :  { %v3189_v21 = vadd.f32 1.0, %v4773_v63 }
0x4144   :  { %4774 = vrcp.f32 %v3189_v21  ;;  %v2579_v21 = vadd.f32 %v5725_v19, %v5608_v7 }
0x414e   :  { %v4775_v34 = vpop.eup %4774 }
0x414f   :  { %v3193_v50 = vmul.f32 %v4775_v34, %v3130_v62 }
0x41b2   :  { %v3196_v15 = vpop.permute.xlu0 %3195 }
0x41b3   :  { %v3198_v61 = vmul.f32 %v4775_v34, %v3196_v15 }
0x41b5   :  { %3200 = vrot.lane.b32.xlu1 %v3198_v61, %s4848_s27 }
0x4227   :  { %v3201_v4 = vpop.permute.xlu1 %3200 }
0x4228   :  { %v3203_v25 = vadd.f32 %v3201_v4, %v3193_v50 }
0x422a   :  { %4776 = vtanh.f32 %v3203_v25 }
0x4234   :  { %v4777_v26 = vpop.eup %4776 }
0x4235   :  { %3206 = vrot.lane.b32.xlu0 %v4777_v26, %s4848_s27 }
0x42a7   :  { %v3207_v5 = vpop.permute.xlu0 %3206 }
0x42a8   :  { %v3209_v6 = vmul.f32 %v4775_v34, %v3207_v5 }
0x42aa   :  { %v3211_v46 = vpack.c.bf16 %v3209_v6, %v3209_v6 }
0x42ac   :  { %3213 = vrot.lane.b32.xlu1 %v3211_v46, %s4851_s3 }
0x431e   :  { %v3214_v10 = vpop.permute.xlu1 %3213 }
0x431f   :  { %4470 = vmatmul.mubr.msk.bf16.vlgmr.msra.gmra.mrb[88].mxu0 %vm510_vm2, %v3214_v10 }
0x4320   :  { %4482 = vmatpush3.bf16.msra.mxu0 %v5572_v27  ;;  %4485 = vmatprep.mubr.msk.bf16.mxu0 %vm4852_vm3, %v4847_v1 }
0x4321   :  { %4483 = vmatprep.subr.bf16.mxu0 %v4847_v1 }
0x4324   :  { %4484 = vmatpush3.bf16.msra.mxu0 %v5580_v60 }
0x4325   :  { %4497 = vmatprep.subr.bf16.mxu0 %v4847_v1 }
0x43f2   :  { %v3252_v12 = vpop.f32.mrb[88].mxu0 }
0x43f3   :  { %v3258_v2 = vadd.f32 %v3252_v12, %v2571_v41  ;;  %v4471_v14 = vpop.f32.mrb[89].mxu0 }
0x43f4   :  { %v3255_v58 = vpop.f32.mrb[90].mxu0 }
0x43f5   :  { %4778 = vtanh.f32 %v3258_v2  ;;  %v4472_v51 = vpop.f32.mrb[91].mxu0  ;;  %v4030_v24 = vmul.f32 -1.442695, %v3258_v2 }
0x43f7   :  { %4780 = vpow2.f32 %v4030_v24 }
0x43ff   :  { %v4779_v40 = vpop.eup %4778 }
0x4400   :  { %3268 = vrot.lane.b32.xlu0 %v4779_v40, %s4848_s27 }
0x4401   :  { %v4781_v48 = vpop.eup %4780 }
0x4402   :  { %v3262_v28 = vadd.f32 1.0, %v4781_v48  ;;  %v2582_v48 = vadd.f32 %v5729_v11, %v5608_v7 }
0x4404   :  { %4782 = vrcp.f32 %v3262_v28 }
0x440e   :  { %v4783_v39 = vpop.eup %4782 }
0x440f   :  { %v3266_v38 = vmul.f32 %v4783_v39, %v3203_v25 }
0x4472   :  { %v3269_v31 = vpop.permute.xlu0 %3268 }
0x4473   :  { %v3271_v16 = vmul.f32 %v4783_v39, %v3269_v31 }
0x4475   :  { %3273 = vrot.lane.b32.xlu1 %v3271_v16, %s4848_s27 }
0x44e7   :  { %v3274_v52 = vpop.permute.xlu1 %3273 }
0x44e8   :  { %v3276_v9 = vadd.f32 %v3274_v52, %v3266_v38 }
0x44ea   :  { %4784 = vtanh.f32 %v3276_v9 }
0x44f4   :  { %v4785_v0 = vpop.eup %4784 }
0x44f5   :  { %3279 = vrot.lane.b32.xlu0 %v4785_v0, %s4848_s27 }
0x4567   :  { %v3280_v35 = vpop.permute.xlu0 %3279 }
0x4568   :  { %v3282_v36 = vmul.f32 %v4783_v39, %v3280_v35 }
0x456a   :  { %v3284_v30 = vpack.c.bf16 %v3282_v36, %v3282_v36 }
0x456c   :  { %3286 = vrot.lane.b32.xlu1 %v3284_v30, %s4851_s3 }
0x45de   :  { %v3287_v54 = vpop.permute.xlu1 %3286 }
0x45df   :  { %4478 = vmatmul.mubr.msk.bf16.vlgmr.msra.gmra.mrb[88].mxu1 %vm510_vm2, %v3287_v54 }
0x45e0   :  { %4490 = vmatpush3.bf16.msra.mxu1 %v5572_v27  ;;  %4493 = vmatprep.mubr.msk.bf16.mxu1 %vm4852_vm3, %v4847_v1 }
0x45e1   :  { %4491 = vmatprep.subr.bf16.mxu1 %v4847_v1 }
0x45e4   :  { %4492 = vmatpush3.bf16.msra.mxu1 %v5580_v60 }
0x45e5   :  { %4505 = vmatprep.subr.bf16.mxu1 %v4847_v1 }
0x46b2   :  { %v3325_v56 = vpop.f32.mrb[88].mxu1 }
0x46b3   :  { %v3331_v32 = vadd.f32 %v3325_v56, %v2574_v29  ;;  %v4479_v33 = vpop.f32.mrb[89].mxu1 }
0x46b4   :  { %v3328_v23 = vpop.f32.mrb[90].mxu1 }
0x46b5   :  { %4786 = vtanh.f32 %v3331_v32  ;;  %v4480_v62 = vpop.f32.mrb[91].mxu1  ;;  %v4032_v45 = vmul.f32 -1.442695, %v3331_v32  ;;  %v4844_v23 = vld [vmem:[%s5912_s9] sm:$0xff]  }
0x46b6   :  { %v4845_v62 = vld [vmem:[%s5912_s9 + $0x8] sm:$0xff]  }
0x46b7   :  { %4788 = vpow2.f32 %v4032_v45 }
0x46bf   :  { %v4787_v53 = vpop.eup %4786 }
0x46c0   :  { %3341 = vrot.lane.b32.xlu0 %v4787_v53, %s4848_s27  ;;  %v5850_v53 = vld [vmem:[%s5913_s10] ss:$0 sm:$0xff] }
0x46c1   :  { %v4789_v18 = vpop.eup %4788  ;;  %v2587_v45 = vadd.f32 %v5850_v53, %v5735_v47 }
0x46c2   :  { %v3335_v17 = vadd.f32 1.0, %v4789_v18 }
0x46c4   :  { %4790 = vrcp.f32 %v3335_v17 }
0x46ce   :  { %v4791_v8 = vpop.eup %4790 }
0x46cf   :  { %v3339_v37 = vmul.f32 %v4791_v8, %v3276_v9 }
0x4732   :  { %v3342_v3 = vpop.permute.xlu0 %3341 }
0x4733   :  { %v3344_v59 = vmul.f32 %v4791_v8, %v3342_v3 }
0x4735   :  { %3346 = vrot.lane.b32.xlu1 %v3344_v59, %s4848_s27 }
0x47a7   :  { %v3347_v13 = vpop.permute.xlu1 %3346 }
0x47a8   :  { %v3349_v55 = vadd.f32 %v3347_v13, %v3339_v37 }
0x47aa   :  { %4792 = vtanh.f32 %v3349_v55 }
0x47b4   :  { %v4793_v20 = vpop.eup %4792 }
0x47b5   :  { %3352 = vrot.lane.b32.xlu0 %v4793_v20, %s4848_s27 }
0x4827   :  { %v3353_v49 = vpop.permute.xlu0 %3352 }
0x4828   :  { %v3355_v42 = vmul.f32 %v4791_v8, %v3353_v49 }
0x482a   :  { %v3357_v57 = vpack.c.bf16 %v3355_v42, %v3355_v42 }
0x482c   :  { %3359 = vrot.lane.b32.xlu1 %v3357_v57, %s4851_s3 }
0x489e   :  { %v3360_v63 = vpop.permute.xlu1 %3359 }
0x489f   :  { %4486 = vmatmul.mubr.msk.bf16.vlgmr.msra.gmra.mrb[92].mxu0 %vm510_vm2, %v3360_v63 }
0x48a0   :  { %4498 = vmatpush3.bf16.msra.mxu0 %v5572_v27  ;;  %4501 = vmatprep.mubr.msk.bf16.mxu0 %vm4852_vm3, %v4847_v1 }
0x48a1   :  { %4499 = vmatprep.subr.bf16.mxu0 %v4847_v1 }
0x48a4   :  { %4500 = vmatpush3.bf16.msra.mxu0 %v5580_v60 }
0x48a5   :  { %4513 = vmatprep.subr.bf16.mxu0 %v4847_v1 }
0x4972   :  { %v3398_v34 = vpop.f32.mrb[92].mxu0 }
0x4973   :  { %v3404_v15 = vadd.f32 %v3398_v34, %v2579_v21  ;;  %v4487_v61 = vpop.f32.mrb[93].mxu0 }
0x4974   :  { %v3401_v50 = vpop.f32.mrb[94].mxu0 }
0x4975   :  { %4794 = vtanh.f32 %v3404_v15  ;;  %v4488_v4 = vpop.f32.mrb[95].mxu0  ;;  %v4034_v26 = vmul.f32 -1.442695, %v3404_v15 }
0x4977   :  { %4796 = vpow2.f32 %v4034_v26 }
0x497f   :  { %v4795_v25 = vpop.eup %4794 }
0x4980   :  { %3414 = vrot.lane.b32.xlu0 %v4795_v25, %s4848_s27  ;;  %v2590_v25 = vadd.f32 %v5850_v53, %v5739_v44 }
0x4981   :  { %v4797_v5 = vpop.eup %4796 }
0x4982   :  { %v3408_v6 = vadd.f32 1.0, %v4797_v5 }
0x4984   :  { %4798 = vrcp.f32 %v3408_v6 }
0x498e   :  { %v4799_v46 = vpop.eup %4798 }
0x498f   :  { %v3412_v19 = vmul.f32 %v4799_v46, %v3349_v55 }
0x49f2   :  { %v3415_v10 = vpop.permute.xlu0 %3414 }
0x49f3   :  { %v3417_v41 = vmul.f32 %v4799_v46, %v3415_v10 }
0x49f5   :  { %3419 = vrot.lane.b32.xlu1 %v3417_v41, %s4848_s27 }
0x4a67   :  { %v3420_v12 = vpop.permute.xlu1 %3419 }
0x4a68   :  { %v3422_v2 = vadd.f32 %v3420_v12, %v3412_v19 }
0x4a6a   :  { %4800 = vtanh.f32 %v3422_v2 }
0x4a74   :  { %v4801_v14 = vpop.eup %4800 }
0x4a75   :  { %3425 = vrot.lane.b32.xlu0 %v4801_v14, %s4848_s27 }
0x4ae7   :  { %v3426_v58 = vpop.permute.xlu0 %3425 }
0x4ae8   :  { %v3428_v51 = vmul.f32 %v4799_v46, %v3426_v58 }
0x4aea   :  { %v3430_v40 = vpack.c.bf16 %v3428_v51, %v3428_v51 }
0x4aec   :  { %3432 = vrot.lane.b32.xlu1 %v3430_v40, %s4851_s3 }
0x4b5e   :  { %v3433_v24 = vpop.permute.xlu1 %3432 }
0x4b5f   :  { %4494 = vmatmul.mubr.msk.bf16.vlgmr.msra.gmra.mrb[92].mxu1 %vm510_vm2, %v3433_v24 }
0x4b60   :  { %4506 = vmatpush3.bf16.msra.mxu1 %v5572_v27  ;;  %4509 = vmatprep.mubr.msk.bf16.mxu1 %vm4852_vm3, %v4847_v1 }
0x4b61   :  { %4507 = vmatprep.subr.bf16.mxu1 %v4847_v1 }
0x4b64   :  { %4508 = vmatpush3.bf16.msra.mxu1 %v5580_v60 }
0x4b65   :  { %4521 = vmatprep.subr.bf16.mxu1 %v4847_v1 }
0x4c32   :  { %v3471_v28 = vpop.f32.mrb[92].mxu1 }
0x4c33   :  { %v3477_v39 = vadd.f32 %v3471_v28, %v2582_v48  ;;  %v4495_v31 = vpop.f32.mrb[93].mxu1 }
0x4c34   :  { %v3474_v16 = vpop.f32.mrb[94].mxu1 }
0x4c35   :  { %4802 = vtanh.f32 %v3477_v39  ;;  %v4496_v38 = vpop.f32.mrb[95].mxu1  ;;  %v4036_v27 = vmul.f32 -1.442695, %v3477_v39 }
0x4c36   :  { %v2595_v38 = vadd.f32 %v5850_v53, %v5733_v43 }
0x4c37   :  { %4804 = vpow2.f32 %v4036_v27 }
0x4c3f   :  { %v4803_v52 = vpop.eup %4802 }
0x4c40   :  { %3487 = vrot.lane.b32.xlu0 %v4803_v52, %s4848_s27 }
0x4c41   :  { %v4805_v9 = vpop.eup %4804 }
0x4c42   :  { %v3481_v0 = vadd.f32 1.0, %v4805_v9 }
0x4c44   :  { %4806 = vrcp.f32 %v3481_v0 }
0x4c4e   :  { %v4807_v60 = vpop.eup %4806 }
0x4c4f   :  { %v3485_v7 = vmul.f32 %v4807_v60, %v3422_v2 }
0x4cb2   :  { %v3488_v35 = vpop.permute.xlu0 %3487 }
0x4cb3   :  { %v3490_v36 = vmul.f32 %v4807_v60, %v3488_v35 }
0x4cb5   :  { %3492 = vrot.lane.b32.xlu1 %v3490_v36, %s4848_s27 }
0x4d27   :  { %v3493_v11 = vpop.permute.xlu1 %3492 }
0x4d28   :  { %v3495_v30 = vadd.f32 %v3493_v11, %v3485_v7 }
0x4d2a   :  { %4808 = vtanh.f32 %v3495_v30 }
0x4d34   :  { %v4809_v54 = vpop.eup %4808 }
0x4d35   :  { %3498 = vrot.lane.b32.xlu0 %v4809_v54, %s4848_s27 }
0x4da7   :  { %v3499_v29 = vpop.permute.xlu0 %3498 }
0x4da8   :  { %v3501_v56 = vmul.f32 %v4807_v60, %v3499_v29 }
0x4daa   :  { %v3503_v32 = vpack.c.bf16 %v3501_v56, %v3501_v56 }
0x4dac   :  { %3505 = vrot.lane.b32.xlu1 %v3503_v32, %s4851_s3 }
0x4e1e   :  { %v3506_v33 = vpop.permute.xlu1 %3505 }
0x4e1f   :  { %4502 = vmatmul.mubr.msk.bf16.vlgmr.msra.gmra.mrb[96].mxu0 %vm510_vm2, %v3506_v33 }
0x4e20   :  { %4514 = vmatpush3.bf16.msra.mxu0 %v4844_v23  ;;  %4517 = vmatprep.mubr.msk.bf16.mxu0 %vm4852_vm3, %v4847_v1 }
0x4e21   :  { %4515 = vmatprep.subr.bf16.mxu0 %v4847_v1 }
0x4e24   :  { %4516 = vmatpush3.bf16.msra.mxu0 %v4845_v62 }
0x4ef2   :  { %v3544_v18 = vpop.f32.mrb[96].mxu0 }
0x4ef3   :  { %v3550_v17 = vadd.f32 %v3544_v18, %v2587_v45  ;;  %v4503_v8 = vpop.f32.mrb[97].mxu0  ;;  %v2598_v18 = vadd.f32 %v5850_v53, %v5737_v22 }
0x4ef4   :  { %v3547_v3 = vpop.f32.mrb[98].mxu0 }
0x4ef5   :  { %4810 = vtanh.f32 %v3550_v17  ;;  %v4504_v59 = vpop.f32.mrb[99].mxu0  ;;  %v4038_v13 = vmul.f32 -1.442695, %v3550_v17 }
0x4ef7   :  { %4812 = vpow2.f32 %v4038_v13 }
0x4eff   :  { %v4811_v37 = vpop.eup %4810 }
0x4f00   :  { %3560 = vrot.lane.b32.xlu0 %v4811_v37, %s4848_s27 }
0x4f01   :  { %v4813_v55 = vpop.eup %4812 }
0x4f02   :  { %v3554_v20 = vadd.f32 1.0, %v4813_v55 }
0x4f04   :  { %4814 = vrcp.f32 %v3554_v20 }
0x4f0e   :  { %v4815_v49 = vpop.eup %4814 }
0x4f0f   :  { %v3558_v47 = vmul.f32 %v4815_v49, %v3495_v30 }
0x4f72   :  { %v3561_v42 = vpop.permute.xlu0 %3560 }
0x4f73   :  { %v3563_v57 = vmul.f32 %v4815_v49, %v3561_v42 }
0x4f75   :  { %3565 = vrot.lane.b32.xlu1 %v3563_v57, %s4848_s27 }
0x4fe7   :  { %v3566_v63 = vpop.permute.xlu1 %3565 }
0x4fe8   :  { %v3568_v21 = vadd.f32 %v3566_v63, %v3558_v47 }
0x4fea   :  { %4816 = vtanh.f32 %v3568_v21 }
0x4ff4   :  { %v4817_v34 = vpop.eup %4816 }
0x4ff5   :  { %3571 = vrot.lane.b32.xlu0 %v4817_v34, %s4848_s27  ;;  %v3794_v34 = vld [vmem:[%s5914_s11] sm:$0xff] }
0x5067   :  { %v3572_v15 = vpop.permute.xlu0 %3571 }
0x5068   :  { %v3574_v61 = vmul.f32 %v4815_v49, %v3572_v15  ;;  %v3795_v15 = vld [vmem:[%s5914_s11 + $0x8] sm:$0xff] }
0x506a   :  { %v3576_v50 = vpack.c.bf16 %v3574_v61, %v3574_v61  ;;  %v3796_v61 = vld [vmem:[%s5914_s11 + $0x10] sm:$0xff] }
0x506c   :  { %3578 = vrot.lane.b32.xlu1 %v3576_v50, %s4851_s3  ;;  %v4541_v50 = vpack.c.bf16 %v3795_v15, %v3794_v34 }
0x50de   :  { %v3579_v4 = vpop.permute.xlu1 %3578 }
0x50df   :  { %4510 = vmatmul.mubr.msk.bf16.vlgmr.msra.gmra.mrb[96].mxu1 %vm510_vm2, %v3579_v4  ;;  %v3797_v4 = vld [vmem:[%s5914_s11 + $0x18] sm:$0xff] }
0x50e0   :  { %4522 = vmatpush3.bf16.msra.mxu1 %v4844_v23  ;;  %4525 = vmatprep.mubr.msk.bf16.mxu1 %vm4852_vm3, %v4847_v1 }
0x50e1   :  { %4523 = vmatprep.subr.bf16.mxu1 %v4847_v1 }
0x50e4   :  { %4524 = vmatpush3.bf16.msra.mxu1 %v4845_v62 }
0x51b2   :  { %v3617_v26 = vpop.f32.mrb[96].mxu1 }
0x51b3   :  { %v3623_v5 = vadd.f32 %v3617_v26, %v2590_v25  ;;  %v4511_v6 = vpop.f32.mrb[97].mxu1  ;;  %v4544_v25 = vpack.c.bf16 %v3797_v4, %v3796_v61 }
0x51b4   :  { %v3620_v46 = vpop.f32.mrb[98].mxu1 }
0x51b5   :  { %4818 = vtanh.f32 %v3623_v5  ;;  %v4512_v10 = vpop.f32.mrb[99].mxu1  ;;  %v4040_v19 = vmul.f32 -1.442695, %v3623_v5 }
0x51b6   :  { %v4045_v10 = vld [vmem:[%s5915_s12] ss:$0 sm:$0xff] }
0x51b7   :  { %4820 = vpow2.f32 %v4040_v19 }
0x51bf   :  { %v4819_v41 = vpop.eup %4818 }
0x51c0   :  { %3633 = vrot.lane.b32.xlu0 %v4819_v41, %s4848_s27 }
0x51c1   :  { %v4821_v12 = vpop.eup %4820 }
0x51c2   :  { %v3627_v2 = vadd.f32 1.0, %v4821_v12 }
0x51c4   :  { %4822 = vrcp.f32 %v3627_v2 }
0x51ce   :  { %v4823_v14 = vpop.eup %4822 }
0x51cf   :  { %v3631_v44 = vmul.f32 %v4823_v14, %v3568_v21  ;;  %v4853_v21 = vmov 0.0|0.0  }
0x51d0   :  { %4540 = vmatprep.subr.bf16.mxu0 %v4853_v21 }
0x5232   :  { %v3634_v58 = vpop.permute.xlu0 %3633 }
0x5233   :  { %v3636_v51 = vmul.f32 %v4823_v14, %v3634_v58 }
0x5235   :  { %3638 = vrot.lane.b32.xlu1 %v3636_v51, %s4848_s27 }
0x52a7   :  { %v3639_v40 = vpop.permute.xlu1 %3638 }
0x52a8   :  { %v3641_v24 = vadd.f32 %v3639_v40, %v3631_v44 }
0x52aa   :  { %4824 = vtanh.f32 %v3641_v24 }
0x52b4   :  { %v4825_v48 = vpop.eup %4824 }
0x52b5   :  { %3644 = vrot.lane.b32.xlu0 %v4825_v48, %s4848_s27 }
0x5327   :  { %v3645_v28 = vpop.permute.xlu0 %3644 }
0x5328   :  { %v3647_v39 = vmul.f32 %v4823_v14, %v3645_v28 }
0x532a   :  { %v3649_v31 = vpack.c.bf16 %v3647_v39, %v3647_v39 }
0x532c   :  { %3651 = vrot.lane.b32.xlu1 %v3649_v31, %s4851_s3 }
0x539e   :  { %v3652_v16 = vpop.permute.xlu1 %3651 }
0x539f   :  { %4518 = vmatmul.mubr.msk.bf16.vlgmr.msra.gmra.mrb[100].mxu0 %vm510_vm2, %v3652_v16 }
0x53a0   :  { %4537 = vmatprep.mubr.msk.f32.mxu0 %vm4852_vm3, %v4847_v1  ;;  %4542 = vmatpush3.bf16.msra.mxu0 %v4541_v50 }
0x53a1   :  { %4543 = vmatprep.subr.bf16.mxu0 %v4853_v21 }
0x53a4   :  { %4545 = vmatpush3.bf16.msra.mxu0 %v4544_v25 }
0x5472   :  { %v3690_v52 = vpop.f32.mrb[100].mxu0 }
0x5473   :  { %v3696_v27 = vadd.f32 %v3690_v52, %v2595_v38  ;;  %v4519_v9 = vpop.f32.mrb[101].mxu0 }
0x5474   :  { %v3693_v0 = vpop.f32.mrb[102].mxu0 }
0x5475   :  { %4826 = vtanh.f32 %v3696_v27  ;;  %v4520_v60 = vpop.f32.mrb[103].mxu0  ;;  %v4042_v36 = vmul.f32 -1.442695, %v3696_v27 }
0x5477   :  { %4828 = vpow2.f32 %v4042_v36 }
0x547f   :  { %v4827_v35 = vpop.eup %4826 }
0x5480   :  { %3706 = vrot.lane.b32.xlu0 %v4827_v35, %s4848_s27 }
0x5481   :  { %v4829_v7 = vpop.eup %4828 }
0x5482   :  { %v3700_v11 = vadd.f32 1.0, %v4829_v7 }
0x5484   :  { %4830 = vrcp.f32 %v3700_v11 }
0x548e   :  { %v4831_v30 = vpop.eup %4830 }
0x548f   :  { %v3704_v43 = vmul.f32 %v4831_v30, %v3641_v24 }
0x54f2   :  { %v3707_v54 = vpop.permute.xlu0 %3706 }
0x54f3   :  { %v3709_v1 = vmul.f32 %v4831_v30, %v3707_v54 }
0x54f5   :  { %3711 = vrot.lane.b32.xlu1 %v3709_v1, %s4848_s27 }
0x5567   :  { %v3712_v29 = vpop.permute.xlu1 %3711 }
0x5568   :  { %v3714_v56 = vadd.f32 %v3712_v29, %v3704_v43 }
0x556a   :  { %4832 = vtanh.f32 %v3714_v56 }
0x5574   :  { %v4833_v32 = vpop.eup %4832 }
0x5575   :  { %3717 = vrot.lane.b32.xlu0 %v4833_v32, %s4848_s27 }
0x55e7   :  { %v3718_v33 = vpop.permute.xlu0 %3717 }
0x55e8   :  { %v3720_v23 = vmul.f32 %v4831_v30, %v3718_v33 }
0x55ea   :  { %v3722_v62 = vpack.c.bf16 %v3720_v23, %v3720_v23 }
0x55ec   :  { %3724 = vrot.lane.b32.xlu1 %v3722_v62, %s4851_s3 }
0x565e   :  { %v3725_v45 = vpop.permute.xlu1 %3724 }
0x565f   :  { %4526 = vmatmul.mubr.msk.bf16.vlgmr.msra.gmra.mrb[100].mxu1 %vm510_vm2, %v3725_v45 }
0x5732   :  { %v3763_v17 = vpop.f32.mrb[100].mxu1 }
0x5733   :  { %v3769_v8 = vadd.f32 %v3763_v17, %v2598_v18  ;;  %v4527_v3 = vpop.f32.mrb[101].mxu1 }
0x5734   :  { %v3766_v59 = vpop.f32.mrb[102].mxu1 }
0x5735   :  { %4834 = vtanh.f32 %v3769_v8  ;;  %v4528_v37 = vpop.f32.mrb[103].mxu1  ;;  %v4044_v55 = vmul.f32 -1.442695, %v3769_v8 }
0x5737   :  { %4836 = vpow2.f32 %v4044_v55 }
0x573f   :  { %v4835_v13 = vpop.eup %4834 }
0x5740   :  { %3779 = vrot.lane.b32.xlu0 %v4835_v13, %s4848_s27 }
0x5741   :  { %v4837_v20 = vpop.eup %4836 }
0x5742   :  { %v3773_v49 = vadd.f32 1.0, %v4837_v20 }
0x5744   :  { %4838 = vrcp.f32 %v3773_v49 }
0x574e   :  { %v4839_v42 = vpop.eup %4838 }
0x574f   :  { %v3777_v22 = vmul.f32 %v4839_v42, %v3714_v56 }
0x57b2   :  { %v3780_v57 = vpop.permute.xlu0 %3779 }
0x57b3   :  { %v3782_v47 = vmul.f32 %v4839_v42, %v3780_v57 }
0x57b5   :  { %3784 = vrot.lane.b32.xlu1 %v3782_v47, %s4848_s27 }
0x5827   :  { %v3785_v53 = vpop.permute.xlu1 %3784 }
0x5828   :  { %v3787_v63 = vadd.f32 %v3785_v53, %v3777_v22 }
0x582a   :  { %4840 = vtanh.f32 %v3787_v63 }
0x5834   :  { %v4841_v26 = vpop.eup %4840 }
0x5835   :  { %3790 = vrot.lane.b32.xlu0 %v4841_v26, %s4848_s27 }
0x58a7   :  { %v3791_v5 = vpop.permute.xlu0 %3790 }
0x58a8   :  { %v3793_v6 = vmul.f32 %v4839_v42, %v3791_v5 }
0x58aa   :  { %3806 = vrot.lane.b32.xlu1 %v3793_v6, %s4851_s3 }
0x591c   :  { %v3807_v46 = vpop.permute.xlu1 %3806 }
0x591d   :  { %4538 = vmatmul.mubr.msk.f32.vlgmr.msra.gmra.mrb[104].mxu0 %vm510_vm2, %v3807_v46 }
0x59f0   :  { %v3876_v41 = vpop.f32.mrb[104].mxu0 }
0x59f1   :  { %v3877_v19 = vadd.f32 %v4045_v10, %v3876_v41  ;;  %v4539_v12 = vpop.f32.mrb[105].mxu0 }
0x59f3   :  { %3880 = vst [vmem:[%s5916_s13] sm:$0xff] %v3877_v19 }

</bundles_post_ra>
